<compile_context>
chip_gen: v7x
topology: tpu7x:2x2x1
jax: 0.10.0
libtpu: 0.0.40
codegen_flags: <defaults>
</compile_context>

<pallas_src>
import functools

import jax
import jax.numpy as jnp
from jax.experimental import pallas as pl
from jax.experimental.pallas import tpu as pltpu


def _round_up(v, m):
    return ((v + m - 1) // m) * m


def _dense(h, w_ref, b_ref):
    # h: [TILE_N, in] (bf16), w_ref: [in, out] (bf16, pre-transposed),
    # b_ref: [1, out].  f32 accumulation on the MXU.
    return (jnp.dot(h, w_ref[...], preferred_element_type=jnp.float32)
            + b_ref[...].astype(jnp.float32))


def dae_kernel(x_ref,
               w_e1, b_e1, w_e2, b_e2, w_e3, b_e3, w_z, b_z,
               w_d1, b_d1, w_d2, b_d2, w_d3, b_d3, w_x, b_x,
               xbar_ref, e2_ref, e3_ref, e4_ref, z_ref):
    cdt = w_e1.dtype                                    # compute dtype (bf16)
    x = x_ref[...].astype(cdt)                          # [TILE_N, n_input]

    e2 = jnp.maximum(_dense(x, w_e1, b_e1), 0.0)                # f32
    e3 = jnp.maximum(_dense(e2.astype(cdt), w_e2, b_e2), 0.0)
    e4 = jnp.maximum(_dense(e3.astype(cdt), w_e3, b_e3), 0.0)
    z = _dense(e4.astype(cdt), w_z, b_z)
    d2 = jnp.maximum(_dense(z.astype(cdt), w_d1, b_d1), 0.0)
    d3 = jnp.maximum(_dense(d2.astype(cdt), w_d2, b_d2), 0.0)
    d4 = jnp.maximum(_dense(d3.astype(cdt), w_d3, b_d3), 0.0)
    xb = _dense(d4.astype(cdt), w_x, b_x)

    xbar_ref[...] = xb.astype(xbar_ref.dtype)
    e2_ref[...] = e2.astype(e2_ref.dtype)
    e3_ref[...] = e3.astype(e3_ref.dtype)
    e4_ref[...] = e4.astype(e4_ref.dtype)
    z_ref[...] = z.astype(z_ref.dtype)


def _vmem_limit_bytes():
    # ~96 MiB on v5e/v6e (128 MiB physical), ~48 MiB on v7x (64 MiB physical).
    try:
        cap = int(pltpu.get_tpu_info().vmem_capacity_bytes)
    except Exception:
        cap = 64 << 20                                 # conservative fallback
    return min(int(cap * 3 // 4), 100 << 20)


def dae_forward(x, weights, biases, *, tile_n=512,
                param_dtype=jnp.bfloat16, out_dtype=jnp.float32,
                single_buffer_weights=True):
    """DAE forward.

    x:       [N, n_input]
    weights: 8 arrays in PyTorch Linear layout [out, in] for
             (enc_1, enc_2, enc_3, z_layer, dec_1, dec_2, dec_3, x_bar_layer)
    biases:  8 arrays [out]
    returns: (x_bar, enc_z2, enc_z3, enc_z4, z), all `out_dtype`
    """
    assert len(weights) == 8 and len(biases) == 8
    n, n_input = x.shape

    wts = [jnp.asarray(w).T.astype(param_dtype) for w in weights]   # [in, out]
    bss = [jnp.asarray(b).reshape(1, -1).astype(param_dtype) for b in biases]
    out_dims = [w.shape[1] for w in wts]
    n_e1, n_e2, n_e3, n_z = out_dims[:4]
    assert wts[7].shape[1] == n_input, "x_bar_layer must map back to n_input"

    out_widths = (n_input, n_e1, n_e2, n_e3, n_z)
    dims_chain = [n_input] + out_dims

    # Stream the input at compute precision (halves input DMA for bf16).
    if x.dtype != param_dtype:
        x = x.astype(param_dtype)

    vmem_limit = _vmem_limit_bytes()

    # --- tile_n selection --------------------------------------------------
    tile_n = _round_up(max(8, int(tile_n)), 8)
    tile_n = min(tile_n, _round_up(n, 8))
    if n > 8:
        # Guarantee >= 2 grid steps so "parallel" can shard rows across both
        # v7x TensorCores even for small batches.
        tile_n = min(tile_n, _round_up((n + 1) // 2, 8))

    weight_bytes = sum(w.size * w.dtype.itemsize + b.size * b.dtype.itemsize
                       for w, b in zip(wts, bss))
    buf_factor = 1 if single_buffer_weights else 2
    out_itemsize = jnp.dtype(out_dtype).itemsize

    def vmem_footprint(t):
        streamed = 2 * t * (n_input * x.dtype.itemsize
                            + sum(out_widths) * out_itemsize)
        interm = t * sum(dims_chain) * 4        # f32 intermediates headroom
        return buf_factor * weight_bytes + streamed + interm

    while tile_n > 8 and vmem_footprint(tile_n) > int(vmem_limit * 0.85):
        tile_n = max(8, _round_up(tile_n // 2, 8))

    n_pad = pl.cdiv(n, tile_n) * tile_n
    if n_pad != n:
        x = jnp.pad(x, ((0, n_pad - n), (0, 0)))
    grid = (n_pad // tile_n,)

    # --- block specs ---------------------------------------------------------
    def row_spec(d):
        return pl.BlockSpec((tile_n, d), lambda i: (i, 0))

    def const_spec(shape):
        if single_buffer_weights:
            # Constant index_map: never re-fetched, one VMEM buffer suffices.
            return pl.BlockSpec(shape, lambda i: (0, 0),
                                pipeline_mode=pl.Buffered(1))
        return pl.BlockSpec(shape, lambda i: (0, 0))

    in_specs = [row_spec(n_input)]
    args = [x]
    for w, b in zip(wts, bss):
        in_specs += [const_spec(w.shape), const_spec(b.shape)]
        args += [w, b]

    out_specs = tuple(row_spec(d) for d in out_widths)
    out_shape = tuple(jax.ShapeDtypeStruct((n_pad, d), out_dtype)
                      for d in out_widths)

    # Advisory cost hint (kernel is HBM-bandwidth bound).
    flops = 2 * n_pad * sum(dims_chain[i] * dims_chain[i + 1] for i in range(8))
    bytes_accessed = (x.dtype.itemsize * n_pad * n_input
                      + out_itemsize * n_pad * sum(out_widths)
                      + weight_bytes)
    cost = pl.CostEstimate(flops=flops, transcendentals=0,
                           bytes_accessed=bytes_accessed)

    outs = pl.pallas_call(
        dae_kernel,
        grid=grid,
        in_specs=in_specs,
        out_specs=out_specs,
        out_shape=out_shape,
        compiler_params=pltpu.CompilerParams(
            dimension_semantics=("parallel",),
            vmem_limit_bytes=vmem_limit),
        cost_estimate=cost,
    )(*args)

    if n_pad != n:
        outs = tuple(o[:n] for o in outs)
    return outs  # (x_bar, enc_z2, enc_z3, enc_z4, z)


if __name__ == "__main__":
    key = jax.random.PRNGKey(0)

    # Small shapes consistent with the DAE forward (8 Linear layers).
    N = 200
    n_input, n_enc_1, n_enc_2, n_enc_3 = 64, 128, 64, 128
    n_z = 16
    n_dec_1, n_dec_2, n_dec_3 = 128, 64, 128

    layer_io = [(n_input, n_enc_1), (n_enc_1, n_enc_2), (n_enc_2, n_enc_3),
                (n_enc_3, n_z), (n_z, n_dec_1), (n_dec_1, n_dec_2),
                (n_dec_2, n_dec_3), (n_dec_3, n_input)]

    keys = jax.random.split(key, 2 * len(layer_io) + 1)
    weights, biases = [], []
    for li, (fin, fout) in enumerate(layer_io):
        bound = 1.0 / (fin ** 0.5)   # PyTorch Linear default init range
        weights.append(jax.random.uniform(keys[2 * li], (fout, fin),
                                          jnp.float32, -bound, bound))
        biases.append(jax.random.uniform(keys[2 * li + 1], (fout,),
                                         jnp.float32, -bound, bound))
    x = jax.random.normal(keys[-1], (N, n_input), jnp.float32)

    # Always call under jit so wrapper-side transposes/casts/pad/slices fuse
    # instead of paying separate HBM passes.
    def make_runner(single_buffer):
        return jax.jit(functools.partial(
            dae_forward, tile_n=512, single_buffer_weights=single_buffer))

    try:
        outs = jax.block_until_ready(make_runner(True)(x, weights, biases))
    except Exception:
        # Fallback if this JAX build rejects pl.Buffered(1) for pallas_call.
        outs = jax.block_until_ready(make_runner(False)(x, weights, biases))

    x_bar, enc_z2, enc_z3, enc_z4, z = outs

    # Pure-JAX reference matching the kernel's precision policy
    # (bf16 weights/activations, f32 accumulation).
    def dense_ref(h, w, b):
        return (jnp.dot(h.astype(jnp.bfloat16), w.astype(jnp.bfloat16).T,
                        preferred_element_type=jnp.float32)
                + b.astype(jnp.bfloat16).astype(jnp.float32))

    def ref(xv):
        e2 = jax.nn.relu(dense_ref(xv, weights[0], biases[0]))
        e3 = jax.nn.relu(dense_ref(e2, weights[1], biases[1]))
        e4 = jax.nn.relu(dense_ref(e3, weights[2], biases[2]))
        zz = dense_ref(e4, weights[3], biases[3])
        d2 = jax.nn.relu(dense_ref(zz, weights[4], biases[4]))
        d3 = jax.nn.relu(dense_ref(d2, weights[5], biases[5]))
        d4 = jax.nn.relu(dense_ref(d3, weights[6], biases[6]))
        xb = dense_ref(d4, weights[7], biases[7])
        return xb, e2, e3, e4, zz

    refs = jax.block_until_ready(jax.jit(ref)(x))

    assert x_bar.shape == (N, n_input)
    assert enc_z2.shape == (N, n_enc_1)
    assert enc_z3.shape == (N, n_enc_2)
    assert enc_z4.shape == (N, n_enc_3)
    assert z.shape == (N, n_z)
    for got, want in zip(outs, refs):
        assert got.shape == want.shape
        assert bool(jnp.allclose(jnp.asarray(got, jnp.float32),
                                 jnp.asarray(want, jnp.float32),
                                 atol=2e-2, rtol=2e-2))

    print("KERNEL_OK")
</pallas_src>

<mosaic_0001>
module attributes {stable_mosaic.version = 11 : i64} {
  func.func @dae_kernel(%arg0: i32, %arg1: memref<104x64xbf16, #tpu.memory_space<vmem>>, %arg2: memref<64x128xbf16, #tpu.memory_space<vmem>>, %arg3: memref<1x128xbf16, #tpu.memory_space<vmem>>, %arg4: memref<128x64xbf16, #tpu.memory_space<vmem>>, %arg5: memref<1x64xbf16, #tpu.memory_space<vmem>>, %arg6: memref<64x128xbf16, #tpu.memory_space<vmem>>, %arg7: memref<1x128xbf16, #tpu.memory_space<vmem>>, %arg8: memref<128x16xbf16, #tpu.memory_space<vmem>>, %arg9: memref<1x16xbf16, #tpu.memory_space<vmem>>, %arg10: memref<16x128xbf16, #tpu.memory_space<vmem>>, %arg11: memref<1x128xbf16, #tpu.memory_space<vmem>>, %arg12: memref<128x64xbf16, #tpu.memory_space<vmem>>, %arg13: memref<1x64xbf16, #tpu.memory_space<vmem>>, %arg14: memref<64x128xbf16, #tpu.memory_space<vmem>>, %arg15: memref<1x128xbf16, #tpu.memory_space<vmem>>, %arg16: memref<128x64xbf16, #tpu.memory_space<vmem>>, %arg17: memref<1x64xbf16, #tpu.memory_space<vmem>>, %arg18: memref<104x64xf32, #tpu.memory_space<vmem>>, %arg19: memref<104x128xf32, #tpu.memory_space<vmem>>, %arg20: memref<104x64xf32, #tpu.memory_space<vmem>>, %arg21: memref<104x128xf32, #tpu.memory_space<vmem>>, %arg22: memref<104x16xf32, #tpu.memory_space<vmem>>) attributes {dimension_semantics = [#tpu.dimension_semantics<parallel>], iteration_bounds = array<i64: 2>, scalar_prefetch = 0 : i64, scratch_operands = 0 : i64, tpu.core_type = #tpu.core_type<tc>, window_params = [{transform_indices = @transform_0, window_bounds = array<i64: 104, 64>}, {pipeline_mode = #tpu.pipeline_mode<synchronous>, transform_indices = @transform_1, window_bounds = array<i64: 64, 128>}, {pipeline_mode = #tpu.pipeline_mode<synchronous>, transform_indices = @transform_2, window_bounds = array<i64: 1, 128>}, {pipeline_mode = #tpu.pipeline_mode<synchronous>, transform_indices = @transform_3, window_bounds = array<i64: 128, 64>}, {pipeline_mode = #tpu.pipeline_mode<synchronous>, transform_indices = @transform_4, window_bounds = array<i64: 1, 64>}, {pipeline_mode = #tpu.pipeline_mode<synchronous>, transform_indices = @transform_5, window_bounds = array<i64: 64, 128>}, {pipeline_mode = #tpu.pipeline_mode<synchronous>, transform_indices = @transform_6, window_bounds = array<i64: 1, 128>}, {pipeline_mode = #tpu.pipeline_mode<synchronous>, transform_indices = @transform_7, window_bounds = array<i64: 128, 16>}, {pipeline_mode = #tpu.pipeline_mode<synchronous>, transform_indices = @transform_8, window_bounds = array<i64: 1, 16>}, {pipeline_mode = #tpu.pipeline_mode<synchronous>, transform_indices = @transform_9, window_bounds = array<i64: 16, 128>}, {pipeline_mode = #tpu.pipeline_mode<synchronous>, transform_indices = @transform_10, window_bounds = array<i64: 1, 128>}, {pipeline_mode = #tpu.pipeline_mode<synchronous>, transform_indices = @transform_11, window_bounds = array<i64: 128, 64>}, {pipeline_mode = #tpu.pipeline_mode<synchronous>, transform_indices = @transform_12, window_bounds = array<i64: 1, 64>}, {pipeline_mode = #tpu.pipeline_mode<synchronous>, transform_indices = @transform_13, window_bounds = array<i64: 64, 128>}, {pipeline_mode = #tpu.pipeline_mode<synchronous>, transform_indices = @transform_14, window_bounds = array<i64: 1, 128>}, {pipeline_mode = #tpu.pipeline_mode<synchronous>, transform_indices = @transform_15, window_bounds = array<i64: 128, 64>}, {pipeline_mode = #tpu.pipeline_mode<synchronous>, transform_indices = @transform_16, window_bounds = array<i64: 1, 64>}, {transform_indices = @transform_17, window_bounds = array<i64: 104, 64>}, {transform_indices = @transform_18, window_bounds = array<i64: 104, 128>}, {transform_indices = @transform_19, window_bounds = array<i64: 104, 64>}, {transform_indices = @transform_20, window_bounds = array<i64: 104, 128>}, {transform_indices = @transform_21, window_bounds = array<i64: 104, 16>}]} {
    %c0 = arith.constant 0 : index
    %c0_0 = arith.constant 0 : index
    %0 = vector.load %arg1[%c0, %c0_0] : memref<104x64xbf16, #tpu.memory_space<vmem>>, vector<104x64xbf16>
    %c0_1 = arith.constant 0 : index
    %c0_2 = arith.constant 0 : index
    %1 = vector.load %arg2[%c0_1, %c0_2] : memref<64x128xbf16, #tpu.memory_space<vmem>>, vector<64x128xbf16>
    %cst = arith.constant dense<0.000000e+00> : vector<104x128xf32>
    %2 = tpu.matmul %0, %1, %cst {dimension_numbers = #tpu.dot_dimension_numbers<[1], [0], [0], [1], [0, 0, 1, 1], [], []>} : vector<104x64xbf16>, vector<64x128xbf16>, vector<104x128xf32> -> vector<104x128xf32>
    %c0_3 = arith.constant 0 : index
    %c0_4 = arith.constant 0 : index
    %3 = vector.load %arg3[%c0_3, %c0_4] : memref<1x128xbf16, #tpu.memory_space<vmem>>, vector<1x128xbf16>
    %4 = arith.extf %3 : vector<1x128xbf16> to vector<1x128xf32>
    %5 = vector.broadcast %4 : vector<1x128xf32> to vector<104x128xf32>
    %6 = arith.addf %2, %5 : vector<104x128xf32>
    %cst_5 = arith.constant 0.000000e+00 : f32
    %7 = vector.broadcast %cst_5 : f32 to vector<104x128xf32>
    %8 = arith.maximumf %6, %7 : vector<104x128xf32>
    %9 = arith.truncf %8 : vector<104x128xf32> to vector<104x128xbf16>
    %c0_6 = arith.constant 0 : index
    %c0_7 = arith.constant 0 : index
    %10 = vector.load %arg4[%c0_6, %c0_7] : memref<128x64xbf16, #tpu.memory_space<vmem>>, vector<128x64xbf16>
    %cst_8 = arith.constant dense<0.000000e+00> : vector<104x64xf32>
    %11 = tpu.matmul %9, %10, %cst_8 {dimension_numbers = #tpu.dot_dimension_numbers<[1], [0], [0], [1], [0, 0, 1, 1], [], []>} : vector<104x128xbf16>, vector<128x64xbf16>, vector<104x64xf32> -> vector<104x64xf32>
    %c0_9 = arith.constant 0 : index
    %c0_10 = arith.constant 0 : index
    %12 = vector.load %arg5[%c0_9, %c0_10] : memref<1x64xbf16, #tpu.memory_space<vmem>>, vector<1x64xbf16>
    %13 = arith.extf %12 : vector<1x64xbf16> to vector<1x64xf32>
    %14 = vector.broadcast %13 : vector<1x64xf32> to vector<104x64xf32>
    %15 = arith.addf %11, %14 : vector<104x64xf32>
    %cst_11 = arith.constant 0.000000e+00 : f32
    %16 = vector.broadcast %cst_11 : f32 to vector<104x64xf32>
    %17 = arith.maximumf %15, %16 : vector<104x64xf32>
    %18 = arith.truncf %17 : vector<104x64xf32> to vector<104x64xbf16>
    %c0_12 = arith.constant 0 : index
    %c0_13 = arith.constant 0 : index
    %19 = vector.load %arg6[%c0_12, %c0_13] : memref<64x128xbf16, #tpu.memory_space<vmem>>, vector<64x128xbf16>
    %cst_14 = arith.constant dense<0.000000e+00> : vector<104x128xf32>
    %20 = tpu.matmul %18, %19, %cst_14 {dimension_numbers = #tpu.dot_dimension_numbers<[1], [0], [0], [1], [0, 0, 1, 1], [], []>} : vector<104x64xbf16>, vector<64x128xbf16>, vector<104x128xf32> -> vector<104x128xf32>
    %c0_15 = arith.constant 0 : index
    %c0_16 = arith.constant 0 : index
    %21 = vector.load %arg7[%c0_15, %c0_16] : memref<1x128xbf16, #tpu.memory_space<vmem>>, vector<1x128xbf16>
    %22 = arith.extf %21 : vector<1x128xbf16> to vector<1x128xf32>
    %23 = vector.broadcast %22 : vector<1x128xf32> to vector<104x128xf32>
    %24 = arith.addf %20, %23 : vector<104x128xf32>
    %cst_17 = arith.constant 0.000000e+00 : f32
    %25 = vector.broadcast %cst_17 : f32 to vector<104x128xf32>
    %26 = arith.maximumf %24, %25 : vector<104x128xf32>
    %27 = arith.truncf %26 : vector<104x128xf32> to vector<104x128xbf16>
    %c0_18 = arith.constant 0 : index
    %c0_19 = arith.constant 0 : index
    %28 = vector.load %arg8[%c0_18, %c0_19] : memref<128x16xbf16, #tpu.memory_space<vmem>>, vector<128x16xbf16>
    %cst_20 = arith.constant dense<0.000000e+00> : vector<104x16xf32>
    %29 = tpu.matmul %27, %28, %cst_20 {dimension_numbers = #tpu.dot_dimension_numbers<[1], [0], [0], [1], [0, 0, 1, 1], [], []>} : vector<104x128xbf16>, vector<128x16xbf16>, vector<104x16xf32> -> vector<104x16xf32>
    %c0_21 = arith.constant 0 : index
    %c0_22 = arith.constant 0 : index
    %30 = vector.load %arg9[%c0_21, %c0_22] : memref<1x16xbf16, #tpu.memory_space<vmem>>, vector<1x16xbf16>
    %31 = arith.extf %30 : vector<1x16xbf16> to vector<1x16xf32>
    %32 = vector.broadcast %31 : vector<1x16xf32> to vector<104x16xf32>
    %33 = arith.addf %29, %32 : vector<104x16xf32>
    %34 = arith.truncf %33 : vector<104x16xf32> to vector<104x16xbf16>
    %c0_23 = arith.constant 0 : index
    %c0_24 = arith.constant 0 : index
    %35 = vector.load %arg10[%c0_23, %c0_24] : memref<16x128xbf16, #tpu.memory_space<vmem>>, vector<16x128xbf16>
    %cst_25 = arith.constant dense<0.000000e+00> : vector<104x128xf32>
    %36 = tpu.matmul %34, %35, %cst_25 {dimension_numbers = #tpu.dot_dimension_numbers<[1], [0], [0], [1], [0, 0, 1, 1], [], []>} : vector<104x16xbf16>, vector<16x128xbf16>, vector<104x128xf32> -> vector<104x128xf32>
    %c0_26 = arith.constant 0 : index
    %c0_27 = arith.constant 0 : index
    %37 = vector.load %arg11[%c0_26, %c0_27] : memref<1x128xbf16, #tpu.memory_space<vmem>>, vector<1x128xbf16>
    %38 = arith.extf %37 : vector<1x128xbf16> to vector<1x128xf32>
    %39 = vector.broadcast %38 : vector<1x128xf32> to vector<104x128xf32>
    %40 = arith.addf %36, %39 : vector<104x128xf32>
    %cst_28 = arith.constant 0.000000e+00 : f32
    %41 = vector.broadcast %cst_28 : f32 to vector<104x128xf32>
    %42 = arith.maximumf %40, %41 : vector<104x128xf32>
    %43 = arith.truncf %42 : vector<104x128xf32> to vector<104x128xbf16>
    %c0_29 = arith.constant 0 : index
    %c0_30 = arith.constant 0 : index
    %44 = vector.load %arg12[%c0_29, %c0_30] : memref<128x64xbf16, #tpu.memory_space<vmem>>, vector<128x64xbf16>
    %cst_31 = arith.constant dense<0.000000e+00> : vector<104x64xf32>
    %45 = tpu.matmul %43, %44, %cst_31 {dimension_numbers = #tpu.dot_dimension_numbers<[1], [0], [0], [1], [0, 0, 1, 1], [], []>} : vector<104x128xbf16>, vector<128x64xbf16>, vector<104x64xf32> -> vector<104x64xf32>
    %c0_32 = arith.constant 0 : index
    %c0_33 = arith.constant 0 : index
    %46 = vector.load %arg13[%c0_32, %c0_33] : memref<1x64xbf16, #tpu.memory_space<vmem>>, vector<1x64xbf16>
    %47 = arith.extf %46 : vector<1x64xbf16> to vector<1x64xf32>
    %48 = vector.broadcast %47 : vector<1x64xf32> to vector<104x64xf32>
    %49 = arith.addf %45, %48 : vector<104x64xf32>
    %cst_34 = arith.constant 0.000000e+00 : f32
    %50 = vector.broadcast %cst_34 : f32 to vector<104x64xf32>
    %51 = arith.maximumf %49, %50 : vector<104x64xf32>
    %52 = arith.truncf %51 : vector<104x64xf32> to vector<104x64xbf16>
    %c0_35 = arith.constant 0 : index
    %c0_36 = arith.constant 0 : index
    %53 = vector.load %arg14[%c0_35, %c0_36] : memref<64x128xbf16, #tpu.memory_space<vmem>>, vector<64x128xbf16>
    %cst_37 = arith.constant dense<0.000000e+00> : vector<104x128xf32>
    %54 = tpu.matmul %52, %53, %cst_37 {dimension_numbers = #tpu.dot_dimension_numbers<[1], [0], [0], [1], [0, 0, 1, 1], [], []>} : vector<104x64xbf16>, vector<64x128xbf16>, vector<104x128xf32> -> vector<104x128xf32>
    %c0_38 = arith.constant 0 : index
    %c0_39 = arith.constant 0 : index
    %55 = vector.load %arg15[%c0_38, %c0_39] : memref<1x128xbf16, #tpu.memory_space<vmem>>, vector<1x128xbf16>
    %56 = arith.extf %55 : vector<1x128xbf16> to vector<1x128xf32>
    %57 = vector.broadcast %56 : vector<1x128xf32> to vector<104x128xf32>
    %58 = arith.addf %54, %57 : vector<104x128xf32>
    %cst_40 = arith.constant 0.000000e+00 : f32
    %59 = vector.broadcast %cst_40 : f32 to vector<104x128xf32>
    %60 = arith.maximumf %58, %59 : vector<104x128xf32>
    %61 = arith.truncf %60 : vector<104x128xf32> to vector<104x128xbf16>
    %c0_41 = arith.constant 0 : index
    %c0_42 = arith.constant 0 : index
    %62 = vector.load %arg16[%c0_41, %c0_42] : memref<128x64xbf16, #tpu.memory_space<vmem>>, vector<128x64xbf16>
    %cst_43 = arith.constant dense<0.000000e+00> : vector<104x64xf32>
    %63 = tpu.matmul %61, %62, %cst_43 {dimension_numbers = #tpu.dot_dimension_numbers<[1], [0], [0], [1], [0, 0, 1, 1], [], []>} : vector<104x128xbf16>, vector<128x64xbf16>, vector<104x64xf32> -> vector<104x64xf32>
    %c0_44 = arith.constant 0 : index
    %c0_45 = arith.constant 0 : index
    %64 = vector.load %arg17[%c0_44, %c0_45] : memref<1x64xbf16, #tpu.memory_space<vmem>>, vector<1x64xbf16>
    %65 = arith.extf %64 : vector<1x64xbf16> to vector<1x64xf32>
    %66 = vector.broadcast %65 : vector<1x64xf32> to vector<104x64xf32>
    %67 = arith.addf %63, %66 : vector<104x64xf32>
    %c0_46 = arith.constant 0 : index
    %c0_47 = arith.constant 0 : index
    %68 = vector.load %arg18[%c0_46, %c0_47] : memref<104x64xf32, #tpu.memory_space<vmem>>, vector<104x64xf32>
    tpu.vector_store %arg18[%c0_46, %c0_47], %67 {strides = array<i32>} : memref<104x64xf32, #tpu.memory_space<vmem>>, vector<104x64xf32>,
    %c0_48 = arith.constant 0 : index
    %c0_49 = arith.constant 0 : index
    %69 = vector.load %arg19[%c0_48, %c0_49] : memref<104x128xf32, #tpu.memory_space<vmem>>, vector<104x128xf32>
    tpu.vector_store %arg19[%c0_48, %c0_49], %8 {strides = array<i32>} : memref<104x128xf32, #tpu.memory_space<vmem>>, vector<104x128xf32>,
    %c0_50 = arith.constant 0 : index
    %c0_51 = arith.constant 0 : index
    %70 = vector.load %arg20[%c0_50, %c0_51] : memref<104x64xf32, #tpu.memory_space<vmem>>, vector<104x64xf32>
    tpu.vector_store %arg20[%c0_50, %c0_51], %17 {strides = array<i32>} : memref<104x64xf32, #tpu.memory_space<vmem>>, vector<104x64xf32>,
    %c0_52 = arith.constant 0 : index
    %c0_53 = arith.constant 0 : index
    %71 = vector.load %arg21[%c0_52, %c0_53] : memref<104x128xf32, #tpu.memory_space<vmem>>, vector<104x128xf32>
    tpu.vector_store %arg21[%c0_52, %c0_53], %26 {strides = array<i32>} : memref<104x128xf32, #tpu.memory_space<vmem>>, vector<104x128xf32>,
    %c0_54 = arith.constant 0 : index
    %c0_55 = arith.constant 0 : index
    %72 = vector.load %arg22[%c0_54, %c0_55] : memref<104x16xf32, #tpu.memory_space<vmem>>, vector<104x16xf32>
    tpu.vector_store %arg22[%c0_54, %c0_55], %33 {strides = array<i32>} : memref<104x16xf32, #tpu.memory_space<vmem>>, vector<104x16xf32>,
    return
  }
  func.func @transform_0(%arg0: i32) -> (i32, i32) {
    %c0_i32 = arith.constant 0 : i32
    %c0_i32_0 = arith.constant 0 : i32
    return %arg0, %c0_i32 : i32, i32
  }
  func.func @transform_1(%arg0: i32) -> (i32, i32) {
    %c0_i32 = arith.constant 0 : i32
    %c0_i32_0 = arith.constant 0 : i32
    %c0_i32_1 = arith.constant 0 : i32
    return %c0_i32, %c0_i32_0 : i32, i32
  }
  func.func @transform_2(%arg0: i32) -> (i32, i32) {
    %c0_i32 = arith.constant 0 : i32
    %c0_i32_0 = arith.constant 0 : i32
    %c0_i32_1 = arith.constant 0 : i32
    return %c0_i32, %c0_i32_0 : i32, i32
  }
  func.func @transform_3(%arg0: i32) -> (i32, i32) {
    %c0_i32 = arith.constant 0 : i32
    %c0_i32_0 = arith.constant 0 : i32
    %c0_i32_1 = arith.constant 0 : i32
    return %c0_i32, %c0_i32_0 : i32, i32
  }
  func.func @transform_4(%arg0: i32) -> (i32, i32) {
    %c0_i32 = arith.constant 0 : i32
    %c0_i32_0 = arith.constant 0 : i32
    %c0_i32_1 = arith.constant 0 : i32
    return %c0_i32, %c0_i32_0 : i32, i32
  }
  func.func @transform_5(%arg0: i32) -> (i32, i32) {
    %c0_i32 = arith.constant 0 : i32
    %c0_i32_0 = arith.constant 0 : i32
    %c0_i32_1 = arith.constant 0 : i32
    return %c0_i32, %c0_i32_0 : i32, i32
  }
  func.func @transform_6(%arg0: i32) -> (i32, i32) {
    %c0_i32 = arith.constant 0 : i32
    %c0_i32_0 = arith.constant 0 : i32
    %c0_i32_1 = arith.constant 0 : i32
    return %c0_i32, %c0_i32_0 : i32, i32
  }
  func.func @transform_7(%arg0: i32) -> (i32, i32) {
    %c0_i32 = arith.constant 0 : i32
    %c0_i32_0 = arith.constant 0 : i32
    %c0_i32_1 = arith.constant 0 : i32
    return %c0_i32, %c0_i32_0 : i32, i32
  }
  func.func @transform_8(%arg0: i32) -> (i32, i32) {
    %c0_i32 = arith.constant 0 : i32
    %c0_i32_0 = arith.constant 0 : i32
    %c0_i32_1 = arith.constant 0 : i32
    return %c0_i32, %c0_i32_0 : i32, i32
  }
  func.func @transform_9(%arg0: i32) -> (i32, i32) {
    %c0_i32 = arith.constant 0 : i32
    %c0_i32_0 = arith.constant 0 : i32
    %c0_i32_1 = arith.constant 0 : i32
    return %c0_i32, %c0_i32_0 : i32, i32
  }
  func.func @transform_10(%arg0: i32) -> (i32, i32) {
    %c0_i32 = arith.constant 0 : i32
    %c0_i32_0 = arith.constant 0 : i32
    %c0_i32_1 = arith.constant 0 : i32
    return %c0_i32, %c0_i32_0 : i32, i32
  }
  func.func @transform_11(%arg0: i32) -> (i32, i32) {
    %c0_i32 = arith.constant 0 : i32
    %c0_i32_0 = arith.constant 0 : i32
    %c0_i32_1 = arith.constant 0 : i32
    return %c0_i32, %c0_i32_0 : i32, i32
  }
  func.func @transform_12(%arg0: i32) -> (i32, i32) {
    %c0_i32 = arith.constant 0 : i32
    %c0_i32_0 = arith.constant 0 : i32
    %c0_i32_1 = arith.constant 0 : i32
    return %c0_i32, %c0_i32_0 : i32, i32
  }
  func.func @transform_13(%arg0: i32) -> (i32, i32) {
    %c0_i32 = arith.constant 0 : i32
    %c0_i32_0 = arith.constant 0 : i32
    %c0_i32_1 = arith.constant 0 : i32
    return %c0_i32, %c0_i32_0 : i32, i32
  }
  func.func @transform_14(%arg0: i32) -> (i32, i32) {
    %c0_i32 = arith.constant 0 : i32
    %c0_i32_0 = arith.constant 0 : i32
    %c0_i32_1 = arith.constant 0 : i32
    return %c0_i32, %c0_i32_0 : i32, i32
  }
  func.func @transform_15(%arg0: i32) -> (i32, i32) {
    %c0_i32 = arith.constant 0 : i32
    %c0_i32_0 = arith.constant 0 : i32
    %c0_i32_1 = arith.constant 0 : i32
    return %c0_i32, %c0_i32_0 : i32, i32
  }
  func.func @transform_16(%arg0: i32) -> (i32, i32) {
    %c0_i32 = arith.constant 0 : i32
    %c0_i32_0 = arith.constant 0 : i32
    %c0_i32_1 = arith.constant 0 : i32
    return %c0_i32, %c0_i32_0 : i32, i32
  }
  func.func @transform_17(%arg0: i32) -> (i32, i32) {
    %c0_i32 = arith.constant 0 : i32
    %c0_i32_0 = arith.constant 0 : i32
    return %arg0, %c0_i32 : i32, i32
  }
  func.func @transform_18(%arg0: i32) -> (i32, i32) {
    %c0_i32 = arith.constant 0 : i32
    %c0_i32_0 = arith.constant 0 : i32
    return %arg0, %c0_i32 : i32, i32
  }
  func.func @transform_19(%arg0: i32) -> (i32, i32) {
    %c0_i32 = arith.constant 0 : i32
    %c0_i32_0 = arith.constant 0 : i32
    return %arg0, %c0_i32 : i32, i32
  }
  func.func @transform_20(%arg0: i32) -> (i32, i32) {
    %c0_i32 = arith.constant 0 : i32
    %c0_i32_0 = arith.constant 0 : i32
    return %arg0, %c0_i32 : i32, i32
  }
  func.func @transform_21(%arg0: i32) -> (i32, i32) {
    %c0_i32 = arith.constant 0 : i32
    %c0_i32_0 = arith.constant 0 : i32
    return %arg0, %c0_i32 : i32, i32
  }
}

module attributes {stable_mosaic.version = 11 : i64} {
  func.func @dae_kernel(%arg0: i32, %arg1: memref<104x64xbf16, #tpu.memory_space<vmem>>, %arg2: memref<64x128xbf16, #tpu.memory_space<vmem>>, %arg3: memref<1x128xbf16, #tpu.memory_space<vmem>>, %arg4: memref<128x64xbf16, #tpu.memory_space<vmem>>, %arg5: memref<1x64xbf16, #tpu.memory_space<vmem>>, %arg6: memref<64x128xbf16, #tpu.memory_space<vmem>>, %arg7: memref<1x128xbf16, #tpu.memory_space<vmem>>, %arg8: memref<128x16xbf16, #tpu.memory_space<vmem>>, %arg9: memref<1x16xbf16, #tpu.memory_space<vmem>>, %arg10: memref<16x128xbf16, #tpu.memory_space<vmem>>, %arg11: memref<1x128xbf16, #tpu.memory_space<vmem>>, %arg12: memref<128x64xbf16, #tpu.memory_space<vmem>>, %arg13: memref<1x64xbf16, #tpu.memory_space<vmem>>, %arg14: memref<64x128xbf16, #tpu.memory_space<vmem>>, %arg15: memref<1x128xbf16, #tpu.memory_space<vmem>>, %arg16: memref<128x64xbf16, #tpu.memory_space<vmem>>, %arg17: memref<1x64xbf16, #tpu.memory_space<vmem>>, %arg18: memref<104x64xf32, #tpu.memory_space<vmem>>, %arg19: memref<104x128xf32, #tpu.memory_space<vmem>>, %arg20: memref<104x64xf32, #tpu.memory_space<vmem>>, %arg21: memref<104x128xf32, #tpu.memory_space<vmem>>, %arg22: memref<104x16xf32, #tpu.memory_space<vmem>>) attributes {dimension_semantics = [#tpu.dimension_semantics<parallel>], iteration_bounds = array<i64: 2>, scalar_prefetch = 0 : i64, scratch_operands = 0 : i64, tpu.core_type = #tpu.core_type<tc>, window_params = [{transform_indices = @transform_0, window_bounds = array<i64: 104, 64>}, {pipeline_mode = #tpu.pipeline_mode<synchronous>, transform_indices = @transform_1, window_bounds = array<i64: 64, 128>}, {pipeline_mode = #tpu.pipeline_mode<synchronous>, transform_indices = @transform_2, window_bounds = array<i64: 1, 128>}, {pipeline_mode = #tpu.pipeline_mode<synchronous>, transform_indices = @transform_3, window_bounds = array<i64: 128, 64>}, {pipeline_mode = #tpu.pipeline_mode<synchronous>, transform_indices = @transform_4, window_bounds = array<i64: 1, 64>}, {pipeline_mode = #tpu.pipeline_mode<synchronous>, transform_indices = @transform_5, window_bounds = array<i64: 64, 128>}, {pipeline_mode = #tpu.pipeline_mode<synchronous>, transform_indices = @transform_6, window_bounds = array<i64: 1, 128>}, {pipeline_mode = #tpu.pipeline_mode<synchronous>, transform_indices = @transform_7, window_bounds = array<i64: 128, 16>}, {pipeline_mode = #tpu.pipeline_mode<synchronous>, transform_indices = @transform_8, window_bounds = array<i64: 1, 16>}, {pipeline_mode = #tpu.pipeline_mode<synchronous>, transform_indices = @transform_9, window_bounds = array<i64: 16, 128>}, {pipeline_mode = #tpu.pipeline_mode<synchronous>, transform_indices = @transform_10, window_bounds = array<i64: 1, 128>}, {pipeline_mode = #tpu.pipeline_mode<synchronous>, transform_indices = @transform_11, window_bounds = array<i64: 128, 64>}, {pipeline_mode = #tpu.pipeline_mode<synchronous>, transform_indices = @transform_12, window_bounds = array<i64: 1, 64>}, {pipeline_mode = #tpu.pipeline_mode<synchronous>, transform_indices = @transform_13, window_bounds = array<i64: 64, 128>}, {pipeline_mode = #tpu.pipeline_mode<synchronous>, transform_indices = @transform_14, window_bounds = array<i64: 1, 128>}, {pipeline_mode = #tpu.pipeline_mode<synchronous>, transform_indices = @transform_15, window_bounds = array<i64: 128, 64>}, {pipeline_mode = #tpu.pipeline_mode<synchronous>, transform_indices = @transform_16, window_bounds = array<i64: 1, 64>}, {transform_indices = @transform_17, window_bounds = array<i64: 104, 64>}, {transform_indices = @transform_18, window_bounds = array<i64: 104, 128>}, {transform_indices = @transform_19, window_bounds = array<i64: 104, 64>}, {transform_indices = @transform_20, window_bounds = array<i64: 104, 128>}, {transform_indices = @transform_21, window_bounds = array<i64: 104, 16>}]} {
    %c0 = arith.constant 0 : index
    %c0_0 = arith.constant 0 : index
    %0 = vector.load %arg1[%c0, %c0_0] : memref<104x64xbf16, #tpu.memory_space<vmem>>, vector<104x64xbf16>
    %c0_1 = arith.constant 0 : index
    %c0_2 = arith.constant 0 : index
    %1 = vector.load %arg2[%c0_1, %c0_2] : memref<64x128xbf16, #tpu.memory_space<vmem>>, vector<64x128xbf16>
    %cst = arith.constant dense<0.000000e+00> : vector<104x128xf32>
    %2 = tpu.matmul %0, %1, %cst {dimension_numbers = #tpu.dot_dimension_numbers<[1], [0], [0], [1], [0, 0, 1, 1], [], []>} : vector<104x64xbf16>, vector<64x128xbf16>, vector<104x128xf32> -> vector<104x128xf32>
    %c0_3 = arith.constant 0 : index
    %c0_4 = arith.constant 0 : index
    %3 = vector.load %arg3[%c0_3, %c0_4] : memref<1x128xbf16, #tpu.memory_space<vmem>>, vector<1x128xbf16>
    %4 = arith.extf %3 : vector<1x128xbf16> to vector<1x128xf32>
    %5 = vector.broadcast %4 : vector<1x128xf32> to vector<104x128xf32>
    %6 = arith.addf %2, %5 : vector<104x128xf32>
    %cst_5 = arith.constant 0.000000e+00 : f32
    %7 = vector.broadcast %cst_5 : f32 to vector<104x128xf32>
    %8 = arith.maximumf %6, %7 : vector<104x128xf32>
    %9 = arith.truncf %8 : vector<104x128xf32> to vector<104x128xbf16>
    %c0_6 = arith.constant 0 : index
    %c0_7 = arith.constant 0 : index
    %10 = vector.load %arg4[%c0_6, %c0_7] : memref<128x64xbf16, #tpu.memory_space<vmem>>, vector<128x64xbf16>
    %cst_8 = arith.constant dense<0.000000e+00> : vector<104x64xf32>
    %11 = tpu.matmul %9, %10, %cst_8 {dimension_numbers = #tpu.dot_dimension_numbers<[1], [0], [0], [1], [0, 0, 1, 1], [], []>} : vector<104x128xbf16>, vector<128x64xbf16>, vector<104x64xf32> -> vector<104x64xf32>
    %c0_9 = arith.constant 0 : index
    %c0_10 = arith.constant 0 : index
    %12 = vector.load %arg5[%c0_9, %c0_10] : memref<1x64xbf16, #tpu.memory_space<vmem>>, vector<1x64xbf16>
    %13 = arith.extf %12 : vector<1x64xbf16> to vector<1x64xf32>
    %14 = vector.broadcast %13 : vector<1x64xf32> to vector<104x64xf32>
    %15 = arith.addf %11, %14 : vector<104x64xf32>
    %cst_11 = arith.constant 0.000000e+00 : f32
    %16 = vector.broadcast %cst_11 : f32 to vector<104x64xf32>
    %17 = arith.maximumf %15, %16 : vector<104x64xf32>
    %18 = arith.truncf %17 : vector<104x64xf32> to vector<104x64xbf16>
    %c0_12 = arith.constant 0 : index
    %c0_13 = arith.constant 0 : index
    %19 = vector.load %arg6[%c0_12, %c0_13] : memref<64x128xbf16, #tpu.memory_space<vmem>>, vector<64x128xbf16>
    %cst_14 = arith.constant dense<0.000000e+00> : vector<104x128xf32>
    %20 = tpu.matmul %18, %19, %cst_14 {dimension_numbers = #tpu.dot_dimension_numbers<[1], [0], [0], [1], [0, 0, 1, 1], [], []>} : vector<104x64xbf16>, vector<64x128xbf16>, vector<104x128xf32> -> vector<104x128xf32>
    %c0_15 = arith.constant 0 : index
    %c0_16 = arith.constant 0 : index
    %21 = vector.load %arg7[%c0_15, %c0_16] : memref<1x128xbf16, #tpu.memory_space<vmem>>, vector<1x128xbf16>
    %22 = arith.extf %21 : vector<1x128xbf16> to vector<1x128xf32>
    %23 = vector.broadcast %22 : vector<1x128xf32> to vector<104x128xf32>
    %24 = arith.addf %20, %23 : vector<104x128xf32>
    %cst_17 = arith.constant 0.000000e+00 : f32
    %25 = vector.broadcast %cst_17 : f32 to vector<104x128xf32>
    %26 = arith.maximumf %24, %25 : vector<104x128xf32>
    %27 = arith.truncf %26 : vector<104x128xf32> to vector<104x128xbf16>
    %c0_18 = arith.constant 0 : index
    %c0_19 = arith.constant 0 : index
    %28 = vector.load %arg8[%c0_18, %c0_19] : memref<128x16xbf16, #tpu.memory_space<vmem>>, vector<128x16xbf16>
    %cst_20 = arith.constant dense<0.000000e+00> : vector<104x16xf32>
    %29 = tpu.matmul %27, %28, %cst_20 {dimension_numbers = #tpu.dot_dimension_numbers<[1], [0], [0], [1], [0, 0, 1, 1], [], []>} : vector<104x128xbf16>, vector<128x16xbf16>, vector<104x16xf32> -> vector<104x16xf32>
    %c0_21 = arith.constant 0 : index
    %c0_22 = arith.constant 0 : index
    %30 = vector.load %arg9[%c0_21, %c0_22] : memref<1x16xbf16, #tpu.memory_space<vmem>>, vector<1x16xbf16>
    %31 = arith.extf %30 : vector<1x16xbf16> to vector<1x16xf32>
    %32 = vector.broadcast %31 : vector<1x16xf32> to vector<104x16xf32>
    %33 = arith.addf %29, %32 : vector<104x16xf32>
    %34 = arith.truncf %33 : vector<104x16xf32> to vector<104x16xbf16>
    %c0_23 = arith.constant 0 : index
    %c0_24 = arith.constant 0 : index
    %35 = vector.load %arg10[%c0_23, %c0_24] : memref<16x128xbf16, #tpu.memory_space<vmem>>, vector<16x128xbf16>
    %cst_25 = arith.constant dense<0.000000e+00> : vector<104x128xf32>
    %36 = tpu.matmul %34, %35, %cst_25 {dimension_numbers = #tpu.dot_dimension_numbers<[1], [0], [0], [1], [0, 0, 1, 1], [], []>} : vector<104x16xbf16>, vector<16x128xbf16>, vector<104x128xf32> -> vector<104x128xf32>
    %c0_26 = arith.constant 0 : index
    %c0_27 = arith.constant 0 : index
    %37 = vector.load %arg11[%c0_26, %c0_27] : memref<1x128xbf16, #tpu.memory_space<vmem>>, vector<1x128xbf16>
    %38 = arith.extf %37 : vector<1x128xbf16> to vector<1x128xf32>
    %39 = vector.broadcast %38 : vector<1x128xf32> to vector<104x128xf32>
    %40 = arith.addf %36, %39 : vector<104x128xf32>
    %cst_28 = arith.constant 0.000000e+00 : f32
    %41 = vector.broadcast %cst_28 : f32 to vector<104x128xf32>
    %42 = arith.maximumf %40, %41 : vector<104x128xf32>
    %43 = arith.truncf %42 : vector<104x128xf32> to vector<104x128xbf16>
    %c0_29 = arith.constant 0 : index
    %c0_30 = arith.constant 0 : index
    %44 = vector.load %arg12[%c0_29, %c0_30] : memref<128x64xbf16, #tpu.memory_space<vmem>>, vector<128x64xbf16>
    %cst_31 = arith.constant dense<0.000000e+00> : vector<104x64xf32>
    %45 = tpu.matmul %43, %44, %cst_31 {dimension_numbers = #tpu.dot_dimension_numbers<[1], [0], [0], [1], [0, 0, 1, 1], [], []>} : vector<104x128xbf16>, vector<128x64xbf16>, vector<104x64xf32> -> vector<104x64xf32>
    %c0_32 = arith.constant 0 : index
    %c0_33 = arith.constant 0 : index
    %46 = vector.load %arg13[%c0_32, %c0_33] : memref<1x64xbf16, #tpu.memory_space<vmem>>, vector<1x64xbf16>
    %47 = arith.extf %46 : vector<1x64xbf16> to vector<1x64xf32>
    %48 = vector.broadcast %47 : vector<1x64xf32> to vector<104x64xf32>
    %49 = arith.addf %45, %48 : vector<104x64xf32>
    %cst_34 = arith.constant 0.000000e+00 : f32
    %50 = vector.broadcast %cst_34 : f32 to vector<104x64xf32>
    %51 = arith.maximumf %49, %50 : vector<104x64xf32>
    %52 = arith.truncf %51 : vector<104x64xf32> to vector<104x64xbf16>
    %c0_35 = arith.constant 0 : index
    %c0_36 = arith.constant 0 : index
    %53 = vector.load %arg14[%c0_35, %c0_36] : memref<64x128xbf16, #tpu.memory_space<vmem>>, vector<64x128xbf16>
    %cst_37 = arith.constant dense<0.000000e+00> : vector<104x128xf32>
    %54 = tpu.matmul %52, %53, %cst_37 {dimension_numbers = #tpu.dot_dimension_numbers<[1], [0], [0], [1], [0, 0, 1, 1], [], []>} : vector<104x64xbf16>, vector<64x128xbf16>, vector<104x128xf32> -> vector<104x128xf32>
    %c0_38 = arith.constant 0 : index
    %c0_39 = arith.constant 0 : index
    %55 = vector.load %arg15[%c0_38, %c0_39] : memref<1x128xbf16, #tpu.memory_space<vmem>>, vector<1x128xbf16>
    %56 = arith.extf %55 : vector<1x128xbf16> to vector<1x128xf32>
    %57 = vector.broadcast %56 : vector<1x128xf32> to vector<104x128xf32>
    %58 = arith.addf %54, %57 : vector<104x128xf32>
    %cst_40 = arith.constant 0.000000e+00 : f32
    %59 = vector.broadcast %cst_40 : f32 to vector<104x128xf32>
    %60 = arith.maximumf %58, %59 : vector<104x128xf32>
    %61 = arith.truncf %60 : vector<104x128xf32> to vector<104x128xbf16>
    %c0_41 = arith.constant 0 : index
    %c0_42 = arith.constant 0 : index
    %62 = vector.load %arg16[%c0_41, %c0_42] : memref<128x64xbf16, #tpu.memory_space<vmem>>, vector<128x64xbf16>
    %cst_43 = arith.constant dense<0.000000e+00> : vector<104x64xf32>
    %63 = tpu.matmul %61, %62, %cst_43 {dimension_numbers = #tpu.dot_dimension_numbers<[1], [0], [0], [1], [0, 0, 1, 1], [], []>} : vector<104x128xbf16>, vector<128x64xbf16>, vector<104x64xf32> -> vector<104x64xf32>
    %c0_44 = arith.constant 0 : index
    %c0_45 = arith.constant 0 : index
    %64 = vector.load %arg17[%c0_44, %c0_45] : memref<1x64xbf16, #tpu.memory_space<vmem>>, vector<1x64xbf16>
    %65 = arith.extf %64 : vector<1x64xbf16> to vector<1x64xf32>
    %66 = vector.broadcast %65 : vector<1x64xf32> to vector<104x64xf32>
    %67 = arith.addf %63, %66 : vector<104x64xf32>
    %c0_46 = arith.constant 0 : index
    %c0_47 = arith.constant 0 : index
    %68 = vector.load %arg18[%c0_46, %c0_47] : memref<104x64xf32, #tpu.memory_space<vmem>>, vector<104x64xf32>
    tpu.vector_store %arg18[%c0_46, %c0_47], %67 {strides = array<i32>} : memref<104x64xf32, #tpu.memory_space<vmem>>, vector<104x64xf32>,
    %c0_48 = arith.constant 0 : index
    %c0_49 = arith.constant 0 : index
    %69 = vector.load %arg19[%c0_48, %c0_49] : memref<104x128xf32, #tpu.memory_space<vmem>>, vector<104x128xf32>
    tpu.vector_store %arg19[%c0_48, %c0_49], %8 {strides = array<i32>} : memref<104x128xf32, #tpu.memory_space<vmem>>, vector<104x128xf32>,
    %c0_50 = arith.constant 0 : index
    %c0_51 = arith.constant 0 : index
    %70 = vector.load %arg20[%c0_50, %c0_51] : memref<104x64xf32, #tpu.memory_space<vmem>>, vector<104x64xf32>
    tpu.vector_store %arg20[%c0_50, %c0_51], %17 {strides = array<i32>} : memref<104x64xf32, #tpu.memory_space<vmem>>, vector<104x64xf32>,
    %c0_52 = arith.constant 0 : index
    %c0_53 = arith.constant 0 : index
    %71 = vector.load %arg21[%c0_52, %c0_53] : memref<104x128xf32, #tpu.memory_space<vmem>>, vector<104x128xf32>
    tpu.vector_store %arg21[%c0_52, %c0_53], %26 {strides = array<i32>} : memref<104x128xf32, #tpu.memory_space<vmem>>, vector<104x128xf32>,
    %c0_54 = arith.constant 0 : index
    %c0_55 = arith.constant 0 : index
    %72 = vector.load %arg22[%c0_54, %c0_55] : memref<104x16xf32, #tpu.memory_space<vmem>>, vector<104x16xf32>
    tpu.vector_store %arg22[%c0_54, %c0_55], %33 {strides = array<i32>} : memref<104x16xf32, #tpu.memory_space<vmem>>, vector<104x16xf32>,
    return
  }
  func.func @transform_0(%arg0: i32) -> (i32, i32) {
    %c0_i32 = arith.constant 0 : i32
    %c0_i32_0 = arith.constant 0 : i32
    return %arg0, %c0_i32 : i32, i32
  }
  func.func @transform_1(%arg0: i32) -> (i32, i32) {
    %c0_i32 = arith.constant 0 : i32
    %c0_i32_0 = arith.constant 0 : i32
    %c0_i32_1 = arith.constant 0 : i32
    return %c0_i32, %c0_i32_0 : i32, i32
  }
  func.func @transform_2(%arg0: i32) -> (i32, i32) {
    %c0_i32 = arith.constant 0 : i32
    %c0_i32_0 = arith.constant 0 : i32
    %c0_i32_1 = arith.constant 0 : i32
    return %c0_i32, %c0_i32_0 : i32, i32
  }
  func.func @transform_3(%arg0: i32) -> (i32, i32) {
    %c0_i32 = arith.constant 0 : i32
    %c0_i32_0 = arith.constant 0 : i32
    %c0_i32_1 = arith.constant 0 : i32
    return %c0_i32, %c0_i32_0 : i32, i32
  }
  func.func @transform_4(%arg0: i32) -> (i32, i32) {
    %c0_i32 = arith.constant 0 : i32
    %c0_i32_0 = arith.constant 0 : i32
    %c0_i32_1 = arith.constant 0 : i32
    return %c0_i32, %c0_i32_0 : i32, i32
  }
  func.func @transform_5(%arg0: i32) -> (i32, i32) {
    %c0_i32 = arith.constant 0 : i32
    %c0_i32_0 = arith.constant 0 : i32
    %c0_i32_1 = arith.constant 0 : i32
    return %c0_i32, %c0_i32_0 : i32, i32
  }
  func.func @transform_6(%arg0: i32) -> (i32, i32) {
    %c0_i32 = arith.constant 0 : i32
    %c0_i32_0 = arith.constant 0 : i32
    %c0_i32_1 = arith.constant 0 : i32
    return %c0_i32, %c0_i32_0 : i32, i32
  }
  func.func @transform_7(%arg0: i32) -> (i32, i32) {
    %c0_i32 = arith.constant 0 : i32
    %c0_i32_0 = arith.constant 0 : i32
    %c0_i32_1 = arith.constant 0 : i32
    return %c0_i32, %c0_i32_0 : i32, i32
  }
  func.func @transform_8(%arg0: i32) -> (i32, i32) {
    %c0_i32 = arith.constant 0 : i32
    %c0_i32_0 = arith.constant 0 : i32
    %c0_i32_1 = arith.constant 0 : i32
    return %c0_i32, %c0_i32_0 : i32, i32
  }
  func.func @transform_9(%arg0: i32) -> (i32, i32) {
    %c0_i32 = arith.constant 0 : i32
    %c0_i32_0 = arith.constant 0 : i32
    %c0_i32_1 = arith.constant 0 : i32
    return %c0_i32, %c0_i32_0 : i32, i32
  }
  func.func @transform_10(%arg0: i32) -> (i32, i32) {
    %c0_i32 = arith.constant 0 : i32
    %c0_i32_0 = arith.constant 0 : i32
    %c0_i32_1 = arith.constant 0 : i32
    return %c0_i32, %c0_i32_0 : i32, i32
  }
  func.func @transform_11(%arg0: i32) -> (i32, i32) {
    %c0_i32 = arith.constant 0 : i32
    %c0_i32_0 = arith.constant 0 : i32
    %c0_i32_1 = arith.constant 0 : i32
    return %c0_i32, %c0_i32_0 : i32, i32
  }
  func.func @transform_12(%arg0: i32) -> (i32, i32) {
    %c0_i32 = arith.constant 0 : i32
    %c0_i32_0 = arith.constant 0 : i32
    %c0_i32_1 = arith.constant 0 : i32
    return %c0_i32, %c0_i32_0 : i32, i32
  }
  func.func @transform_13(%arg0: i32) -> (i32, i32) {
    %c0_i32 = arith.constant 0 : i32
    %c0_i32_0 = arith.constant 0 : i32
    %c0_i32_1 = arith.constant 0 : i32
    return %c0_i32, %c0_i32_0 : i32, i32
  }
  func.func @transform_14(%arg0: i32) -> (i32, i32) {
    %c0_i32 = arith.constant 0 : i32
    %c0_i32_0 = arith.constant 0 : i32
    %c0_i32_1 = arith.constant 0 : i32
    return %c0_i32, %c0_i32_0 : i32, i32
  }
  func.func @transform_15(%arg0: i32) -> (i32, i32) {
    %c0_i32 = arith.constant 0 : i32
    %c0_i32_0 = arith.constant 0 : i32
    %c0_i32_1 = arith.constant 0 : i32
    return %c0_i32, %c0_i32_0 : i32, i32
  }
  func.func @transform_16(%arg0: i32) -> (i32, i32) {
    %c0_i32 = arith.constant 0 : i32
    %c0_i32_0 = arith.constant 0 : i32
    %c0_i32_1 = arith.constant 0 : i32
    return %c0_i32, %c0_i32_0 : i32, i32
  }
  func.func @transform_17(%arg0: i32) -> (i32, i32) {
    %c0_i32 = arith.constant 0 : i32
    %c0_i32_0 = arith.constant 0 : i32
    return %arg0, %c0_i32 : i32, i32
  }
  func.func @transform_18(%arg0: i32) -> (i32, i32) {
    %c0_i32 = arith.constant 0 : i32
    %c0_i32_0 = arith.constant 0 : i32
    return %arg0, %c0_i32 : i32, i32
  }
  func.func @transform_19(%arg0: i32) -> (i32, i32) {
    %c0_i32 = arith.constant 0 : i32
    %c0_i32_0 = arith.constant 0 : i32
    return %arg0, %c0_i32 : i32, i32
  }
  func.func @transform_20(%arg0: i32) -> (i32, i32) {
    %c0_i32 = arith.constant 0 : i32
    %c0_i32_0 = arith.constant 0 : i32
    return %arg0, %c0_i32 : i32, i32
  }
  func.func @transform_21(%arg0: i32) -> (i32, i32) {
    %c0_i32 = arith.constant 0 : i32
    %c0_i32_0 = arith.constant 0 : i32
    return %arg0, %c0_i32 : i32, i32
  }
}

</mosaic_0001>

<bundles_post_ra>
// kernel: dae_forward.1
= control target key start
LH: loop header
LB: loop body
LE: loop exit
PB: predicated region body
PF: predicated region fallthrough
CT: control target
= control target key end

     0   :  { %s3690_s0 = inlined_call_operand.vmem [shape: bf16[208,64], index: 0, kind: input, shape index: {}]   ;;  %s3691_s1 = inlined_call_operand.vmem [shape: bf16[64,128], index: 1, kind: input, shape index: {}]   ;;  %s3692_s2 = inlined_call_operand.vmem [shape: bf16[1,128], index: 2, kind: input, shape index: {}]   ;;  %s3693_s3 = inlined_call_operand.vmem [shape: bf16[128,64], index: 3, kind: input, shape index: {}]   ;;  %s3694_s4 = inlined_call_operand.vmem [shape: bf16[1,64], index: 4, kind: input, shape index: {}]   ;;  %s3695_s5 = inlined_call_operand.vmem [shape: bf16[64,128], index: 5, kind: input, shape index: {}]   ;;  %s3696_s6 = inlined_call_operand.vmem [shape: bf16[1,128], index: 6, kind: input, shape index: {}]   ;;  %s3697_s7 = inlined_call_operand.vmem [shape: bf16[128,16], index: 7, kind: input, shape index: {}]   ;;  %s3698_s8 = inlined_call_operand.vmem [shape: bf16[1,16], index: 8, kind: input, shape index: {}]   ;;  %s3699_s9 = inlined_call_operand.vmem [shape: bf16[16,128], index: 9, kind: input, shape index: {}]   ;;  %s3700_s10 = inlined_call_operand.vmem [shape: bf16[1,128], index: 10, kind: input, shape index: {}]   ;;  %s3701_s11 = inlined_call_operand.vmem [shape: bf16[128,64], index: 11, kind: input, shape index: {}]   ;;  %s3702_s12 = inlined_call_operand.vmem [shape: bf16[1,64], index: 12, kind: input, shape index: {}]   ;;  %s3703_s13 = inlined_call_operand.vmem [shape: bf16[64,128], index: 13, kind: input, shape index: {}]   ;;  %s3704_s14 = inlined_call_operand.vmem [shape: bf16[1,128], index: 14, kind: input, shape index: {}]   ;;  %s3705_s15 = inlined_call_operand.vmem [shape: bf16[128,64], index: 15, kind: input, shape index: {}]   ;;  %s3706_s16 = inlined_call_operand.vmem [shape: bf16[1,64], index: 16, kind: input, shape index: {}]   ;;  %s3707_s17 = inlined_call_operand.vmem [shape: f32[208,64], index: 17, kind: output, shape index: {0}]   ;;  %s3708_s18 = inlined_call_operand.vmem [shape: f32[208,128], index: 18, kind: output, shape index: {1}]   ;;  %s3709_s19 = inlined_call_operand.vmem [shape: f32[208,64], index: 19, kind: output, shape index: {2}]   ;;  %s3710_s20 = inlined_call_operand.vmem [shape: f32[208,128], index: 20, kind: output, shape index: {3}]   ;;  %s3711_s21 = inlined_call_operand.vmem [shape: f32[208,16], index: 21, kind: output, shape index: {4}]  }
   0x1   :  { %3715 = sst [smem:[#allocation2_spill]] %s3690_s0 }
   0x2   :  { %3716 = sst [smem:[#allocation3_spill]] %s3691_s1 }
   0x3   :  { %3717 = sst [smem:[#allocation4_spill]] %s3692_s2  ;;  %s3048_s2 = smov 0  }
   0x4   :  { %3718 = sst [smem:[#allocation5_spill]] %s3693_s3 }
   0x5   :  { %3719 = sst [smem:[#allocation6_spill]] %s3694_s4 }
   0x6   :  { %3720 = sst [smem:[#allocation7_spill]] %s3695_s5 }
   0x7 LB: > { %s2342_s25 = sadd.s32 4294967295, %s2934_s2   ;;  %p2346_p0 = scmp.ge.s32.totalorder %s2934_s2, 1  ;;  %s2934_s2 = sphi %s3048_s2, %s32_s2  }
   0x8   : > { %p597_p1 = scmp.lt.s32.totalorder %s2934_s2, 3 }
   0xa   : > { %p598_p2 = pnand %p2346_p0, %p597_p1 }
   0xb   : > { %s3721_s3 = sld [smem:[#allocation3_spill]] (!%p598_p2)  ;;  %v2936_v1 = vmov (!%p598_p2), 0.0   ;;  %vm2937_vm0 = vmmov (!%p598_p2), 0   ;;  %s677_s0 = smul.u32 (!%p598_p2), 13, %s2342_s25  ;;  %vm798_vm1 = vcmask (!%p598_p2), 523264   ;;  %v737_v24 = vlaneseq (!%p598_p2) }
   0xc   : > { %601 = sbr.rel (%p598_p2) target bundleno = 1834 (0x72a), region = 88  ;;  %2536 = vmatprep.subr.bf16.mxu0 (!%p598_p2), %v2936_v1  ;;  %2572 = vmatprep.subr.bf16.mxu1 (!%p598_p2), %v2936_v1  ;;  %s3722_s5 = sld [smem:[#allocation5_spill]] (!%p598_p2)  ;;  %vm1452_vm2 = vcmask (!%p598_p2), 130048  }
   0xd   : > { %2544 = vmatprep.mubr.msk.bf16.mxu0 (!%p598_p2), %vm2937_vm0, %v2936_v1  ;;  %2588 = vmatprep.mubr.msk.bf16.mxu1 (!%p598_p2), %vm2937_vm0, %v2936_v1  ;;  %p678_p3 = scmp.lt.s32.totalorder (!%p598_p2), %s677_s0, 25  ;;  %s3723_s4 = sld [smem:[#allocation2_spill]] (!%p598_p2)  ;;  %v738_v25 = vshrl.u32 (!%p598_p2), %v737_v24, 7 }
   0xe   : > { %s3724_s24 = sld [smem:[#allocation7_spill]] (!%p598_p2) }
   0xf   : > { %v3165_v28 = vsub.s32 (!%p598_p2), 0, %v738_v25 }
  0x11   : > { %v2876_v0 = vld [vmem:[%s3721_s3] sm:$0xff] (!%p598_p2)   ;;  %v2877_v2 = vld [vmem:[%s3721_s3 + $0x8] sm:$0xff] (!%p598_p2)   ;;  %v2878_v4 = vld [vmem:[%s3721_s3 + $0x10] sm:$0xff] (!%p598_p2)  }
  0x12   : > { %2537 = vmatpush3.bf16.msra.mxu0 (!%p598_p2), %v2876_v0  ;;  %v2887_v3 = vld [vmem:[%s3722_s5] sm:$0xff] (!%p598_p2)   ;;  %v2888_v5 = vld [vmem:[%s3722_s5 + $0x8] sm:$0xff] (!%p598_p2)   ;;  %v2879_v6 = vld [vmem:[%s3721_s3 + $0x18] sm:$0xff] (!%p598_p2)  }
  0x13   : > { %2538 = vmatprep.subr.bf16.mxu0 %v2936_v1  ;;  %s3728_s0 = smov (!%p678_p3, %s677_s0), 25  ;;  %2573 = vmatpush3.bf16.msra.mxu1 %v2887_v3  ;;  %v2889_v7 = vld [vmem:[%s3722_s5 + $0x10] sm:$0xff]   ;;  %v2890_v9 = vld [vmem:[%s3722_s5 + $0x18] sm:$0xff]   ;;  %v2891_v10 = vld [vmem:[%s3722_s5 + $0x20] sm:$0xff]  }
  0x14   : > { %2574 = vmatprep.subr.bf16.mxu1 %v2936_v1  ;;  %s2347_s25 = sshll.u32 %s3728_s0, 2  ;;  %v2892_v12 = vld [vmem:[%s3722_s5 + $0x28] sm:$0xff]   ;;  %v2893_v18 = vld [vmem:[%s3722_s5 + $0x30] sm:$0xff]   ;;  %v2894_v19 = vld [vmem:[%s3722_s5 + $0x38] sm:$0xff]   ;;  %s3171_s1 = sshll.u32 %s3728_s0, 3 }
  0x15   : > { %s3089_s30 = scalar_lea.vmem %s3723_s4, %s2347_s25  ;;  %v2895_v20 = vld [vmem:[%s3724_s24] sm:$0xff]   ;;  %v2896_v21 = vld [vmem:[%s3724_s24 + $0x8] sm:$0xff]   ;;  %v2897_v22 = vld [vmem:[%s3724_s24 + $0x10] sm:$0xff]   ;;  %s3178_s27 = scalar_lea.vmem %s3708_s18, %s3171_s1 }
  0x16   : > { %2539 = vmatpush3.bf16.msra.mxu0 %v2877_v2  ;;  %v2880_v8 = vld [vmem:[%s3089_s30] sm:$0xff]   ;;  %v2881_v11 = vld [vmem:[%s3089_s30 + $0x8] sm:$0xff]   ;;  %v2882_v13 = vld [vmem:[%s3089_s30 + $0x10] sm:$0xff]   ;;  %s3437_s25 = scalar_lea.vmem %s3711_s21, %s3171_s1  ;;  %s3659_s22 = scalar_lea.vmem %s3707_s17, %s3171_s1 }
  0x17   : > { %2540 = vmatprep.subr.bf16.mxu0 %v2936_v1  ;;  %2575 = vmatpush3.bf16.msra.mxu1 %v2888_v5  ;;  %v2883_v14 = vld [vmem:[%s3089_s30 + $0x18] sm:$0xff]   ;;  %v2884_v15 = vld [vmem:[%s3089_s30 + $0x20] sm:$0xff]   ;;  %v2885_v16 = vld [vmem:[%s3089_s30 + $0x28] sm:$0xff]  }
  0x18   : > { %2576 = vmatprep.subr.bf16.mxu1 %v2936_v1  ;;  %v2886_v17 = vld [vmem:[%s3089_s30 + $0x30] ss:$0 sps:$4 sm:$0xff]   ;;  %v2898_v23 = vld [vmem:[%s3724_s24 + $0x18] sm:$0xff]   ;;  %s3725_s30 = sld [smem:[#allocation4_spill]] }
  0x1a   : > { %2541 = vmatpush3.bf16.msra.mxu0 %v2878_v4 }
  0x1b   : > { %2542 = vmatprep.subr.bf16.mxu0 %v2936_v1  ;;  %2577 = vmatpush3.bf16.msra.mxu1 %v2889_v7 }
  0x1c   : > { %2578 = vmatprep.subr.bf16.mxu1 %v2936_v1 }
  0x1e   : > { %2543 = vmatpush3.bf16.msra.mxu0 %v2879_v6  ;;  %v735_v26 = vld [vmem:[%s3725_s30] sm:$0x1]  ;;  %s3726_s30 = sld [smem:[#allocation6_spill]] }
  0x1f   : > { %2616 = vmatprep.subr.bf16.mxu0 %v2936_v1  ;;  %2579 = vmatpush3.bf16.msra.mxu1 %v2890_v9  ;;  %v736_v27 = vunpack.c.l.bf16 %v735_v26 }
  0x20   : > { %2580 = vmatprep.subr.bf16.mxu1 %v2936_v1 }
  0x21   : > { %2545 = vmatmul.mubr.msk.bf16.vlgmr.msra.gmra.mrb[0].mxu0 %vm798_vm1, %v2880_v8  ;;  %v3168_v29 = vrot.slane %v736_v27, %v3165_v28 }
  0x22   : > { %2548 = vmatprep.mubr.msk.bf16.mxu0 %vm2937_vm0, %v2936_v1  ;;  %2617 = vmatpush3.bf16.msra.mxu0 %v2895_v20 }
  0x23   : > { %2581 = vmatpush3.bf16.msra.mxu1 %v2891_v10  ;;  %2618 = vmatprep.subr.bf16.mxu0 %v2936_v1 }
  0x24   : > { %2582 = vmatprep.subr.bf16.mxu1 %v2936_v1 }
  0x26   : > { %2619 = vmatpush3.bf16.msra.mxu0 %v2896_v21 }
  0x27   : > { %2583 = vmatpush3.bf16.msra.mxu1 %v2892_v12  ;;  %2620 = vmatprep.subr.bf16.mxu0 %v2936_v1 }
  0x28   : > { %2584 = vmatprep.subr.bf16.mxu1 %v2936_v1 }
  0x29   : > { %2549 = vmatmul.mubr.msk.bf16.gmra.mrb[4].mxu0 %vm798_vm1, %v2881_v11 }
  0x2a   : > { %2552 = vmatprep.mubr.msk.bf16.mxu0 %vm2937_vm0, %v2936_v1  ;;  %2621 = vmatpush3.bf16.msra.mxu0 %v2897_v22 }
  0x2b   : > { %2585 = vmatpush3.bf16.msra.mxu1 %v2893_v18  ;;  %2622 = vmatprep.subr.bf16.mxu0 %v2936_v1 }
  0x2c   : > { %2586 = vmatprep.subr.bf16.mxu1 %v2936_v1 }
  0x2e   : > { %2623 = vmatpush3.bf16.msra.mxu0 %v2898_v23 }
  0x2f   : > { %2587 = vmatpush3.bf16.msra.mxu1 %v2894_v19  ;;  %2652 = vmatprep.subr.bf16.mxu0 %v2936_v1 }
  0x30   : > { %2850 = vmatprep.subr.bf16.mxu1 %v2936_v1 }
  0x31   : > { %2553 = vmatmul.mubr.msk.bf16.gmra.mrb[8].mxu0 %vm798_vm1, %v2882_v13 }
  0x32   : > { %2556 = vmatprep.mubr.msk.bf16.mxu0 %vm2937_vm0, %v2936_v1 }
  0x39   : > { %2557 = vmatmul.mubr.msk.bf16.gmra.mrb[12].mxu0 %vm798_vm1, %v2883_v14 }
  0x3a   : > { %2560 = vmatprep.mubr.msk.bf16.mxu0 %vm2937_vm0, %v2936_v1 }
  0x41   : > { %2561 = vmatmul.mubr.msk.bf16.gmra.mrb[16].mxu0 %vm798_vm1, %v2884_v15 }
  0x42   : > { %2564 = vmatprep.mubr.msk.bf16.mxu0 %vm2937_vm0, %v2936_v1 }
  0x49   : > { %2565 = vmatmul.mubr.msk.bf16.gmra.mrb[20].mxu0 %vm798_vm1, %v2885_v16 }
  0x4a   : > { %2568 = vmatprep.mubr.msk.bf16.mxu0 %vm2937_vm0, %v2936_v1 }
  0x51   : > { %2569 = vmatmul.mubr.msk.bf16.gmra.mrb[24].mxu0 %vm798_vm1, %v2886_v17 }
  0x52   : > { %2624 = vmatprep.mubr.msk.bf16.mxu0 %vm2937_vm0, %v2936_v1 }
  0xf4   : > { %v854_v30 = vpop.f32.mrb[0].mxu0 }
  0xf5   : > { %v855_v31 = vadd.f32 %v854_v30, %v3168_v29  ;;  %v2546_v32 = vpop.f32.mrb[1].mxu0  ;;  %v2899_v30 = vld [vmem:[%s3697_s7] sm:$0xff]  }
  0xf6   : > { %v857_v33 = vpop.f32.mrb[2].mxu0  ;;  %v2902_v32 = vld [vmem:[%s3697_s7 + $0x18] sm:$0xff]  }
  0xf7   : > { %v908_v34 = vmax.f32 %v855_v31, 0.0  ;;  %v858_v35 = vadd.f32 %v857_v33, %v3168_v29  ;;  %v2547_v36 = vpop.f32.mrb[3].mxu0  ;;  %v2901_v31 = vld [vmem:[%s3697_s7 + $0x10] sm:$0xff]   ;;  %v3238_v33 = vld [vmem:[%s3697_s7 + $0x20] sm:$0xff]  }
  0xf8   : > { %v944_v36 = vld [vmem:[%s3726_s30] sm:$0x1]  ;;  %s3354_s30 = scalar_lea.vmem %s3710_s20, %s3171_s1 }
  0xf9   : > { %2098 = vst [vmem:[%s3178_s27] sm:$0xff] %v908_v34  ;;  %v909_v37 = vmax.f32 %v858_v35, 0.0  ;;  %v3252_v35 = vld [vmem:[%s3697_s7 + $0x30] sm:$0xff]  }
  0xfb   : > { %v921_v38 = vpack.c.bf16 %v909_v37, %v908_v34  ;;  %2099 = vst [vmem:[%s3178_s27 + $0x8] sm:$0xff] %v909_v37  ;;  %v3245_v34 = vld [vmem:[%s3697_s7 + $0x28] sm:$0xff]   ;;  %v945_v37 = vunpack.c.l.bf16 %v944_v36 }
  0xfc   : > { %v862_v39 = vpop.f32.mrb[4].mxu0 }
  0xfd   : > { %v863_v40 = vadd.f32 %v862_v39, %v3168_v29  ;;  %v2550_v41 = vpop.f32.mrb[5].mxu0  ;;  %2589 = vmatmul.mubr.bf16.vlgmr.msra.gmra.mrb[0].mxu1 %v921_v38  ;;  %v3260_v38 = vrot.slane %v945_v37, %v3165_v28 }
  0xfe   : > { %v865_v42 = vpop.f32.mrb[6].mxu0  ;;  %2592 = vmatprep.mubr.msk.bf16.mxu1 %vm2937_vm0, %v2936_v1  ;;  %2858 = vmatpush3.bf16.msra.mxu1 %v2899_v30 }
  0xff   : > { %v910_v43 = vmax.f32 %v863_v40, 0.0  ;;  %v866_v44 = vadd.f32 %v865_v42, %v3168_v29  ;;  %v2551_v45 = vpop.f32.mrb[7].mxu0  ;;  %2851 = vmatprep.subr.bf16.mxu1 %v2936_v1 }
 0x101   : > { %2100 = vst [vmem:[%s3178_s27 + $0x10] sm:$0xff] %v910_v43  ;;  %v911_v46 = vmax.f32 %v866_v44, 0.0 }
 0x103   : > { %v922_v47 = vpack.c.bf16 %v911_v46, %v910_v43  ;;  %2101 = vst [vmem:[%s3178_s27 + $0x18] sm:$0xff] %v911_v46 }
 0x104   : > { %v870_v48 = vpop.f32.mrb[8].mxu0 }
 0x105   : > { %v871_v49 = vadd.f32 %v870_v48, %v3168_v29  ;;  %v2554_v50 = vpop.f32.mrb[9].mxu0  ;;  %2593 = vmatmul.mubr.bf16.gmra.mrb[4].mxu1 %v922_v47 }
 0x106   : > { %v873_v51 = vpop.f32.mrb[10].mxu0  ;;  %2596 = vmatprep.mubr.msk.bf16.mxu1 %vm2937_vm0, %v2936_v1 }
 0x107   : > { %v912_v52 = vmax.f32 %v871_v49, 0.0  ;;  %v874_v53 = vadd.f32 %v873_v51, %v3168_v29  ;;  %v2555_v54 = vpop.f32.mrb[11].mxu0 }
 0x109   : > { %2102 = vst [vmem:[%s3178_s27 + $0x20] sm:$0xff] %v912_v52  ;;  %v913_v55 = vmax.f32 %v874_v53, 0.0 }
 0x10b   : > { %v923_v56 = vpack.c.bf16 %v913_v55, %v912_v52  ;;  %2103 = vst [vmem:[%s3178_s27 + $0x28] sm:$0xff] %v913_v55 }
 0x10c   : > { %v878_v57 = vpop.f32.mrb[12].mxu0 }
 0x10d   : > { %v879_v58 = vadd.f32 %v878_v57, %v3168_v29  ;;  %v2558_v59 = vpop.f32.mrb[13].mxu0  ;;  %2597 = vmatmul.mubr.bf16.gmra.mrb[8].mxu1 %v923_v56 }
 0x10e   : > { %v881_v60 = vpop.f32.mrb[14].mxu0  ;;  %2600 = vmatprep.mubr.msk.bf16.mxu1 %vm2937_vm0, %v2936_v1 }
 0x10f   : > { %v914_v61 = vmax.f32 %v879_v58, 0.0  ;;  %v882_v62 = vadd.f32 %v881_v60, %v3168_v29  ;;  %v2559_v63 = vpop.f32.mrb[15].mxu0 }
 0x111   : > { %2104 = vst [vmem:[%s3178_s27 + $0x30] sm:$0xff] %v914_v61  ;;  %v915_v0 = vmax.f32 %v882_v62, 0.0 }
 0x113   : > { %v924_v2 = vpack.c.bf16 %v915_v0, %v914_v61  ;;  %2105 = vst [vmem:[%s3178_s27 + $0x38] sm:$0xff] %v915_v0 }
 0x114   : > { %v886_v3 = vpop.f32.mrb[16].mxu0 }
 0x115   : > { %v887_v4 = vadd.f32 %v886_v3, %v3168_v29  ;;  %v2562_v5 = vpop.f32.mrb[17].mxu0  ;;  %2601 = vmatmul.mubr.bf16.gmra.mrb[12].mxu1 %v924_v2 }
 0x116   : > { %v889_v6 = vpop.f32.mrb[18].mxu0  ;;  %2604 = vmatprep.mubr.msk.bf16.mxu1 %vm2937_vm0, %v2936_v1 }
 0x117   : > { %v916_v7 = vmax.f32 %v887_v4, 0.0  ;;  %v890_v8 = vadd.f32 %v889_v6, %v3168_v29  ;;  %v2563_v9 = vpop.f32.mrb[19].mxu0 }
 0x119   : > { %2106 = vst [vmem:[%s3178_s27 + $0x40] sm:$0xff] %v916_v7  ;;  %v917_v10 = vmax.f32 %v890_v8, 0.0 }
 0x11b   : > { %v925_v11 = vpack.c.bf16 %v917_v10, %v916_v7  ;;  %2107 = vst [vmem:[%s3178_s27 + $0x48] sm:$0xff] %v917_v10 }
 0x11c   : > { %v894_v12 = vpop.f32.mrb[20].mxu0 }
 0x11d   : > { %v895_v13 = vadd.f32 %v894_v12, %v3168_v29  ;;  %v2566_v14 = vpop.f32.mrb[21].mxu0  ;;  %2605 = vmatmul.mubr.bf16.gmra.mrb[16].mxu1 %v925_v11 }
 0x11e   : > { %v897_v15 = vpop.f32.mrb[22].mxu0  ;;  %2608 = vmatprep.mubr.msk.bf16.mxu1 %vm2937_vm0, %v2936_v1 }
 0x11f   : > { %v918_v16 = vmax.f32 %v895_v13, 0.0  ;;  %v898_v17 = vadd.f32 %v897_v15, %v3168_v29  ;;  %v2567_v18 = vpop.f32.mrb[23].mxu0 }
 0x121   : > { %2108 = vst [vmem:[%s3178_s27 + $0x50] sm:$0xff] %v918_v16  ;;  %v919_v19 = vmax.f32 %v898_v17, 0.0 }
 0x123   : > { %v926_v20 = vpack.c.bf16 %v919_v19, %v918_v16  ;;  %2109 = vst [vmem:[%s3178_s27 + $0x58] sm:$0xff] %v919_v19 }
 0x124   : > { %v902_v21 = vpop.f32.mrb[24].mxu0 }
 0x125   : > { %2609 = vmatmul.mubr.bf16.gmra.mrb[20].mxu1 %v926_v20  ;;  %v903_v22 = vadd.f32 %v902_v21, %v3168_v29  ;;  %v2570_v23 = vpop.f32.mrb[25].mxu0  ;;  %v2900_v29 = vld [vmem:[%s3697_s7 + $0x8] sm:$0xff]  }
 0x126   : > { %v905_v24 = vpop.f32.mrb[26].mxu0  ;;  %2612 = vmatprep.mubr.msk.bf16.mxu1 %vm2937_vm0, %v2936_v1  ;;  %2859 = vmatpush3.bf16.msra.mxu1 %v2900_v29 }
 0x127   : > { %v920_v25 = vmax.f32 %v903_v22, 0.0  ;;  %v2571_v26 = vpop.f32.mrb[27].mxu0  ;;  %2852 = vmatprep.subr.bf16.mxu1 %v2936_v1 }
 0x129   : > { %v927_v27 = vpack.c.bf16 %v920_v25, %v920_v25  ;;  %2110 = vst [vmem:[%s3178_s27 + $0x60] sm:$0xff] %v920_v25  ;;  %s3267_s27 = scalar_lea.vmem %s3709_s19, %s3171_s1 }
 0x12a   : > { %2860 = vmatpush3.bf16.msra.mxu1 %v2901_v31 }
 0x12b   : > { %2853 = vmatprep.subr.bf16.mxu1 %v2936_v1 }
 0x12d   : > { %2613 = vmatmul.mubr.bf16.gmra.mrb[24].mxu1 %v927_v27 }
 0x12e   : > { %2672 = vmatprep.mubr.msk.bf16.mxu1 %vm2937_vm0, %v2936_v1  ;;  %2861 = vmatpush3.bf16.msra.mxu1 %v2902_v32 }
 0x12f   : > { %2854 = vmatprep.subr.bf16.mxu1 %v2936_v1 }
 0x132   : > { %2862 = vmatpush3.bf16.msra.mxu1 %v3238_v33 }
 0x133   : > { %2855 = vmatprep.subr.bf16.mxu1 %v2936_v1 }
 0x136   : > { %2863 = vmatpush3.bf16.msra.mxu1 %v3245_v34 }
 0x137   : > { %2856 = vmatprep.subr.bf16.mxu1 %v2936_v1 }
 0x13a   : > { %2864 = vmatpush3.bf16.msra.mxu1 %v3252_v35 }
 0x13b   : > { %2857 = vmatprep.subr.bf16.mxu1 %v2936_v1 }
 0x1d0   : > { %v1032_v39 = vpop.f32.mrb[0].mxu1 }
 0x1d1   : > { %v1033_v40 = vadd.f32 %v1032_v39, %v3260_v38  ;;  %v2590_v41 = vpop.f32.mrb[1].mxu1  ;;  %v1114_v39 = vld [vmem:[%s3696_s6] sm:$0x1] }
 0x1d2   : > { %v1035_v42 = vpop.f32.mrb[2].mxu1 }
 0x1d3   : > { %v1086_v43 = vmax.f32 %v1033_v40, 0.0  ;;  %v1036_v44 = vadd.f32 %v1035_v42, %v3260_v38  ;;  %v2591_v45 = vpop.f32.mrb[3].mxu1  ;;  %v1115_v40 = vunpack.c.l.bf16 %v1114_v39 }
 0x1d5   : > { %2111 = vst.msk [vmem:[%s3267_s27] sm:$0xff] %vm798_vm1, %v1086_v43  ;;  %v1087_v46 = vmax.f32 %v1036_v44, 0.0  ;;  %v3347_v41 = vrot.slane %v1115_v40, %v3165_v28 }
 0x1d7   : > { %v1099_v47 = vpack.c.bf16 %v1087_v46, %v1086_v43  ;;  %2112 = vst.msk [vmem:[%s3267_s27 + $0x8] sm:$0xff] %vm798_vm1, %v1087_v46 }
 0x1d8   : > { %v1040_v48 = vpop.f32.mrb[4].mxu1 }
 0x1d9   : > { %v1041_v49 = vadd.f32 %v1040_v48, %v3260_v38  ;;  %v2594_v50 = vpop.f32.mrb[5].mxu1  ;;  %2625 = vmatmul.mubr.msk.bf16.vlgmr.msra.gmra.mrb[28].mxu0 %vm798_vm1, %v1099_v47 }
 0x1da   : > { %v1043_v51 = vpop.f32.mrb[6].mxu1  ;;  %2628 = vmatprep.mubr.msk.bf16.mxu0 %vm2937_vm0, %v2936_v1  ;;  %2653 = vmatpush3.bf16.msra.mxu0 %v2899_v30  ;;  %v2907_v50 = vld [vmem:[%s3699_s9] sm:$0xff]  }
 0x1db   : > { %v1088_v52 = vmax.f32 %v1041_v49, 0.0  ;;  %v1044_v53 = vadd.f32 %v1043_v51, %v3260_v38  ;;  %v2595_v54 = vpop.f32.mrb[7].mxu1  ;;  %2654 = vmatprep.subr.bf16.mxu0 %v2936_v1 }
 0x1dd   : > { %2113 = vst.msk [vmem:[%s3267_s27 + $0x10] sm:$0xff] %vm798_vm1, %v1088_v52  ;;  %v1089_v55 = vmax.f32 %v1044_v53, 0.0 }
 0x1de   : > { %2655 = vmatpush3.bf16.msra.mxu0 %v2900_v29 }
 0x1df   : > { %v1100_v56 = vpack.c.bf16 %v1089_v55, %v1088_v52  ;;  %2114 = vst.msk [vmem:[%s3267_s27 + $0x18] sm:$0xff] %vm798_vm1, %v1089_v55  ;;  %2656 = vmatprep.subr.bf16.mxu0 %v2936_v1 }
 0x1e0   : > { %v1048_v57 = vpop.f32.mrb[8].mxu1 }
 0x1e1   : > { %v1049_v58 = vadd.f32 %v1048_v57, %v3260_v38  ;;  %v2598_v59 = vpop.f32.mrb[9].mxu1  ;;  %2629 = vmatmul.mubr.msk.bf16.gmra.mrb[32].mxu0 %vm798_vm1, %v1100_v56 }
 0x1e2   : > { %v1051_v60 = vpop.f32.mrb[10].mxu1  ;;  %2632 = vmatprep.mubr.msk.bf16.mxu0 %vm2937_vm0, %v2936_v1  ;;  %2657 = vmatpush3.bf16.msra.mxu0 %v2901_v31 }
 0x1e3   : > { %v1090_v61 = vmax.f32 %v1049_v58, 0.0  ;;  %v1052_v62 = vadd.f32 %v1051_v60, %v3260_v38  ;;  %v2599_v63 = vpop.f32.mrb[11].mxu1  ;;  %2658 = vmatprep.subr.bf16.mxu0 %v2936_v1 }
 0x1e5   : > { %2115 = vst.msk [vmem:[%s3267_s27 + $0x20] sm:$0xff] %vm798_vm1, %v1090_v61  ;;  %v1091_v0 = vmax.f32 %v1052_v62, 0.0 }
 0x1e6   : > { %2659 = vmatpush3.bf16.msra.mxu0 %v2902_v32 }
 0x1e7   : > { %v1101_v2 = vpack.c.bf16 %v1091_v0, %v1090_v61  ;;  %2116 = vst.msk [vmem:[%s3267_s27 + $0x28] sm:$0xff] %vm798_vm1, %v1091_v0  ;;  %2660 = vmatprep.subr.bf16.mxu0 %v2936_v1 }
 0x1e8   : > { %v1056_v3 = vpop.f32.mrb[12].mxu1 }
 0x1e9   : > { %v1057_v4 = vadd.f32 %v1056_v3, %v3260_v38  ;;  %v2602_v5 = vpop.f32.mrb[13].mxu1  ;;  %2633 = vmatmul.mubr.msk.bf16.gmra.mrb[36].mxu0 %vm798_vm1, %v1101_v2 }
 0x1ea   : > { %v1059_v6 = vpop.f32.mrb[14].mxu1  ;;  %2636 = vmatprep.mubr.msk.bf16.mxu0 %vm2937_vm0, %v2936_v1  ;;  %2661 = vmatpush3.bf16.msra.mxu0 %v3238_v33 }
 0x1eb   : > { %v1092_v7 = vmax.f32 %v1057_v4, 0.0  ;;  %v1060_v8 = vadd.f32 %v1059_v6, %v3260_v38  ;;  %v2603_v9 = vpop.f32.mrb[15].mxu1  ;;  %2662 = vmatprep.subr.bf16.mxu0 %v2936_v1 }
 0x1ed   : > { %2117 = vst.msk [vmem:[%s3267_s27 + $0x30] sm:$0xff] %vm798_vm1, %v1092_v7  ;;  %v1093_v10 = vmax.f32 %v1060_v8, 0.0 }
 0x1ee   : > { %2663 = vmatpush3.bf16.msra.mxu0 %v3245_v34 }
 0x1ef   : > { %v1102_v11 = vpack.c.bf16 %v1093_v10, %v1092_v7  ;;  %2118 = vst.msk [vmem:[%s3267_s27 + $0x38] sm:$0xff] %vm798_vm1, %v1093_v10  ;;  %2664 = vmatprep.subr.bf16.mxu0 %v2936_v1 }
 0x1f0   : > { %v1064_v12 = vpop.f32.mrb[16].mxu1 }
 0x1f1   : > { %v1065_v13 = vadd.f32 %v1064_v12, %v3260_v38  ;;  %v2606_v14 = vpop.f32.mrb[17].mxu1  ;;  %2637 = vmatmul.mubr.msk.bf16.gmra.mrb[40].mxu0 %vm798_vm1, %v1102_v11 }
 0x1f2   : > { %v1067_v15 = vpop.f32.mrb[18].mxu1  ;;  %2640 = vmatprep.mubr.msk.bf16.mxu0 %vm2937_vm0, %v2936_v1  ;;  %2665 = vmatpush3.bf16.msra.mxu0 %v3252_v35 }
 0x1f3   : > { %v1094_v16 = vmax.f32 %v1065_v13, 0.0  ;;  %v1068_v17 = vadd.f32 %v1067_v15, %v3260_v38  ;;  %v2607_v18 = vpop.f32.mrb[19].mxu1  ;;  %2666 = vmatprep.subr.bf16.mxu0 %v2936_v1 }
 0x1f5   : > { %2119 = vst.msk [vmem:[%s3267_s27 + $0x40] sm:$0xff] %vm798_vm1, %v1094_v16  ;;  %v1095_v19 = vmax.f32 %v1068_v17, 0.0 }
 0x1f7   : > { %v1103_v20 = vpack.c.bf16 %v1095_v19, %v1094_v16  ;;  %2120 = vst.msk [vmem:[%s3267_s27 + $0x48] sm:$0xff] %vm798_vm1, %v1095_v19 }
 0x1f8   : > { %v1072_v21 = vpop.f32.mrb[20].mxu1 }
 0x1f9   : > { %v1073_v22 = vadd.f32 %v1072_v21, %v3260_v38  ;;  %v2610_v23 = vpop.f32.mrb[21].mxu1  ;;  %2641 = vmatmul.mubr.msk.bf16.gmra.mrb[44].mxu0 %vm798_vm1, %v1103_v20 }
 0x1fa   : > { %v1075_v24 = vpop.f32.mrb[22].mxu1  ;;  %2644 = vmatprep.mubr.msk.bf16.mxu0 %vm2937_vm0, %v2936_v1 }
 0x1fb   : > { %v1096_v25 = vmax.f32 %v1073_v22, 0.0  ;;  %v1076_v26 = vadd.f32 %v1075_v24, %v3260_v38  ;;  %v2611_v27 = vpop.f32.mrb[23].mxu1 }
 0x1fd   : > { %2121 = vst.msk [vmem:[%s3267_s27 + $0x50] sm:$0xff] %vm798_vm1, %v1096_v25  ;;  %v1097_v30 = vmax.f32 %v1076_v26, 0.0 }
 0x1ff   : > { %v1104_v29 = vpack.c.bf16 %v1097_v30, %v1096_v25  ;;  %2122 = vst.msk [vmem:[%s3267_s27 + $0x58] sm:$0xff] %vm798_vm1, %v1097_v30 }
 0x200   : > { %v1080_v31 = vpop.f32.mrb[24].mxu1 }
 0x201   : > { %2645 = vmatmul.mubr.msk.bf16.gmra.mrb[48].mxu0 %vm798_vm1, %v1104_v29  ;;  %v1081_v32 = vadd.f32 %v1080_v31, %v3260_v38  ;;  %v2614_v33 = vpop.f32.mrb[25].mxu1  ;;  %v2906_v38 = vld [vmem:[%s3697_s7 + $0x38] sm:$0xff]  }
 0x202   : > { %v1083_v34 = vpop.f32.mrb[26].mxu1  ;;  %2648 = vmatprep.mubr.msk.bf16.mxu0 %vm2937_vm0, %v2936_v1  ;;  %2667 = vmatpush3.bf16.msra.mxu0 %v2906_v38 }
 0x203   : > { %v1098_v35 = vmax.f32 %v1081_v32, 0.0  ;;  %v2615_v36 = vpop.f32.mrb[27].mxu1  ;;  %2865 = vmatpush3.bf16.msra.mxu1 %v2906_v38  ;;  %2696 = vmatprep.subr.bf16.mxu0 %v2936_v1 }
 0x204   : > { %2726 = vmatprep.subr.bf16.mxu1 %v2936_v1 }
 0x205   : > { %v1105_v37 = vpack.c.bf16 %v1098_v35, %v1098_v35  ;;  %2123 = vst.msk [vmem:[%s3267_s27 + $0x60] sm:$0xff] %vm798_vm1, %v1098_v35 }
 0x209   : > { %2649 = vmatmul.mubr.msk.bf16.gmra.mrb[52].mxu0 %vm798_vm1, %v1105_v37 }
 0x20a   : > { %2668 = vmatprep.mubr.msk.bf16.mxu0 %vm2937_vm0, %v2936_v1 }
 0x2ac   : > { %v1199_v42 = vpop.f32.mrb[28].mxu0 }
 0x2ad   : > { %v1200_v43 = vadd.f32 %v1199_v42, %v3347_v41  ;;  %v2626_v44 = vpop.f32.mrb[29].mxu0 }
 0x2ae   : > { %v1202_v45 = vpop.f32.mrb[30].mxu0  ;;  %v2910_v44 = vld [vmem:[%s3701_s11 + $0x10] sm:$0xff]  }
 0x2af   : > { %v1253_v46 = vmax.f32 %v1200_v43, 0.0  ;;  %v1203_v47 = vadd.f32 %v1202_v45, %v3347_v41  ;;  %v2627_v48 = vpop.f32.mrb[31].mxu0  ;;  %v2908_v43 = vld [vmem:[%s3701_s11] sm:$0xff]   ;;  %v2911_v45 = vld [vmem:[%s3701_s11 + $0x18] sm:$0xff]  }
 0x2b0   : > { %v2914_v48 = vld [vmem:[%s3701_s11 + $0x30] sm:$0xff]  }
 0x2b1   : > { %2124 = vst [vmem:[%s3354_s30] sm:$0xff] %v1253_v46  ;;  %v1254_v49 = vmax.f32 %v1203_v47, 0.0  ;;  %v2913_v47 = vld [vmem:[%s3701_s11 + $0x28] sm:$0xff]  }
 0x2b3   : > { %v1266_v51 = vpack.c.bf16 %v1254_v49, %v1253_v46  ;;  %2125 = vst [vmem:[%s3354_s30 + $0x8] sm:$0xff] %v1254_v49  ;;  %v2912_v46 = vld [vmem:[%s3701_s11 + $0x20] sm:$0xff]  }
 0x2b4   : > { %v1207_v52 = vpop.f32.mrb[32].mxu0  ;;  %v1289_v49 = vld [vmem:[%s3698_s8] sm:$0x1] }
 0x2b5   : > { %v1208_v53 = vadd.f32 %v1207_v52, %v3347_v41  ;;  %v2630_v54 = vpop.f32.mrb[33].mxu0  ;;  %2669 = vmatmul.mubr.bf16.vlgmr.msra.gmra.mrb[56].mxu0 %v1266_v51 }
 0x2b6   : > { %v1210_v55 = vpop.f32.mrb[34].mxu0  ;;  %2697 = vmatpush3.bf16.msra.mxu0 %v2907_v50  ;;  %2698 = vmatprep.mubr.msk.bf16.mxu0 %vm2937_vm0, %v2936_v1  ;;  %v1290_v50 = vunpack.c.l.bf16 %v1289_v49 }
 0x2b7   : > { %v1255_v56 = vmax.f32 %v1208_v53, 0.0  ;;  %v1211_v57 = vadd.f32 %v1210_v55, %v3347_v41  ;;  %v2631_v58 = vpop.f32.mrb[35].mxu0  ;;  %2770 = vmatprep.subr.bf16.mxu0 %v2936_v1 }
 0x2b8   : > { %v3431_v51 = vrot.slane %v1290_v50, %v3165_v28 }
 0x2b9   : > { %2126 = vst [vmem:[%s3354_s30 + $0x10] sm:$0xff] %v1255_v56  ;;  %v1256_v59 = vmax.f32 %v1211_v57, 0.0 }
 0x2bb   : > { %v1267_v60 = vpack.c.bf16 %v1256_v59, %v1255_v56  ;;  %2127 = vst [vmem:[%s3354_s30 + $0x18] sm:$0xff] %v1256_v59 }
 0x2bc   : > { %v1215_v61 = vpop.f32.mrb[36].mxu0 }
 0x2bd   : > { %v1216_v62 = vadd.f32 %v1215_v61, %v3347_v41  ;;  %v2634_v63 = vpop.f32.mrb[37].mxu0  ;;  %2673 = vmatmul.mubr.bf16.vlgmr.msra.gmra.mrb[28].mxu1 %v1267_v60 }
 0x2be   : > { %v1218_v0 = vpop.f32.mrb[38].mxu0  ;;  %2676 = vmatprep.mubr.msk.bf16.mxu1 %vm2937_vm0, %v2936_v1  ;;  %2727 = vmatpush3.bf16.msra.mxu1 %v2908_v43  ;;  %v2919_v43 = vld [vmem:[%s3703_s13 + $0x18] sm:$0xff]  }
 0x2bf   : > { %v1257_v2 = vmax.f32 %v1216_v62, 0.0  ;;  %v1219_v3 = vadd.f32 %v1218_v0, %v3347_v41  ;;  %v2635_v4 = vpop.f32.mrb[39].mxu0  ;;  %2728 = vmatprep.subr.bf16.mxu1 %v2936_v1 }
 0x2c1   : > { %2128 = vst [vmem:[%s3354_s30 + $0x20] sm:$0xff] %v1257_v2  ;;  %v1258_v5 = vmax.f32 %v1219_v3, 0.0 }
 0x2c3   : > { %v1268_v6 = vpack.c.bf16 %v1258_v5, %v1257_v2  ;;  %2129 = vst [vmem:[%s3354_s30 + $0x28] sm:$0xff] %v1258_v5 }
 0x2c4   : > { %v1223_v7 = vpop.f32.mrb[40].mxu0 }
 0x2c5   : > { %v1224_v8 = vadd.f32 %v1223_v7, %v3347_v41  ;;  %v2638_v9 = vpop.f32.mrb[41].mxu0  ;;  %2677 = vmatmul.mubr.bf16.gmra.mrb[32].mxu1 %v1268_v6 }
 0x2c6   : > { %v1226_v10 = vpop.f32.mrb[42].mxu0  ;;  %2680 = vmatprep.mubr.msk.bf16.mxu1 %vm2937_vm0, %v2936_v1 }
 0x2c7   : > { %v1259_v11 = vmax.f32 %v1224_v8, 0.0  ;;  %v1227_v12 = vadd.f32 %v1226_v10, %v3347_v41  ;;  %v2639_v13 = vpop.f32.mrb[43].mxu0 }
 0x2c9   : > { %2130 = vst [vmem:[%s3354_s30 + $0x30] sm:$0xff] %v1259_v11  ;;  %v1260_v14 = vmax.f32 %v1227_v12, 0.0 }
 0x2cb   : > { %v1269_v15 = vpack.c.bf16 %v1260_v14, %v1259_v11  ;;  %2131 = vst [vmem:[%s3354_s30 + $0x38] sm:$0xff] %v1260_v14 }
 0x2cc   : > { %v1231_v16 = vpop.f32.mrb[44].mxu0 }
 0x2cd   : > { %v1232_v17 = vadd.f32 %v1231_v16, %v3347_v41  ;;  %v2642_v18 = vpop.f32.mrb[45].mxu0  ;;  %2681 = vmatmul.mubr.bf16.gmra.mrb[36].mxu1 %v1269_v15 }
 0x2ce   : > { %v1234_v19 = vpop.f32.mrb[46].mxu0  ;;  %2684 = vmatprep.mubr.msk.bf16.mxu1 %vm2937_vm0, %v2936_v1 }
 0x2cf   : > { %v1261_v20 = vmax.f32 %v1232_v17, 0.0  ;;  %v1235_v21 = vadd.f32 %v1234_v19, %v3347_v41  ;;  %v2643_v22 = vpop.f32.mrb[47].mxu0 }
 0x2d1   : > { %2132 = vst [vmem:[%s3354_s30 + $0x40] sm:$0xff] %v1261_v20  ;;  %v1262_v23 = vmax.f32 %v1235_v21, 0.0 }
 0x2d3   : > { %v1270_v24 = vpack.c.bf16 %v1262_v23, %v1261_v20  ;;  %2133 = vst [vmem:[%s3354_s30 + $0x48] sm:$0xff] %v1262_v23 }
 0x2d4   : > { %v1239_v25 = vpop.f32.mrb[48].mxu0 }
 0x2d5   : > { %v1240_v26 = vadd.f32 %v1239_v25, %v3347_v41  ;;  %v2646_v27 = vpop.f32.mrb[49].mxu0  ;;  %2685 = vmatmul.mubr.bf16.gmra.mrb[40].mxu1 %v1270_v24 }
 0x2d6   : > { %v1242_v30 = vpop.f32.mrb[50].mxu0  ;;  %2688 = vmatprep.mubr.msk.bf16.mxu1 %vm2937_vm0, %v2936_v1 }
 0x2d7   : > { %v1263_v29 = vmax.f32 %v1240_v26, 0.0  ;;  %v1243_v31 = vadd.f32 %v1242_v30, %v3347_v41  ;;  %v2647_v32 = vpop.f32.mrb[51].mxu0 }
 0x2d9   : > { %2134 = vst [vmem:[%s3354_s30 + $0x50] sm:$0xff] %v1263_v29  ;;  %v1264_v33 = vmax.f32 %v1243_v31, 0.0 }
 0x2db   : > { %v1271_v34 = vpack.c.bf16 %v1264_v33, %v1263_v29  ;;  %2135 = vst [vmem:[%s3354_s30 + $0x58] sm:$0xff] %v1264_v33 }
 0x2dc   : > { %v1247_v35 = vpop.f32.mrb[52].mxu0 }
 0x2dd   : > { %2689 = vmatmul.mubr.bf16.gmra.mrb[44].mxu1 %v1271_v34  ;;  %v1248_v36 = vadd.f32 %v1247_v35, %v3347_v41  ;;  %v2650_v37 = vpop.f32.mrb[53].mxu0  ;;  %v2909_v41 = vld [vmem:[%s3701_s11 + $0x8] sm:$0xff]  }
 0x2de   : > { %v1250_v38 = vpop.f32.mrb[54].mxu0  ;;  %2692 = vmatprep.mubr.msk.bf16.mxu1 %vm2937_vm0, %v2936_v1  ;;  %2729 = vmatpush3.bf16.msra.mxu1 %v2909_v41  ;;  %v1440_v41 = vld [vmem:[%s3700_s10] sm:$0x1] }
 0x2df   : > { %v1265_v39 = vmax.f32 %v1248_v36, 0.0  ;;  %v2651_v40 = vpop.f32.mrb[55].mxu0  ;;  %2730 = vmatprep.subr.bf16.mxu1 %v2936_v1  ;;  %v2915_v38 = vld [vmem:[%s3701_s11 + $0x38] sm:$0xff]  }
 0x2e0   : > { %v2917_v40 = vld [vmem:[%s3703_s13 + $0x8] sm:$0xff]  }
 0x2e1   : > { %v1272_v42 = vpack.c.bf16 %v1265_v39, %v1265_v39  ;;  %2136 = vst [vmem:[%s3354_s30 + $0x60] sm:$0xff] %v1265_v39  ;;  %v2916_v39 = vld [vmem:[%s3703_s13] sm:$0xff]  }
 0x2e2   : > { %2731 = vmatpush3.bf16.msra.mxu1 %v2910_v44  ;;  %v1441_v44 = vunpack.c.l.bf16 %v1440_v41 }
 0x2e3   : > { %2732 = vmatprep.subr.bf16.mxu1 %v2936_v1 }
 0x2e5   : > { %2693 = vmatmul.mubr.bf16.gmra.mrb[48].mxu1 %v1272_v42  ;;  %v2918_v42 = vld [vmem:[%s3703_s13 + $0x10] sm:$0xff]  }
 0x2e6   : > { %2742 = vmatprep.mubr.msk.bf16.mxu1 %vm2937_vm0, %v2936_v1  ;;  %2733 = vmatpush3.bf16.msra.mxu1 %v2911_v45  ;;  %v3522_v45 = vrot.slane %v1441_v44, %v3165_v28 }
 0x2e7   : > { %2734 = vmatprep.subr.bf16.mxu1 %v2936_v1 }
 0x2ea   : > { %2735 = vmatpush3.bf16.msra.mxu1 %v2912_v46 }
 0x2eb   : > { %2736 = vmatprep.subr.bf16.mxu1 %v2936_v1 }
 0x2ee   : > { %2737 = vmatpush3.bf16.msra.mxu1 %v2913_v47 }
 0x2ef   : > { %2738 = vmatprep.subr.bf16.mxu1 %v2936_v1 }
 0x2f2   : > { %2739 = vmatpush3.bf16.msra.mxu1 %v2914_v48 }
 0x2f3   : > { %2740 = vmatprep.subr.bf16.mxu1 %v2936_v1 }
 0x2f6   : > { %2741 = vmatpush3.bf16.msra.mxu1 %v2915_v38 }
 0x2f7   : > { %2806 = vmatprep.subr.bf16.mxu1 %v2936_v1 }
 0x388   : > { %v1377_v52 = vpop.f32.mrb[56].mxu0 }
 0x389   : > { %v1378_v53 = vadd.f32 %v1377_v52, %v3431_v51  ;;  %v2670_v54 = vpop.f32.mrb[57].mxu0 }
 0x38a   : > { %v1380_v55 = vpop.f32.mrb[58].mxu0 }
 0x38b   : > { %2137 = vst.msk [vmem:[%s3437_s25] sm:$0xff] %vm1452_vm2, %v1378_v53  ;;  %v1381_v56 = vadd.f32 %v1380_v55, %v3431_v51  ;;  %v2671_v57 = vpop.f32.mrb[59].mxu0 }
 0x38d   : > { %v1431_v58 = vpack.c.bf16 %v1381_v56, %v1378_v53  ;;  %2138 = vst.msk [vmem:[%s3437_s25 + $0x8] sm:$0xff] %vm1452_vm2, %v1381_v56 }
 0x38f   : > { %2699 = vmatmul.mubr.msk.bf16.vlgmr.msra.gmra.mrb[60].mxu0 %vm1452_vm2, %v1431_v58 }
 0x390   : > { %v1385_v59 = vpop.f32.mrb[28].mxu1  ;;  %2702 = vmatprep.mubr.msk.bf16.mxu0 %vm2937_vm0, %v2936_v1  ;;  %2771 = vmatpush3.bf16.msra.mxu0 %v2916_v39 }
 0x391   : > { %v1386_v60 = vadd.f32 %v1385_v59, %v3431_v51  ;;  %v2674_v61 = vpop.f32.mrb[29].mxu1  ;;  %2772 = vmatprep.subr.bf16.mxu0 %v2936_v1 }
 0x392   : > { %v1388_v62 = vpop.f32.mrb[30].mxu1 }
 0x393   : > { %2139 = vst.msk [vmem:[%s3437_s25 + $0x10] sm:$0xff] %vm1452_vm2, %v1386_v60  ;;  %v1389_v63 = vadd.f32 %v1388_v62, %v3431_v51  ;;  %v2675_v0 = vpop.f32.mrb[31].mxu1 }
 0x394   : > { %2773 = vmatpush3.bf16.msra.mxu0 %v2917_v40 }
 0x395   : > { %v1432_v2 = vpack.c.bf16 %v1389_v63, %v1386_v60  ;;  %2140 = vst.msk [vmem:[%s3437_s25 + $0x18] sm:$0xff] %vm1452_vm2, %v1389_v63  ;;  %2774 = vmatprep.subr.bf16.mxu0 %v2936_v1 }
 0x397   : > { %2703 = vmatmul.mubr.msk.bf16.gmra.mrb[64].mxu0 %vm1452_vm2, %v1432_v2 }
 0x398   : > { %v1393_v3 = vpop.f32.mrb[32].mxu1  ;;  %2706 = vmatprep.mubr.msk.bf16.mxu0 %vm2937_vm0, %v2936_v1  ;;  %2775 = vmatpush3.bf16.msra.mxu0 %v2918_v42 }
 0x399   : > { %v1394_v4 = vadd.f32 %v1393_v3, %v3431_v51  ;;  %v2678_v5 = vpop.f32.mrb[33].mxu1  ;;  %2776 = vmatprep.subr.bf16.mxu0 %v2936_v1 }
 0x39a   : > { %v1396_v6 = vpop.f32.mrb[34].mxu1 }
 0x39b   : > { %2141 = vst.msk [vmem:[%s3437_s25 + $0x20] sm:$0xff] %vm1452_vm2, %v1394_v4  ;;  %v1397_v7 = vadd.f32 %v1396_v6, %v3431_v51  ;;  %v2679_v8 = vpop.f32.mrb[35].mxu1 }
 0x39c   : > { %2777 = vmatpush3.bf16.msra.mxu0 %v2919_v43 }
 0x39d   : > { %v1433_v9 = vpack.c.bf16 %v1397_v7, %v1394_v4  ;;  %2142 = vst.msk [vmem:[%s3437_s25 + $0x28] sm:$0xff] %vm1452_vm2, %v1397_v7 }
 0x39f   : > { %2707 = vmatmul.mubr.msk.bf16.gmra.mrb[68].mxu0 %vm1452_vm2, %v1433_v9 }
 0x3a0   : > { %v1401_v10 = vpop.f32.mrb[36].mxu1  ;;  %2710 = vmatprep.mubr.msk.bf16.mxu0 %vm2937_vm0, %v2936_v1 }
 0x3a1   : > { %v1402_v11 = vadd.f32 %v1401_v10, %v3431_v51  ;;  %v2682_v12 = vpop.f32.mrb[37].mxu1 }
 0x3a2   : > { %v1404_v13 = vpop.f32.mrb[38].mxu1 }
 0x3a3   : > { %2143 = vst.msk [vmem:[%s3437_s25 + $0x30] sm:$0xff] %vm1452_vm2, %v1402_v11  ;;  %v1405_v14 = vadd.f32 %v1404_v13, %v3431_v51  ;;  %v2683_v15 = vpop.f32.mrb[39].mxu1 }
 0x3a5   : > { %v1434_v16 = vpack.c.bf16 %v1405_v14, %v1402_v11  ;;  %2144 = vst.msk [vmem:[%s3437_s25 + $0x38] sm:$0xff] %vm1452_vm2, %v1405_v14 }
 0x3a7   : > { %2711 = vmatmul.mubr.msk.bf16.gmra.mrb[72].mxu0 %vm1452_vm2, %v1434_v16 }
 0x3a8   : > { %v1409_v17 = vpop.f32.mrb[40].mxu1  ;;  %2714 = vmatprep.mubr.msk.bf16.mxu0 %vm2937_vm0, %v2936_v1 }
 0x3a9   : > { %v1410_v18 = vadd.f32 %v1409_v17, %v3431_v51  ;;  %v2686_v19 = vpop.f32.mrb[41].mxu1 }
 0x3aa   : > { %v1412_v20 = vpop.f32.mrb[42].mxu1 }
 0x3ab   : > { %2145 = vst.msk [vmem:[%s3437_s25 + $0x40] sm:$0xff] %vm1452_vm2, %v1410_v18  ;;  %v1413_v21 = vadd.f32 %v1412_v20, %v3431_v51  ;;  %v2687_v22 = vpop.f32.mrb[43].mxu1 }
 0x3ad   : > { %v1435_v23 = vpack.c.bf16 %v1413_v21, %v1410_v18  ;;  %2146 = vst.msk [vmem:[%s3437_s25 + $0x48] sm:$0xff] %vm1452_vm2, %v1413_v21 }
 0x3af   : > { %2715 = vmatmul.mubr.msk.bf16.gmra.mrb[76].mxu0 %vm1452_vm2, %v1435_v23 }
 0x3b0   : > { %v1417_v24 = vpop.f32.mrb[44].mxu1  ;;  %2718 = vmatprep.mubr.msk.bf16.mxu0 %vm2937_vm0, %v2936_v1 }
 0x3b1   : > { %v1418_v25 = vadd.f32 %v1417_v24, %v3431_v51  ;;  %v2690_v26 = vpop.f32.mrb[45].mxu1 }
 0x3b2   : > { %v1420_v27 = vpop.f32.mrb[46].mxu1 }
 0x3b3   : > { %2147 = vst.msk [vmem:[%s3437_s25 + $0x50] sm:$0xff] %vm1452_vm2, %v1418_v25  ;;  %v1421_v30 = vadd.f32 %v1420_v27, %v3431_v51  ;;  %v2691_v29 = vpop.f32.mrb[47].mxu1 }
 0x3b5   : > { %v1436_v31 = vpack.c.bf16 %v1421_v30, %v1418_v25  ;;  %2148 = vst.msk [vmem:[%s3437_s25 + $0x58] sm:$0xff] %vm1452_vm2, %v1421_v30 }
 0x3b7   : > { %2719 = vmatmul.mubr.msk.bf16.gmra.mrb[80].mxu0 %vm1452_vm2, %v1436_v31 }
 0x3b8   : > { %v1425_v32 = vpop.f32.mrb[48].mxu1  ;;  %2722 = vmatprep.mubr.msk.bf16.mxu0 %vm2937_vm0, %v2936_v1 }
 0x3b9   : > { %v1426_v33 = vadd.f32 %v1425_v32, %v3431_v51  ;;  %v2694_v34 = vpop.f32.mrb[49].mxu1 }
 0x3ba   : > { %v1428_v35 = vpop.f32.mrb[50].mxu1 }
 0x3bb   : > { %v1437_v36 = vpack.c.bf16 %v1426_v33, %v1426_v33  ;;  %2149 = vst.msk [vmem:[%s3437_s25 + $0x60] sm:$0xff] %vm1452_vm2, %v1426_v33  ;;  %v2695_v37 = vpop.f32.mrb[51].mxu1 }
 0x3bf   : > { %2723 = vmatmul.mubr.msk.bf16.gmra.mrb[84].mxu0 %vm1452_vm2, %v1437_v36 }
 0x3c0   : > { %2778 = vmatprep.mubr.msk.bf16.mxu0 %vm2937_vm0, %v2936_v1 }
 0x462   : > { %v1508_v46 = vpop.f32.mrb[60].mxu0 }
 0x463   : > { %v1509_v47 = vadd.f32 %v1508_v46, %v3522_v45  ;;  %v2700_v48 = vpop.f32.mrb[61].mxu0  ;;  %v2920_v46 = vld [vmem:[%s3705_s15] sm:$0xff]  }
 0x464   : > { %v1511_v49 = vpop.f32.mrb[62].mxu0  ;;  %v2923_v48 = vld [vmem:[%s3705_s15 + $0x18] sm:$0xff]  }
 0x465   : > { %v1512_v50 = vadd.f32 %v1511_v49, %v3522_v45  ;;  %v2701_v51 = vpop.f32.mrb[63].mxu0  ;;  %v1562_v52 = vmax.f32 %v1509_v47, 0.0  ;;  %v2922_v47 = vld [vmem:[%s3705_s15 + $0x10] sm:$0xff]   ;;  %v2924_v49 = vld [vmem:[%s3705_s15 + $0x20] sm:$0xff]  }
 0x466   : > { %v2926_v51 = vld [vmem:[%s3705_s15 + $0x30] sm:$0xff]  }
 0x467   : > { %v1563_v53 = vmax.f32 %v1512_v50, 0.0  ;;  %v2925_v50 = vld [vmem:[%s3705_s15 + $0x28] sm:$0xff]  }
 0x469   : > { %v1575_v54 = vpack.c.bf16 %v1563_v53, %v1562_v52  ;;  %v1598_v52 = vld [vmem:[%s3702_s12] sm:$0x1] }
 0x46a   : > { %v1516_v55 = vpop.f32.mrb[64].mxu0  ;;  %v1599_v53 = vunpack.c.l.bf16 %v1598_v52 }
 0x46b   : > { %v1517_v56 = vadd.f32 %v1516_v55, %v3522_v45  ;;  %v2704_v57 = vpop.f32.mrb[65].mxu0  ;;  %2743 = vmatmul.mubr.bf16.vlgmr.msra.gmra.mrb[52].mxu1 %v1575_v54 }
 0x46c   : > { %v1519_v58 = vpop.f32.mrb[66].mxu0  ;;  %2746 = vmatprep.mubr.msk.bf16.mxu1 %vm2937_vm0, %v2936_v1  ;;  %2807 = vmatpush3.bf16.msra.mxu1 %v2920_v46  ;;  %v3583_v54 = vrot.slane %v1599_v53, %v3165_v28 }
 0x46d   : > { %v1520_v59 = vadd.f32 %v1519_v58, %v3522_v45  ;;  %v2705_v60 = vpop.f32.mrb[67].mxu0  ;;  %v1564_v61 = vmax.f32 %v1517_v56, 0.0  ;;  %2808 = vmatprep.subr.bf16.mxu1 %v2936_v1 }
 0x46f   : > { %v1565_v62 = vmax.f32 %v1520_v59, 0.0 }
 0x471   : > { %v1576_v63 = vpack.c.bf16 %v1565_v62, %v1564_v61 }
 0x472   : > { %v1524_v0 = vpop.f32.mrb[68].mxu0 }
 0x473   : > { %v1525_v2 = vadd.f32 %v1524_v0, %v3522_v45  ;;  %v2708_v3 = vpop.f32.mrb[69].mxu0  ;;  %2747 = vmatmul.mubr.bf16.gmra.mrb[56].mxu1 %v1576_v63 }
 0x474   : > { %v1527_v4 = vpop.f32.mrb[70].mxu0  ;;  %2750 = vmatprep.mubr.msk.bf16.mxu1 %vm2937_vm0, %v2936_v1 }
 0x475   : > { %v1528_v5 = vadd.f32 %v1527_v4, %v3522_v45  ;;  %v2709_v6 = vpop.f32.mrb[71].mxu0  ;;  %v1566_v7 = vmax.f32 %v1525_v2, 0.0 }
 0x477   : > { %v1567_v8 = vmax.f32 %v1528_v5, 0.0 }
 0x479   : > { %v1577_v9 = vpack.c.bf16 %v1567_v8, %v1566_v7 }
 0x47a   : > { %v1532_v10 = vpop.f32.mrb[72].mxu0 }
 0x47b   : > { %v1533_v11 = vadd.f32 %v1532_v10, %v3522_v45  ;;  %v2712_v12 = vpop.f32.mrb[73].mxu0  ;;  %2751 = vmatmul.mubr.bf16.gmra.mrb[60].mxu1 %v1577_v9 }
 0x47c   : > { %v1535_v13 = vpop.f32.mrb[74].mxu0  ;;  %2754 = vmatprep.mubr.msk.bf16.mxu1 %vm2937_vm0, %v2936_v1 }
 0x47d   : > { %v1536_v14 = vadd.f32 %v1535_v13, %v3522_v45  ;;  %v2713_v15 = vpop.f32.mrb[75].mxu0  ;;  %v1568_v16 = vmax.f32 %v1533_v11, 0.0 }
 0x47f   : > { %v1569_v17 = vmax.f32 %v1536_v14, 0.0 }
 0x481   : > { %v1578_v18 = vpack.c.bf16 %v1569_v17, %v1568_v16 }
 0x482   : > { %v1540_v19 = vpop.f32.mrb[76].mxu0 }
 0x483   : > { %v1541_v20 = vadd.f32 %v1540_v19, %v3522_v45  ;;  %v2716_v21 = vpop.f32.mrb[77].mxu0  ;;  %2755 = vmatmul.mubr.bf16.gmra.mrb[64].mxu1 %v1578_v18 }
 0x484   : > { %v1543_v22 = vpop.f32.mrb[78].mxu0  ;;  %2758 = vmatprep.mubr.msk.bf16.mxu1 %vm2937_vm0, %v2936_v1 }
 0x485   : > { %v1544_v23 = vadd.f32 %v1543_v22, %v3522_v45  ;;  %v2717_v24 = vpop.f32.mrb[79].mxu0  ;;  %v1570_v25 = vmax.f32 %v1541_v20, 0.0 }
 0x487   : > { %v1571_v26 = vmax.f32 %v1544_v23, 0.0 }
 0x489   : > { %v1579_v27 = vpack.c.bf16 %v1571_v26, %v1570_v25 }
 0x48a   : > { %v1548_v30 = vpop.f32.mrb[80].mxu0 }
 0x48b   : > { %v1549_v29 = vadd.f32 %v1548_v30, %v3522_v45  ;;  %v2720_v31 = vpop.f32.mrb[81].mxu0  ;;  %2759 = vmatmul.mubr.bf16.gmra.mrb[68].mxu1 %v1579_v27 }
 0x48c   : > { %v1551_v32 = vpop.f32.mrb[82].mxu0  ;;  %2762 = vmatprep.mubr.msk.bf16.mxu1 %vm2937_vm0, %v2936_v1 }
 0x48d   : > { %v1552_v33 = vadd.f32 %v1551_v32, %v3522_v45  ;;  %v2721_v34 = vpop.f32.mrb[83].mxu0  ;;  %v1572_v35 = vmax.f32 %v1549_v29, 0.0 }
 0x48f   : > { %v1573_v36 = vmax.f32 %v1552_v33, 0.0 }
 0x491   : > { %v1580_v37 = vpack.c.bf16 %v1573_v36, %v1572_v35 }
 0x492   : > { %v1556_v38 = vpop.f32.mrb[84].mxu0 }
 0x493   : > { %2763 = vmatmul.mubr.bf16.gmra.mrb[72].mxu1 %v1580_v37  ;;  %v1557_v39 = vadd.f32 %v1556_v38, %v3522_v45  ;;  %v2724_v40 = vpop.f32.mrb[85].mxu0  ;;  %v2921_v45 = vld [vmem:[%s3705_s15 + $0x8] sm:$0xff]  }
 0x494   : > { %v1559_v42 = vpop.f32.mrb[86].mxu0  ;;  %2766 = vmatprep.mubr.msk.bf16.mxu1 %vm2937_vm0, %v2936_v1  ;;  %2809 = vmatpush3.bf16.msra.mxu1 %v2921_v45 }
 0x495   : > { %v1574_v43 = vmax.f32 %v1557_v39, 0.0  ;;  %v2725_v41 = vpop.f32.mrb[87].mxu0  ;;  %2810 = vmatprep.subr.bf16.mxu1 %v2936_v1 }
 0x497   : > { %v1581_v44 = vpack.c.bf16 %v1574_v43, %v1574_v43 }
 0x498   : > { %2811 = vmatpush3.bf16.msra.mxu1 %v2922_v47 }
 0x499   : > { %2812 = vmatprep.subr.bf16.mxu1 %v2936_v1 }
 0x49b   : > { %2767 = vmatmul.mubr.bf16.gmra.mrb[76].mxu1 %v1581_v44 }
 0x49c   : > { %2822 = vmatprep.mubr.msk.bf16.mxu1 %vm2937_vm0, %v2936_v1  ;;  %2813 = vmatpush3.bf16.msra.mxu1 %v2923_v48 }
 0x49d   : > { %2814 = vmatprep.subr.bf16.mxu1 %v2936_v1 }
 0x4a0   : > { %2815 = vmatpush3.bf16.msra.mxu1 %v2924_v49 }
 0x4a1   : > { %2816 = vmatprep.subr.bf16.mxu1 %v2936_v1 }
 0x4a4   : > { %2817 = vmatpush3.bf16.msra.mxu1 %v2925_v50 }
 0x4a5   : > { %2818 = vmatprep.subr.bf16.mxu1 %v2936_v1 }
 0x4a8   : > { %2819 = vmatpush3.bf16.msra.mxu1 %v2926_v51 }
 0x4a9   : > { %2820 = vmatprep.subr.bf16.mxu1 %v2936_v1 }
 0x53e   : > { %v1686_v55 = vpop.f32.mrb[52].mxu1 }
 0x53f   : > { %v1687_v56 = vadd.f32 %v1686_v55, %v3583_v54  ;;  %v2744_v57 = vpop.f32.mrb[53].mxu1  ;;  %v2927_v55 = vld [vmem:[%s3705_s15 + $0x38] sm:$0xff]  }
 0x540   : > { %v1689_v58 = vpop.f32.mrb[54].mxu1  ;;  %2821 = vmatpush3.bf16.msra.mxu1 %v2927_v55 }
 0x541   : > { %v1690_v59 = vadd.f32 %v1689_v58, %v3583_v54  ;;  %v2745_v60 = vpop.f32.mrb[55].mxu1  ;;  %v1740_v61 = vmax.f32 %v1687_v56, 0.0 }
 0x543   : > { %v1741_v62 = vmax.f32 %v1690_v59, 0.0 }
 0x545   : > { %v1753_v63 = vpack.c.bf16 %v1741_v62, %v1740_v61 }
 0x546   : > { %v1694_v0 = vpop.f32.mrb[56].mxu1 }
 0x547   : > { %v1695_v2 = vadd.f32 %v1694_v0, %v3583_v54  ;;  %v2748_v3 = vpop.f32.mrb[57].mxu1  ;;  %2779 = vmatmul.mubr.msk.bf16.vlgmr.msra.gmra.mrb[88].mxu0 %vm798_vm1, %v1753_v63 }
 0x548   : > { %v1697_v4 = vpop.f32.mrb[58].mxu1  ;;  %2782 = vmatprep.mubr.msk.bf16.mxu0 %vm2937_vm0, %v2936_v1 }
 0x549   : > { %v1698_v5 = vadd.f32 %v1697_v4, %v3583_v54  ;;  %v2749_v6 = vpop.f32.mrb[59].mxu1  ;;  %v1742_v7 = vmax.f32 %v1695_v2, 0.0 }
 0x54b   : > { %v1743_v8 = vmax.f32 %v1698_v5, 0.0 }
 0x54d   : > { %v1754_v9 = vpack.c.bf16 %v1743_v8, %v1742_v7 }
 0x54e   : > { %v1702_v10 = vpop.f32.mrb[60].mxu1 }
 0x54f   : > { %v1703_v11 = vadd.f32 %v1702_v10, %v3583_v54  ;;  %v2752_v12 = vpop.f32.mrb[61].mxu1  ;;  %2783 = vmatmul.mubr.msk.bf16.gmra.mrb[92].mxu0 %vm798_vm1, %v1754_v9 }
 0x550   : > { %v1705_v13 = vpop.f32.mrb[62].mxu1  ;;  %2786 = vmatprep.mubr.msk.bf16.mxu0 %vm2937_vm0, %v2936_v1 }
 0x551   : > { %v1706_v14 = vadd.f32 %v1705_v13, %v3583_v54  ;;  %v2753_v15 = vpop.f32.mrb[63].mxu1  ;;  %v1744_v16 = vmax.f32 %v1703_v11, 0.0 }
 0x553   : > { %v1745_v17 = vmax.f32 %v1706_v14, 0.0 }
 0x555   : > { %v1755_v18 = vpack.c.bf16 %v1745_v17, %v1744_v16 }
 0x556   : > { %v1710_v19 = vpop.f32.mrb[64].mxu1 }
 0x557   : > { %v1711_v20 = vadd.f32 %v1710_v19, %v3583_v54  ;;  %v2756_v21 = vpop.f32.mrb[65].mxu1  ;;  %2787 = vmatmul.mubr.msk.bf16.gmra.mrb[96].mxu0 %vm798_vm1, %v1755_v18 }
 0x558   : > { %v1713_v22 = vpop.f32.mrb[66].mxu1  ;;  %2790 = vmatprep.mubr.msk.bf16.mxu0 %vm2937_vm0, %v2936_v1 }
 0x559   : > { %v1714_v23 = vadd.f32 %v1713_v22, %v3583_v54  ;;  %v2757_v24 = vpop.f32.mrb[67].mxu1  ;;  %v1746_v25 = vmax.f32 %v1711_v20, 0.0 }
 0x55b   : > { %v1747_v26 = vmax.f32 %v1714_v23, 0.0 }
 0x55d   : > { %v1756_v27 = vpack.c.bf16 %v1747_v26, %v1746_v25 }
 0x55e   : > { %v1718_v30 = vpop.f32.mrb[68].mxu1 }
 0x55f   : > { %v1719_v29 = vadd.f32 %v1718_v30, %v3583_v54  ;;  %v2760_v31 = vpop.f32.mrb[69].mxu1  ;;  %2791 = vmatmul.mubr.msk.bf16.gmra.mrb[100].mxu0 %vm798_vm1, %v1756_v27 }
 0x560   : > { %v1721_v32 = vpop.f32.mrb[70].mxu1  ;;  %2794 = vmatprep.mubr.msk.bf16.mxu0 %vm2937_vm0, %v2936_v1 }
 0x561   : > { %v1722_v33 = vadd.f32 %v1721_v32, %v3583_v54  ;;  %v2761_v34 = vpop.f32.mrb[71].mxu1  ;;  %v1748_v35 = vmax.f32 %v1719_v29, 0.0 }
 0x563   : > { %v1749_v36 = vmax.f32 %v1722_v33, 0.0 }
 0x565   : > { %v1757_v37 = vpack.c.bf16 %v1749_v36, %v1748_v35 }
 0x566   : > { %v1726_v38 = vpop.f32.mrb[72].mxu1 }
 0x567   : > { %v1727_v39 = vadd.f32 %v1726_v38, %v3583_v54  ;;  %v2764_v40 = vpop.f32.mrb[73].mxu1  ;;  %2795 = vmatmul.mubr.msk.bf16.gmra.mrb[104].mxu0 %vm798_vm1, %v1757_v37 }
 0x568   : > { %v1729_v42 = vpop.f32.mrb[74].mxu1  ;;  %2798 = vmatprep.mubr.msk.bf16.mxu0 %vm2937_vm0, %v2936_v1 }
 0x569   : > { %v1730_v43 = vadd.f32 %v1729_v42, %v3583_v54  ;;  %v2765_v41 = vpop.f32.mrb[75].mxu1  ;;  %v1750_v44 = vmax.f32 %v1727_v39, 0.0 }
 0x56b   : > { %v1751_v46 = vmax.f32 %v1730_v43, 0.0 }
 0x56d   : > { %v1758_v45 = vpack.c.bf16 %v1751_v46, %v1750_v44 }
 0x56e   : > { %v1734_v47 = vpop.f32.mrb[76].mxu1 }
 0x56f   : > { %v1735_v48 = vadd.f32 %v1734_v47, %v3583_v54  ;;  %2799 = vmatmul.mubr.msk.bf16.gmra.mrb[108].mxu0 %vm798_vm1, %v1758_v45  ;;  %v2768_v49 = vpop.f32.mrb[77].mxu1  ;;  %v1768_v54 = vld [vmem:[%s3704_s14] sm:$0x1] }
 0x570   : > { %v1737_v50 = vpop.f32.mrb[78].mxu1  ;;  %2802 = vmatprep.mubr.msk.bf16.mxu0 %vm2937_vm0, %v2936_v1  ;;  %v1769_v56 = vunpack.c.l.bf16 %v1768_v54 }
 0x571   : > { %v1752_v51 = vmax.f32 %v1735_v48, 0.0  ;;  %v2769_v52 = vpop.f32.mrb[79].mxu1 }
 0x572   : > { %v3624_v57 = vrot.slane %v1769_v56, %v3165_v28 }
 0x573   : > { %v1759_v53 = vpack.c.bf16 %v1752_v51, %v1752_v51 }
 0x577   : > { %2803 = vmatmul.mubr.msk.bf16.gmra.mrb[112].mxu0 %vm798_vm1, %v1759_v53 }
 0x61a   : > { %v1853_v58 = vpop.f32.mrb[88].mxu0 }
 0x61b   : > { %v1854_v59 = vadd.f32 %v1853_v58, %v3624_v57  ;;  %v2780_v60 = vpop.f32.mrb[89].mxu0  ;;  %v1943_v58 = vld [vmem:[%s3706_s16] sm:$0x1] }
 0x61c   : > { %v1856_v61 = vpop.f32.mrb[90].mxu0 }
 0x61d   : > { %v1857_v62 = vadd.f32 %v1856_v61, %v3624_v57  ;;  %v2781_v63 = vpop.f32.mrb[91].mxu0  ;;  %v1907_v0 = vmax.f32 %v1854_v59, 0.0  ;;  %v1944_v59 = vunpack.c.l.bf16 %v1943_v58 }
 0x61f   : > { %v1908_v2 = vmax.f32 %v1857_v62, 0.0  ;;  %v1948_v60 = vrot.slane %v1944_v59, %v3165_v28 }
 0x621   : > { %v1920_v3 = vpack.c.bf16 %v1908_v2, %v1907_v0 }
 0x622   : > { %v1861_v4 = vpop.f32.mrb[92].mxu0 }
 0x623   : > { %v1862_v5 = vadd.f32 %v1861_v4, %v3624_v57  ;;  %v2784_v6 = vpop.f32.mrb[93].mxu0  ;;  %2823 = vmatmul.mubr.bf16.vlgmr.msra.gmra.mrb[80].mxu1 %v1920_v3 }
 0x624   : > { %v1864_v7 = vpop.f32.mrb[94].mxu0  ;;  %2826 = vmatprep.mubr.msk.bf16.mxu1 %vm2937_vm0, %v2936_v1 }
 0x625   : > { %v1865_v8 = vadd.f32 %v1864_v7, %v3624_v57  ;;  %v2785_v9 = vpop.f32.mrb[95].mxu0  ;;  %v1909_v10 = vmax.f32 %v1862_v5, 0.0 }
 0x627   : > { %v1910_v11 = vmax.f32 %v1865_v8, 0.0 }
 0x629   : > { %v1921_v12 = vpack.c.bf16 %v1910_v11, %v1909_v10 }
 0x62a   : > { %v1869_v13 = vpop.f32.mrb[96].mxu0 }
 0x62b   : > { %v1870_v14 = vadd.f32 %v1869_v13, %v3624_v57  ;;  %v2788_v15 = vpop.f32.mrb[97].mxu0  ;;  %2827 = vmatmul.mubr.bf16.gmra.mrb[84].mxu1 %v1921_v12 }
 0x62c   : > { %v1872_v16 = vpop.f32.mrb[98].mxu0  ;;  %2830 = vmatprep.mubr.msk.bf16.mxu1 %vm2937_vm0, %v2936_v1 }
 0x62d   : > { %v1873_v17 = vadd.f32 %v1872_v16, %v3624_v57  ;;  %v2789_v18 = vpop.f32.mrb[99].mxu0  ;;  %v1911_v19 = vmax.f32 %v1870_v14, 0.0 }
 0x62f   : > { %v1912_v20 = vmax.f32 %v1873_v17, 0.0 }
 0x631   : > { %v1922_v21 = vpack.c.bf16 %v1912_v20, %v1911_v19 }
 0x632   : > { %v1877_v22 = vpop.f32.mrb[100].mxu0 }
 0x633   : > { %v1878_v23 = vadd.f32 %v1877_v22, %v3624_v57  ;;  %v2792_v24 = vpop.f32.mrb[101].mxu0  ;;  %2831 = vmatmul.mubr.bf16.gmra.mrb[88].mxu1 %v1922_v21 }
 0x634   : > { %v1880_v25 = vpop.f32.mrb[102].mxu0  ;;  %2834 = vmatprep.mubr.msk.bf16.mxu1 %vm2937_vm0, %v2936_v1 }
 0x635   : > { %v1881_v26 = vadd.f32 %v1880_v25, %v3624_v57  ;;  %v2793_v27 = vpop.f32.mrb[103].mxu0  ;;  %v1913_v30 = vmax.f32 %v1878_v23, 0.0 }
 0x637   : > { %v1914_v29 = vmax.f32 %v1881_v26, 0.0 }
 0x639   : > { %v1923_v31 = vpack.c.bf16 %v1914_v29, %v1913_v30 }
 0x63a   : > { %v1885_v32 = vpop.f32.mrb[104].mxu0 }
 0x63b   : > { %v1886_v33 = vadd.f32 %v1885_v32, %v3624_v57  ;;  %v2796_v34 = vpop.f32.mrb[105].mxu0  ;;  %2835 = vmatmul.mubr.bf16.gmra.mrb[92].mxu1 %v1923_v31 }
 0x63c   : > { %v1888_v35 = vpop.f32.mrb[106].mxu0  ;;  %2838 = vmatprep.mubr.msk.bf16.mxu1 %vm2937_vm0, %v2936_v1 }
 0x63d   : > { %v1889_v36 = vadd.f32 %v1888_v35, %v3624_v57  ;;  %v2797_v37 = vpop.f32.mrb[107].mxu0  ;;  %v1915_v38 = vmax.f32 %v1886_v33, 0.0 }
 0x63f   : > { %v1916_v39 = vmax.f32 %v1889_v36, 0.0 }
 0x641   : > { %v1924_v40 = vpack.c.bf16 %v1916_v39, %v1915_v38 }
 0x642   : > { %v1893_v42 = vpop.f32.mrb[108].mxu0 }
 0x643   : > { %v1894_v43 = vadd.f32 %v1893_v42, %v3624_v57  ;;  %v2800_v41 = vpop.f32.mrb[109].mxu0  ;;  %2839 = vmatmul.mubr.bf16.gmra.mrb[96].mxu1 %v1924_v40 }
 0x644   : > { %v1896_v44 = vpop.f32.mrb[110].mxu0  ;;  %2842 = vmatprep.mubr.msk.bf16.mxu1 %vm2937_vm0, %v2936_v1 }
 0x645   : > { %v1897_v46 = vadd.f32 %v1896_v44, %v3624_v57  ;;  %v2801_v45 = vpop.f32.mrb[111].mxu0  ;;  %v1917_v47 = vmax.f32 %v1894_v43, 0.0 }
 0x647   : > { %v1918_v48 = vmax.f32 %v1897_v46, 0.0 }
 0x649   : > { %v1925_v49 = vpack.c.bf16 %v1918_v48, %v1917_v47 }
 0x64a   : > { %v1901_v50 = vpop.f32.mrb[112].mxu0 }
 0x64b   : > { %v1902_v51 = vadd.f32 %v1901_v50, %v3624_v57  ;;  %v2804_v52 = vpop.f32.mrb[113].mxu0  ;;  %2843 = vmatmul.mubr.bf16.gmra.mrb[100].mxu1 %v1925_v49 }
 0x64c   : > { %v1904_v53 = vpop.f32.mrb[114].mxu0  ;;  %2846 = vmatprep.mubr.msk.bf16.mxu1 %vm2937_vm0, %v2936_v1 }
 0x64d   : > { %v1919_v55 = vmax.f32 %v1902_v51, 0.0  ;;  %v2805_v54 = vpop.f32.mrb[115].mxu0 }
 0x64f   : > { %v1926_v56 = vpack.c.bf16 %v1919_v55, %v1919_v55 }
 0x653   : > { %2847 = vmatmul.mubr.bf16.gmra.mrb[104].mxu1 %v1926_v56 }
 0x6f6   : > { %v2031_v1 = vpop.f32.mrb[80].mxu1 }
 0x6f7   : > { %v2032_v57 = vadd.f32 %v2031_v1, %v1948_v60  ;;  %v2824_v61 = vpop.f32.mrb[81].mxu1 }
 0x6f8   : > { %v2034_v62 = vpop.f32.mrb[82].mxu1 }
 0x6f9   : > { %2085 = vst.msk [vmem:[%s3659_s22] sm:$0xff] %vm798_vm1, %v2032_v57  ;;  %v2035_v63 = vadd.f32 %v2034_v62, %v1948_v60  ;;  %v2825_v0 = vpop.f32.mrb[83].mxu1 }
 0x6fb   : > { %2086 = vst.msk [vmem:[%s3659_s22 + $0x8] sm:$0xff] %vm798_vm1, %v2035_v63 }
 0x6fe   : > { %v2039_v28 = vpop.f32.mrb[84].mxu1 }
 0x6ff   : > { %v2040_v2 = vadd.f32 %v2039_v28, %v1948_v60  ;;  %v2828_v3 = vpop.f32.mrb[85].mxu1 }
 0x700   : > { %v2042_v4 = vpop.f32.mrb[86].mxu1 }
 0x701   : > { %2087 = vst.msk [vmem:[%s3659_s22 + $0x10] sm:$0xff] %vm798_vm1, %v2040_v2  ;;  %v2043_v5 = vadd.f32 %v2042_v4, %v1948_v60  ;;  %v2829_v6 = vpop.f32.mrb[87].mxu1 }
 0x703   : > { %2088 = vst.msk [vmem:[%s3659_s22 + $0x18] sm:$0xff] %vm798_vm1, %v2043_v5 }
 0x706   : > { %v2047_v7 = vpop.f32.mrb[88].mxu1 }
 0x707   : > { %v2048_v8 = vadd.f32 %v2047_v7, %v1948_v60  ;;  %v2832_v9 = vpop.f32.mrb[89].mxu1 }
 0x708   : > { %v2050_v10 = vpop.f32.mrb[90].mxu1 }
 0x709   : > { %2089 = vst.msk [vmem:[%s3659_s22 + $0x20] sm:$0xff] %vm798_vm1, %v2048_v8  ;;  %v2051_v11 = vadd.f32 %v2050_v10, %v1948_v60  ;;  %v2833_v12 = vpop.f32.mrb[91].mxu1 }
 0x70b   : > { %2090 = vst.msk [vmem:[%s3659_s22 + $0x28] sm:$0xff] %vm798_vm1, %v2051_v11 }
 0x70e   : > { %v2055_v13 = vpop.f32.mrb[92].mxu1 }
 0x70f   : > { %v2056_v14 = vadd.f32 %v2055_v13, %v1948_v60  ;;  %v2836_v15 = vpop.f32.mrb[93].mxu1 }
 0x710   : > { %v2058_v16 = vpop.f32.mrb[94].mxu1 }
 0x711   : > { %2091 = vst.msk [vmem:[%s3659_s22 + $0x30] sm:$0xff] %vm798_vm1, %v2056_v14  ;;  %v2059_v17 = vadd.f32 %v2058_v16, %v1948_v60  ;;  %v2837_v18 = vpop.f32.mrb[95].mxu1 }
 0x713   : > { %2092 = vst.msk [vmem:[%s3659_s22 + $0x38] sm:$0xff] %vm798_vm1, %v2059_v17 }
 0x716   : > { %v2063_v19 = vpop.f32.mrb[96].mxu1 }
 0x717   : > { %v2064_v20 = vadd.f32 %v2063_v19, %v1948_v60  ;;  %v2840_v21 = vpop.f32.mrb[97].mxu1 }
 0x718   : > { %v2066_v22 = vpop.f32.mrb[98].mxu1 }
 0x719   : > { %2093 = vst.msk [vmem:[%s3659_s22 + $0x40] sm:$0xff] %vm798_vm1, %v2064_v20  ;;  %v2067_v23 = vadd.f32 %v2066_v22, %v1948_v60  ;;  %v2841_v24 = vpop.f32.mrb[99].mxu1 }
 0x71b   : > { %2094 = vst.msk [vmem:[%s3659_s22 + $0x48] sm:$0xff] %vm798_vm1, %v2067_v23 }
 0x71e   : > { %v2071_v25 = vpop.f32.mrb[100].mxu1 }
 0x71f   : > { %v2072_v26 = vadd.f32 %v2071_v25, %v1948_v60  ;;  %v2844_v27 = vpop.f32.mrb[101].mxu1 }
 0x720   : > { %v2074_v30 = vpop.f32.mrb[102].mxu1 }
 0x721   : > { %2095 = vst.msk [vmem:[%s3659_s22 + $0x50] sm:$0xff] %vm798_vm1, %v2072_v26  ;;  %v2075_v29 = vadd.f32 %v2074_v30, %v1948_v60  ;;  %v2845_v31 = vpop.f32.mrb[103].mxu1 }
 0x723   : > { %2096 = vst.msk [vmem:[%s3659_s22 + $0x58] sm:$0xff] %vm798_vm1, %v2075_v29 }
 0x726   : > { %v2079_v32 = vpop.f32.mrb[104].mxu1 }
 0x727   : > { %v2080_v33 = vadd.f32 %v2079_v32, %v1948_v60  ;;  %v2848_v34 = vpop.f32.mrb[105].mxu1 }
 0x728   : > { %v2082_v35 = vpop.f32.mrb[106].mxu1 }
 0x729   : > { %2097 = vst.msk [vmem:[%s3659_s22 + $0x60] sm:$0xff] %vm798_vm1, %v2080_v33  ;;  %v2849_v36 = vpop.f32.mrb[107].mxu1 }
 0x72a PF: > { %s32_s2 = sadd.s32 1, %s2934_s2  }
 0x72b   : > { %p29_p4 = scmp.ge.s32.totalorder %s32_s2, 4  }
 0x72d   :  { %31 = sbr.rel (!%p29_p4) target bundleno = 7 (0x7), region = 166 }

// kernel: dae_forward.1
= control target key start
LH: loop header
LB: loop body
LE: loop exit
PB: predicated region body
PF: predicated region fallthrough
CT: control target
= control target key end

     0   :  { %s3690_s0 = inlined_call_operand.vmem [shape: bf16[208,64], index: 0, kind: input, shape index: {}]   ;;  %s3691_s1 = inlined_call_operand.vmem [shape: bf16[64,128], index: 1, kind: input, shape index: {}]   ;;  %s3692_s2 = inlined_call_operand.vmem [shape: bf16[1,128], index: 2, kind: input, shape index: {}]   ;;  %s3693_s3 = inlined_call_operand.vmem [shape: bf16[128,64], index: 3, kind: input, shape index: {}]   ;;  %s3694_s4 = inlined_call_operand.vmem [shape: bf16[1,64], index: 4, kind: input, shape index: {}]   ;;  %s3695_s5 = inlined_call_operand.vmem [shape: bf16[64,128], index: 5, kind: input, shape index: {}]   ;;  %s3696_s6 = inlined_call_operand.vmem [shape: bf16[1,128], index: 6, kind: input, shape index: {}]   ;;  %s3697_s7 = inlined_call_operand.vmem [shape: bf16[128,16], index: 7, kind: input, shape index: {}]   ;;  %s3698_s8 = inlined_call_operand.vmem [shape: bf16[1,16], index: 8, kind: input, shape index: {}]   ;;  %s3699_s9 = inlined_call_operand.vmem [shape: bf16[16,128], index: 9, kind: input, shape index: {}]   ;;  %s3700_s10 = inlined_call_operand.vmem [shape: bf16[1,128], index: 10, kind: input, shape index: {}]   ;;  %s3701_s11 = inlined_call_operand.vmem [shape: bf16[128,64], index: 11, kind: input, shape index: {}]   ;;  %s3702_s12 = inlined_call_operand.vmem [shape: bf16[1,64], index: 12, kind: input, shape index: {}]   ;;  %s3703_s13 = inlined_call_operand.vmem [shape: bf16[64,128], index: 13, kind: input, shape index: {}]   ;;  %s3704_s14 = inlined_call_operand.vmem [shape: bf16[1,128], index: 14, kind: input, shape index: {}]   ;;  %s3705_s15 = inlined_call_operand.vmem [shape: bf16[128,64], index: 15, kind: input, shape index: {}]   ;;  %s3706_s16 = inlined_call_operand.vmem [shape: bf16[1,64], index: 16, kind: input, shape index: {}]   ;;  %s3707_s17 = inlined_call_operand.vmem [shape: f32[208,64], index: 17, kind: output, shape index: {0}]   ;;  %s3708_s18 = inlined_call_operand.vmem [shape: f32[208,128], index: 18, kind: output, shape index: {1}]   ;;  %s3709_s19 = inlined_call_operand.vmem [shape: f32[208,64], index: 19, kind: output, shape index: {2}]   ;;  %s3710_s20 = inlined_call_operand.vmem [shape: f32[208,128], index: 20, kind: output, shape index: {3}]   ;;  %s3711_s21 = inlined_call_operand.vmem [shape: f32[208,16], index: 21, kind: output, shape index: {4}]  }
   0x1   :  { %3715 = sst [smem:[#allocation2_spill]] %s3690_s0 }
   0x2   :  { %3716 = sst [smem:[#allocation3_spill]] %s3691_s1 }
   0x3   :  { %3717 = sst [smem:[#allocation4_spill]] %s3692_s2  ;;  %s3048_s2 = smov 0  }
   0x4   :  { %3718 = sst [smem:[#allocation5_spill]] %s3693_s3 }
   0x5   :  { %3719 = sst [smem:[#allocation6_spill]] %s3694_s4 }
   0x6   :  { %3720 = sst [smem:[#allocation7_spill]] %s3695_s5 }
   0x7 LB: > { %s2342_s25 = sadd.s32 4294967295, %s2934_s2   ;;  %p2346_p0 = scmp.ge.s32.totalorder %s2934_s2, 1  ;;  %s2934_s2 = sphi %s3048_s2, %s32_s2  }
   0x8   : > { %p597_p1 = scmp.lt.s32.totalorder %s2934_s2, 3 }
   0xa   : > { %p598_p2 = pnand %p2346_p0, %p597_p1 }
   0xb   : > { %s3721_s3 = sld [smem:[#allocation3_spill]] (!%p598_p2)  ;;  %v2936_v1 = vmov (!%p598_p2), 0.0   ;;  %vm2937_vm0 = vmmov (!%p598_p2), 0   ;;  %s677_s0 = smul.u32 (!%p598_p2), 13, %s2342_s25  ;;  %vm798_vm1 = vcmask (!%p598_p2), 523264   ;;  %v737_v24 = vlaneseq (!%p598_p2) }
   0xc   : > { %601 = sbr.rel (%p598_p2) target bundleno = 1834 (0x72a), region = 88  ;;  %2536 = vmatprep.subr.bf16.mxu0 (!%p598_p2), %v2936_v1  ;;  %2572 = vmatprep.subr.bf16.mxu1 (!%p598_p2), %v2936_v1  ;;  %s3722_s5 = sld [smem:[#allocation5_spill]] (!%p598_p2)  ;;  %vm1452_vm2 = vcmask (!%p598_p2), 130048  }
   0xd   : > { %2544 = vmatprep.mubr.msk.bf16.mxu0 (!%p598_p2), %vm2937_vm0, %v2936_v1  ;;  %2588 = vmatprep.mubr.msk.bf16.mxu1 (!%p598_p2), %vm2937_vm0, %v2936_v1  ;;  %p678_p3 = scmp.lt.s32.totalorder (!%p598_p2), %s677_s0, 25  ;;  %s3723_s4 = sld [smem:[#allocation2_spill]] (!%p598_p2)  ;;  %v738_v25 = vshrl.u32 (!%p598_p2), %v737_v24, 7 }
   0xe   : > { %s3724_s24 = sld [smem:[#allocation7_spill]] (!%p598_p2) }
   0xf   : > { %v3165_v28 = vsub.s32 (!%p598_p2), 0, %v738_v25 }
  0x11   : > { %v2876_v0 = vld [vmem:[%s3721_s3] sm:$0xff] (!%p598_p2)   ;;  %v2877_v2 = vld [vmem:[%s3721_s3 + $0x8] sm:$0xff] (!%p598_p2)   ;;  %v2878_v4 = vld [vmem:[%s3721_s3 + $0x10] sm:$0xff] (!%p598_p2)  }
  0x12   : > { %2537 = vmatpush3.bf16.msra.mxu0 (!%p598_p2), %v2876_v0  ;;  %v2887_v3 = vld [vmem:[%s3722_s5] sm:$0xff] (!%p598_p2)   ;;  %v2888_v5 = vld [vmem:[%s3722_s5 + $0x8] sm:$0xff] (!%p598_p2)   ;;  %v2879_v6 = vld [vmem:[%s3721_s3 + $0x18] sm:$0xff] (!%p598_p2)  }
  0x13   : > { %2538 = vmatprep.subr.bf16.mxu0 %v2936_v1  ;;  %s3728_s0 = smov (!%p678_p3, %s677_s0), 25  ;;  %2573 = vmatpush3.bf16.msra.mxu1 %v2887_v3  ;;  %v2889_v7 = vld [vmem:[%s3722_s5 + $0x10] sm:$0xff]   ;;  %v2890_v9 = vld [vmem:[%s3722_s5 + $0x18] sm:$0xff]   ;;  %v2891_v10 = vld [vmem:[%s3722_s5 + $0x20] sm:$0xff]  }
  0x14   : > { %2574 = vmatprep.subr.bf16.mxu1 %v2936_v1  ;;  %s2347_s25 = sshll.u32 %s3728_s0, 2  ;;  %v2892_v12 = vld [vmem:[%s3722_s5 + $0x28] sm:$0xff]   ;;  %v2893_v18 = vld [vmem:[%s3722_s5 + $0x30] sm:$0xff]   ;;  %v2894_v19 = vld [vmem:[%s3722_s5 + $0x38] sm:$0xff]   ;;  %s3171_s1 = sshll.u32 %s3728_s0, 3 }
  0x15   : > { %s3089_s30 = scalar_lea.vmem %s3723_s4, %s2347_s25  ;;  %v2895_v20 = vld [vmem:[%s3724_s24] sm:$0xff]   ;;  %v2896_v21 = vld [vmem:[%s3724_s24 + $0x8] sm:$0xff]   ;;  %v2897_v22 = vld [vmem:[%s3724_s24 + $0x10] sm:$0xff]   ;;  %s3178_s27 = scalar_lea.vmem %s3708_s18, %s3171_s1 }
  0x16   : > { %2539 = vmatpush3.bf16.msra.mxu0 %v2877_v2  ;;  %v2880_v8 = vld [vmem:[%s3089_s30] sm:$0xff]   ;;  %v2881_v11 = vld [vmem:[%s3089_s30 + $0x8] sm:$0xff]   ;;  %v2882_v13 = vld [vmem:[%s3089_s30 + $0x10] sm:$0xff]   ;;  %s3437_s25 = scalar_lea.vmem %s3711_s21, %s3171_s1  ;;  %s3659_s22 = scalar_lea.vmem %s3707_s17, %s3171_s1 }
  0x17   : > { %2540 = vmatprep.subr.bf16.mxu0 %v2936_v1  ;;  %2575 = vmatpush3.bf16.msra.mxu1 %v2888_v5  ;;  %v2883_v14 = vld [vmem:[%s3089_s30 + $0x18] sm:$0xff]   ;;  %v2884_v15 = vld [vmem:[%s3089_s30 + $0x20] sm:$0xff]   ;;  %v2885_v16 = vld [vmem:[%s3089_s30 + $0x28] sm:$0xff]  }
  0x18   : > { %2576 = vmatprep.subr.bf16.mxu1 %v2936_v1  ;;  %v2886_v17 = vld [vmem:[%s3089_s30 + $0x30] ss:$0 sps:$4 sm:$0xff]   ;;  %v2898_v23 = vld [vmem:[%s3724_s24 + $0x18] sm:$0xff]   ;;  %s3725_s30 = sld [smem:[#allocation4_spill]] }
  0x1a   : > { %2541 = vmatpush3.bf16.msra.mxu0 %v2878_v4 }
  0x1b   : > { %2542 = vmatprep.subr.bf16.mxu0 %v2936_v1  ;;  %2577 = vmatpush3.bf16.msra.mxu1 %v2889_v7 }
  0x1c   : > { %2578 = vmatprep.subr.bf16.mxu1 %v2936_v1 }
  0x1e   : > { %2543 = vmatpush3.bf16.msra.mxu0 %v2879_v6  ;;  %v735_v26 = vld [vmem:[%s3725_s30] sm:$0x1]  ;;  %s3726_s30 = sld [smem:[#allocation6_spill]] }
  0x1f   : > { %2616 = vmatprep.subr.bf16.mxu0 %v2936_v1  ;;  %2579 = vmatpush3.bf16.msra.mxu1 %v2890_v9  ;;  %v736_v27 = vunpack.c.l.bf16 %v735_v26 }
  0x20   : > { %2580 = vmatprep.subr.bf16.mxu1 %v2936_v1 }
  0x21   : > { %2545 = vmatmul.mubr.msk.bf16.vlgmr.msra.gmra.mrb[0].mxu0 %vm798_vm1, %v2880_v8  ;;  %v3168_v29 = vrot.slane %v736_v27, %v3165_v28 }
  0x22   : > { %2548 = vmatprep.mubr.msk.bf16.mxu0 %vm2937_vm0, %v2936_v1  ;;  %2617 = vmatpush3.bf16.msra.mxu0 %v2895_v20 }
  0x23   : > { %2581 = vmatpush3.bf16.msra.mxu1 %v2891_v10  ;;  %2618 = vmatprep.subr.bf16.mxu0 %v2936_v1 }
  0x24   : > { %2582 = vmatprep.subr.bf16.mxu1 %v2936_v1 }
  0x26   : > { %2619 = vmatpush3.bf16.msra.mxu0 %v2896_v21 }
  0x27   : > { %2583 = vmatpush3.bf16.msra.mxu1 %v2892_v12  ;;  %2620 = vmatprep.subr.bf16.mxu0 %v2936_v1 }
  0x28   : > { %2584 = vmatprep.subr.bf16.mxu1 %v2936_v1 }
  0x29   : > { %2549 = vmatmul.mubr.msk.bf16.gmra.mrb[4].mxu0 %vm798_vm1, %v2881_v11 }
  0x2a   : > { %2552 = vmatprep.mubr.msk.bf16.mxu0 %vm2937_vm0, %v2936_v1  ;;  %2621 = vmatpush3.bf16.msra.mxu0 %v2897_v22 }
  0x2b   : > { %2585 = vmatpush3.bf16.msra.mxu1 %v2893_v18  ;;  %2622 = vmatprep.subr.bf16.mxu0 %v2936_v1 }
  0x2c   : > { %2586 = vmatprep.subr.bf16.mxu1 %v2936_v1 }
  0x2e   : > { %2623 = vmatpush3.bf16.msra.mxu0 %v2898_v23 }
  0x2f   : > { %2587 = vmatpush3.bf16.msra.mxu1 %v2894_v19  ;;  %2652 = vmatprep.subr.bf16.mxu0 %v2936_v1 }
  0x30   : > { %2850 = vmatprep.subr.bf16.mxu1 %v2936_v1 }
  0x31   : > { %2553 = vmatmul.mubr.msk.bf16.gmra.mrb[8].mxu0 %vm798_vm1, %v2882_v13 }
  0x32   : > { %2556 = vmatprep.mubr.msk.bf16.mxu0 %vm2937_vm0, %v2936_v1 }
  0x39   : > { %2557 = vmatmul.mubr.msk.bf16.gmra.mrb[12].mxu0 %vm798_vm1, %v2883_v14 }
  0x3a   : > { %2560 = vmatprep.mubr.msk.bf16.mxu0 %vm2937_vm0, %v2936_v1 }
  0x41   : > { %2561 = vmatmul.mubr.msk.bf16.gmra.mrb[16].mxu0 %vm798_vm1, %v2884_v15 }
  0x42   : > { %2564 = vmatprep.mubr.msk.bf16.mxu0 %vm2937_vm0, %v2936_v1 }
  0x49   : > { %2565 = vmatmul.mubr.msk.bf16.gmra.mrb[20].mxu0 %vm798_vm1, %v2885_v16 }
  0x4a   : > { %2568 = vmatprep.mubr.msk.bf16.mxu0 %vm2937_vm0, %v2936_v1 }
  0x51   : > { %2569 = vmatmul.mubr.msk.bf16.gmra.mrb[24].mxu0 %vm798_vm1, %v2886_v17 }
  0x52   : > { %2624 = vmatprep.mubr.msk.bf16.mxu0 %vm2937_vm0, %v2936_v1 }
  0xf4   : > { %v854_v30 = vpop.f32.mrb[0].mxu0 }
  0xf5   : > { %v855_v31 = vadd.f32 %v854_v30, %v3168_v29  ;;  %v2546_v32 = vpop.f32.mrb[1].mxu0  ;;  %v2899_v30 = vld [vmem:[%s3697_s7] sm:$0xff]  }
  0xf6   : > { %v857_v33 = vpop.f32.mrb[2].mxu0  ;;  %v2902_v32 = vld [vmem:[%s3697_s7 + $0x18] sm:$0xff]  }
  0xf7   : > { %v908_v34 = vmax.f32 %v855_v31, 0.0  ;;  %v858_v35 = vadd.f32 %v857_v33, %v3168_v29  ;;  %v2547_v36 = vpop.f32.mrb[3].mxu0  ;;  %v2901_v31 = vld [vmem:[%s3697_s7 + $0x10] sm:$0xff]   ;;  %v3238_v33 = vld [vmem:[%s3697_s7 + $0x20] sm:$0xff]  }
  0xf8   : > { %v944_v36 = vld [vmem:[%s3726_s30] sm:$0x1]  ;;  %s3354_s30 = scalar_lea.vmem %s3710_s20, %s3171_s1 }
  0xf9   : > { %2098 = vst [vmem:[%s3178_s27] sm:$0xff] %v908_v34  ;;  %v909_v37 = vmax.f32 %v858_v35, 0.0  ;;  %v3252_v35 = vld [vmem:[%s3697_s7 + $0x30] sm:$0xff]  }
  0xfb   : > { %v921_v38 = vpack.c.bf16 %v909_v37, %v908_v34  ;;  %2099 = vst [vmem:[%s3178_s27 + $0x8] sm:$0xff] %v909_v37  ;;  %v3245_v34 = vld [vmem:[%s3697_s7 + $0x28] sm:$0xff]   ;;  %v945_v37 = vunpack.c.l.bf16 %v944_v36 }
  0xfc   : > { %v862_v39 = vpop.f32.mrb[4].mxu0 }
  0xfd   : > { %v863_v40 = vadd.f32 %v862_v39, %v3168_v29  ;;  %v2550_v41 = vpop.f32.mrb[5].mxu0  ;;  %2589 = vmatmul.mubr.bf16.vlgmr.msra.gmra.mrb[0].mxu1 %v921_v38  ;;  %v3260_v38 = vrot.slane %v945_v37, %v3165_v28 }
  0xfe   : > { %v865_v42 = vpop.f32.mrb[6].mxu0  ;;  %2592 = vmatprep.mubr.msk.bf16.mxu1 %vm2937_vm0, %v2936_v1  ;;  %2858 = vmatpush3.bf16.msra.mxu1 %v2899_v30 }
  0xff   : > { %v910_v43 = vmax.f32 %v863_v40, 0.0  ;;  %v866_v44 = vadd.f32 %v865_v42, %v3168_v29  ;;  %v2551_v45 = vpop.f32.mrb[7].mxu0  ;;  %2851 = vmatprep.subr.bf16.mxu1 %v2936_v1 }
 0x101   : > { %2100 = vst [vmem:[%s3178_s27 + $0x10] sm:$0xff] %v910_v43  ;;  %v911_v46 = vmax.f32 %v866_v44, 0.0 }
 0x103   : > { %v922_v47 = vpack.c.bf16 %v911_v46, %v910_v43  ;;  %2101 = vst [vmem:[%s3178_s27 + $0x18] sm:$0xff] %v911_v46 }
 0x104   : > { %v870_v48 = vpop.f32.mrb[8].mxu0 }
 0x105   : > { %v871_v49 = vadd.f32 %v870_v48, %v3168_v29  ;;  %v2554_v50 = vpop.f32.mrb[9].mxu0  ;;  %2593 = vmatmul.mubr.bf16.gmra.mrb[4].mxu1 %v922_v47 }
 0x106   : > { %v873_v51 = vpop.f32.mrb[10].mxu0  ;;  %2596 = vmatprep.mubr.msk.bf16.mxu1 %vm2937_vm0, %v2936_v1 }
 0x107   : > { %v912_v52 = vmax.f32 %v871_v49, 0.0  ;;  %v874_v53 = vadd.f32 %v873_v51, %v3168_v29  ;;  %v2555_v54 = vpop.f32.mrb[11].mxu0 }
 0x109   : > { %2102 = vst [vmem:[%s3178_s27 + $0x20] sm:$0xff] %v912_v52  ;;  %v913_v55 = vmax.f32 %v874_v53, 0.0 }
 0x10b   : > { %v923_v56 = vpack.c.bf16 %v913_v55, %v912_v52  ;;  %2103 = vst [vmem:[%s3178_s27 + $0x28] sm:$0xff] %v913_v55 }
 0x10c   : > { %v878_v57 = vpop.f32.mrb[12].mxu0 }
 0x10d   : > { %v879_v58 = vadd.f32 %v878_v57, %v3168_v29  ;;  %v2558_v59 = vpop.f32.mrb[13].mxu0  ;;  %2597 = vmatmul.mubr.bf16.gmra.mrb[8].mxu1 %v923_v56 }
 0x10e   : > { %v881_v60 = vpop.f32.mrb[14].mxu0  ;;  %2600 = vmatprep.mubr.msk.bf16.mxu1 %vm2937_vm0, %v2936_v1 }
 0x10f   : > { %v914_v61 = vmax.f32 %v879_v58, 0.0  ;;  %v882_v62 = vadd.f32 %v881_v60, %v3168_v29  ;;  %v2559_v63 = vpop.f32.mrb[15].mxu0 }
 0x111   : > { %2104 = vst [vmem:[%s3178_s27 + $0x30] sm:$0xff] %v914_v61  ;;  %v915_v0 = vmax.f32 %v882_v62, 0.0 }
 0x113   : > { %v924_v2 = vpack.c.bf16 %v915_v0, %v914_v61  ;;  %2105 = vst [vmem:[%s3178_s27 + $0x38] sm:$0xff] %v915_v0 }
 0x114   : > { %v886_v3 = vpop.f32.mrb[16].mxu0 }
 0x115   : > { %v887_v4 = vadd.f32 %v886_v3, %v3168_v29  ;;  %v2562_v5 = vpop.f32.mrb[17].mxu0  ;;  %2601 = vmatmul.mubr.bf16.gmra.mrb[12].mxu1 %v924_v2 }
 0x116   : > { %v889_v6 = vpop.f32.mrb[18].mxu0  ;;  %2604 = vmatprep.mubr.msk.bf16.mxu1 %vm2937_vm0, %v2936_v1 }
 0x117   : > { %v916_v7 = vmax.f32 %v887_v4, 0.0  ;;  %v890_v8 = vadd.f32 %v889_v6, %v3168_v29  ;;  %v2563_v9 = vpop.f32.mrb[19].mxu0 }
 0x119   : > { %2106 = vst [vmem:[%s3178_s27 + $0x40] sm:$0xff] %v916_v7  ;;  %v917_v10 = vmax.f32 %v890_v8, 0.0 }
 0x11b   : > { %v925_v11 = vpack.c.bf16 %v917_v10, %v916_v7  ;;  %2107 = vst [vmem:[%s3178_s27 + $0x48] sm:$0xff] %v917_v10 }
 0x11c   : > { %v894_v12 = vpop.f32.mrb[20].mxu0 }
 0x11d   : > { %v895_v13 = vadd.f32 %v894_v12, %v3168_v29  ;;  %v2566_v14 = vpop.f32.mrb[21].mxu0  ;;  %2605 = vmatmul.mubr.bf16.gmra.mrb[16].mxu1 %v925_v11 }
 0x11e   : > { %v897_v15 = vpop.f32.mrb[22].mxu0  ;;  %2608 = vmatprep.mubr.msk.bf16.mxu1 %vm2937_vm0, %v2936_v1 }
 0x11f   : > { %v918_v16 = vmax.f32 %v895_v13, 0.0  ;;  %v898_v17 = vadd.f32 %v897_v15, %v3168_v29  ;;  %v2567_v18 = vpop.f32.mrb[23].mxu0 }
 0x121   : > { %2108 = vst [vmem:[%s3178_s27 + $0x50] sm:$0xff] %v918_v16  ;;  %v919_v19 = vmax.f32 %v898_v17, 0.0 }
 0x123   : > { %v926_v20 = vpack.c.bf16 %v919_v19, %v918_v16  ;;  %2109 = vst [vmem:[%s3178_s27 + $0x58] sm:$0xff] %v919_v19 }
 0x124   : > { %v902_v21 = vpop.f32.mrb[24].mxu0 }
 0x125   : > { %2609 = vmatmul.mubr.bf16.gmra.mrb[20].mxu1 %v926_v20  ;;  %v903_v22 = vadd.f32 %v902_v21, %v3168_v29  ;;  %v2570_v23 = vpop.f32.mrb[25].mxu0  ;;  %v2900_v29 = vld [vmem:[%s3697_s7 + $0x8] sm:$0xff]  }
 0x126   : > { %v905_v24 = vpop.f32.mrb[26].mxu0  ;;  %2612 = vmatprep.mubr.msk.bf16.mxu1 %vm2937_vm0, %v2936_v1  ;;  %2859 = vmatpush3.bf16.msra.mxu1 %v2900_v29 }
 0x127   : > { %v920_v25 = vmax.f32 %v903_v22, 0.0  ;;  %v2571_v26 = vpop.f32.mrb[27].mxu0  ;;  %2852 = vmatprep.subr.bf16.mxu1 %v2936_v1 }
 0x129   : > { %v927_v27 = vpack.c.bf16 %v920_v25, %v920_v25  ;;  %2110 = vst [vmem:[%s3178_s27 + $0x60] sm:$0xff] %v920_v25  ;;  %s3267_s27 = scalar_lea.vmem %s3709_s19, %s3171_s1 }
 0x12a   : > { %2860 = vmatpush3.bf16.msra.mxu1 %v2901_v31 }
 0x12b   : > { %2853 = vmatprep.subr.bf16.mxu1 %v2936_v1 }
 0x12d   : > { %2613 = vmatmul.mubr.bf16.gmra.mrb[24].mxu1 %v927_v27 }
 0x12e   : > { %2672 = vmatprep.mubr.msk.bf16.mxu1 %vm2937_vm0, %v2936_v1  ;;  %2861 = vmatpush3.bf16.msra.mxu1 %v2902_v32 }
 0x12f   : > { %2854 = vmatprep.subr.bf16.mxu1 %v2936_v1 }
 0x132   : > { %2862 = vmatpush3.bf16.msra.mxu1 %v3238_v33 }
 0x133   : > { %2855 = vmatprep.subr.bf16.mxu1 %v2936_v1 }
 0x136   : > { %2863 = vmatpush3.bf16.msra.mxu1 %v3245_v34 }
 0x137   : > { %2856 = vmatprep.subr.bf16.mxu1 %v2936_v1 }
 0x13a   : > { %2864 = vmatpush3.bf16.msra.mxu1 %v3252_v35 }
 0x13b   : > { %2857 = vmatprep.subr.bf16.mxu1 %v2936_v1 }
 0x1d0   : > { %v1032_v39 = vpop.f32.mrb[0].mxu1 }
 0x1d1   : > { %v1033_v40 = vadd.f32 %v1032_v39, %v3260_v38  ;;  %v2590_v41 = vpop.f32.mrb[1].mxu1  ;;  %v1114_v39 = vld [vmem:[%s3696_s6] sm:$0x1] }
 0x1d2   : > { %v1035_v42 = vpop.f32.mrb[2].mxu1 }
 0x1d3   : > { %v1086_v43 = vmax.f32 %v1033_v40, 0.0  ;;  %v1036_v44 = vadd.f32 %v1035_v42, %v3260_v38  ;;  %v2591_v45 = vpop.f32.mrb[3].mxu1  ;;  %v1115_v40 = vunpack.c.l.bf16 %v1114_v39 }
 0x1d5   : > { %2111 = vst.msk [vmem:[%s3267_s27] sm:$0xff] %vm798_vm1, %v1086_v43  ;;  %v1087_v46 = vmax.f32 %v1036_v44, 0.0  ;;  %v3347_v41 = vrot.slane %v1115_v40, %v3165_v28 }
 0x1d7   : > { %v1099_v47 = vpack.c.bf16 %v1087_v46, %v1086_v43  ;;  %2112 = vst.msk [vmem:[%s3267_s27 + $0x8] sm:$0xff] %vm798_vm1, %v1087_v46 }
 0x1d8   : > { %v1040_v48 = vpop.f32.mrb[4].mxu1 }
 0x1d9   : > { %v1041_v49 = vadd.f32 %v1040_v48, %v3260_v38  ;;  %v2594_v50 = vpop.f32.mrb[5].mxu1  ;;  %2625 = vmatmul.mubr.msk.bf16.vlgmr.msra.gmra.mrb[28].mxu0 %vm798_vm1, %v1099_v47 }
 0x1da   : > { %v1043_v51 = vpop.f32.mrb[6].mxu1  ;;  %2628 = vmatprep.mubr.msk.bf16.mxu0 %vm2937_vm0, %v2936_v1  ;;  %2653 = vmatpush3.bf16.msra.mxu0 %v2899_v30  ;;  %v2907_v50 = vld [vmem:[%s3699_s9] sm:$0xff]  }
 0x1db   : > { %v1088_v52 = vmax.f32 %v1041_v49, 0.0  ;;  %v1044_v53 = vadd.f32 %v1043_v51, %v3260_v38  ;;  %v2595_v54 = vpop.f32.mrb[7].mxu1  ;;  %2654 = vmatprep.subr.bf16.mxu0 %v2936_v1 }
 0x1dd   : > { %2113 = vst.msk [vmem:[%s3267_s27 + $0x10] sm:$0xff] %vm798_vm1, %v1088_v52  ;;  %v1089_v55 = vmax.f32 %v1044_v53, 0.0 }
 0x1de   : > { %2655 = vmatpush3.bf16.msra.mxu0 %v2900_v29 }
 0x1df   : > { %v1100_v56 = vpack.c.bf16 %v1089_v55, %v1088_v52  ;;  %2114 = vst.msk [vmem:[%s3267_s27 + $0x18] sm:$0xff] %vm798_vm1, %v1089_v55  ;;  %2656 = vmatprep.subr.bf16.mxu0 %v2936_v1 }
 0x1e0   : > { %v1048_v57 = vpop.f32.mrb[8].mxu1 }
 0x1e1   : > { %v1049_v58 = vadd.f32 %v1048_v57, %v3260_v38  ;;  %v2598_v59 = vpop.f32.mrb[9].mxu1  ;;  %2629 = vmatmul.mubr.msk.bf16.gmra.mrb[32].mxu0 %vm798_vm1, %v1100_v56 }
 0x1e2   : > { %v1051_v60 = vpop.f32.mrb[10].mxu1  ;;  %2632 = vmatprep.mubr.msk.bf16.mxu0 %vm2937_vm0, %v2936_v1  ;;  %2657 = vmatpush3.bf16.msra.mxu0 %v2901_v31 }
 0x1e3   : > { %v1090_v61 = vmax.f32 %v1049_v58, 0.0  ;;  %v1052_v62 = vadd.f32 %v1051_v60, %v3260_v38  ;;  %v2599_v63 = vpop.f32.mrb[11].mxu1  ;;  %2658 = vmatprep.subr.bf16.mxu0 %v2936_v1 }
 0x1e5   : > { %2115 = vst.msk [vmem:[%s3267_s27 + $0x20] sm:$0xff] %vm798_vm1, %v1090_v61  ;;  %v1091_v0 = vmax.f32 %v1052_v62, 0.0 }
 0x1e6   : > { %2659 = vmatpush3.bf16.msra.mxu0 %v2902_v32 }
 0x1e7   : > { %v1101_v2 = vpack.c.bf16 %v1091_v0, %v1090_v61  ;;  %2116 = vst.msk [vmem:[%s3267_s27 + $0x28] sm:$0xff] %vm798_vm1, %v1091_v0  ;;  %2660 = vmatprep.subr.bf16.mxu0 %v2936_v1 }
 0x1e8   : > { %v1056_v3 = vpop.f32.mrb[12].mxu1 }
 0x1e9   : > { %v1057_v4 = vadd.f32 %v1056_v3, %v3260_v38  ;;  %v2602_v5 = vpop.f32.mrb[13].mxu1  ;;  %2633 = vmatmul.mubr.msk.bf16.gmra.mrb[36].mxu0 %vm798_vm1, %v1101_v2 }
 0x1ea   : > { %v1059_v6 = vpop.f32.mrb[14].mxu1  ;;  %2636 = vmatprep.mubr.msk.bf16.mxu0 %vm2937_vm0, %v2936_v1  ;;  %2661 = vmatpush3.bf16.msra.mxu0 %v3238_v33 }
 0x1eb   : > { %v1092_v7 = vmax.f32 %v1057_v4, 0.0  ;;  %v1060_v8 = vadd.f32 %v1059_v6, %v3260_v38  ;;  %v2603_v9 = vpop.f32.mrb[15].mxu1  ;;  %2662 = vmatprep.subr.bf16.mxu0 %v2936_v1 }
 0x1ed   : > { %2117 = vst.msk [vmem:[%s3267_s27 + $0x30] sm:$0xff] %vm798_vm1, %v1092_v7  ;;  %v1093_v10 = vmax.f32 %v1060_v8, 0.0 }
 0x1ee   : > { %2663 = vmatpush3.bf16.msra.mxu0 %v3245_v34 }
 0x1ef   : > { %v1102_v11 = vpack.c.bf16 %v1093_v10, %v1092_v7  ;;  %2118 = vst.msk [vmem:[%s3267_s27 + $0x38] sm:$0xff] %vm798_vm1, %v1093_v10  ;;  %2664 = vmatprep.subr.bf16.mxu0 %v2936_v1 }
 0x1f0   : > { %v1064_v12 = vpop.f32.mrb[16].mxu1 }
 0x1f1   : > { %v1065_v13 = vadd.f32 %v1064_v12, %v3260_v38  ;;  %v2606_v14 = vpop.f32.mrb[17].mxu1  ;;  %2637 = vmatmul.mubr.msk.bf16.gmra.mrb[40].mxu0 %vm798_vm1, %v1102_v11 }
 0x1f2   : > { %v1067_v15 = vpop.f32.mrb[18].mxu1  ;;  %2640 = vmatprep.mubr.msk.bf16.mxu0 %vm2937_vm0, %v2936_v1  ;;  %2665 = vmatpush3.bf16.msra.mxu0 %v3252_v35 }
 0x1f3   : > { %v1094_v16 = vmax.f32 %v1065_v13, 0.0  ;;  %v1068_v17 = vadd.f32 %v1067_v15, %v3260_v38  ;;  %v2607_v18 = vpop.f32.mrb[19].mxu1  ;;  %2666 = vmatprep.subr.bf16.mxu0 %v2936_v1 }
 0x1f5   : > { %2119 = vst.msk [vmem:[%s3267_s27 + $0x40] sm:$0xff] %vm798_vm1, %v1094_v16  ;;  %v1095_v19 = vmax.f32 %v1068_v17, 0.0 }
 0x1f7   : > { %v1103_v20 = vpack.c.bf16 %v1095_v19, %v1094_v16  ;;  %2120 = vst.msk [vmem:[%s3267_s27 + $0x48] sm:$0xff] %vm798_vm1, %v1095_v19 }
 0x1f8   : > { %v1072_v21 = vpop.f32.mrb[20].mxu1 }
 0x1f9   : > { %v1073_v22 = vadd.f32 %v1072_v21, %v3260_v38  ;;  %v2610_v23 = vpop.f32.mrb[21].mxu1  ;;  %2641 = vmatmul.mubr.msk.bf16.gmra.mrb[44].mxu0 %vm798_vm1, %v1103_v20 }
 0x1fa   : > { %v1075_v24 = vpop.f32.mrb[22].mxu1  ;;  %2644 = vmatprep.mubr.msk.bf16.mxu0 %vm2937_vm0, %v2936_v1 }
 0x1fb   : > { %v1096_v25 = vmax.f32 %v1073_v22, 0.0  ;;  %v1076_v26 = vadd.f32 %v1075_v24, %v3260_v38  ;;  %v2611_v27 = vpop.f32.mrb[23].mxu1 }
 0x1fd   : > { %2121 = vst.msk [vmem:[%s3267_s27 + $0x50] sm:$0xff] %vm798_vm1, %v1096_v25  ;;  %v1097_v30 = vmax.f32 %v1076_v26, 0.0 }
 0x1ff   : > { %v1104_v29 = vpack.c.bf16 %v1097_v30, %v1096_v25  ;;  %2122 = vst.msk [vmem:[%s3267_s27 + $0x58] sm:$0xff] %vm798_vm1, %v1097_v30 }
 0x200   : > { %v1080_v31 = vpop.f32.mrb[24].mxu1 }
 0x201   : > { %2645 = vmatmul.mubr.msk.bf16.gmra.mrb[48].mxu0 %vm798_vm1, %v1104_v29  ;;  %v1081_v32 = vadd.f32 %v1080_v31, %v3260_v38  ;;  %v2614_v33 = vpop.f32.mrb[25].mxu1  ;;  %v2906_v38 = vld [vmem:[%s3697_s7 + $0x38] sm:$0xff]  }
 0x202   : > { %v1083_v34 = vpop.f32.mrb[26].mxu1  ;;  %2648 = vmatprep.mubr.msk.bf16.mxu0 %vm2937_vm0, %v2936_v1  ;;  %2667 = vmatpush3.bf16.msra.mxu0 %v2906_v38 }
 0x203   : > { %v1098_v35 = vmax.f32 %v1081_v32, 0.0  ;;  %v2615_v36 = vpop.f32.mrb[27].mxu1  ;;  %2865 = vmatpush3.bf16.msra.mxu1 %v2906_v38  ;;  %2696 = vmatprep.subr.bf16.mxu0 %v2936_v1 }
 0x204   : > { %2726 = vmatprep.subr.bf16.mxu1 %v2936_v1 }
 0x205   : > { %v1105_v37 = vpack.c.bf16 %v1098_v35, %v1098_v35  ;;  %2123 = vst.msk [vmem:[%s3267_s27 + $0x60] sm:$0xff] %vm798_vm1, %v1098_v35 }
 0x209   : > { %2649 = vmatmul.mubr.msk.bf16.gmra.mrb[52].mxu0 %vm798_vm1, %v1105_v37 }
 0x20a   : > { %2668 = vmatprep.mubr.msk.bf16.mxu0 %vm2937_vm0, %v2936_v1 }
 0x2ac   : > { %v1199_v42 = vpop.f32.mrb[28].mxu0 }
 0x2ad   : > { %v1200_v43 = vadd.f32 %v1199_v42, %v3347_v41  ;;  %v2626_v44 = vpop.f32.mrb[29].mxu0 }
 0x2ae   : > { %v1202_v45 = vpop.f32.mrb[30].mxu0  ;;  %v2910_v44 = vld [vmem:[%s3701_s11 + $0x10] sm:$0xff]  }
 0x2af   : > { %v1253_v46 = vmax.f32 %v1200_v43, 0.0  ;;  %v1203_v47 = vadd.f32 %v1202_v45, %v3347_v41  ;;  %v2627_v48 = vpop.f32.mrb[31].mxu0  ;;  %v2908_v43 = vld [vmem:[%s3701_s11] sm:$0xff]   ;;  %v2911_v45 = vld [vmem:[%s3701_s11 + $0x18] sm:$0xff]  }
 0x2b0   : > { %v2914_v48 = vld [vmem:[%s3701_s11 + $0x30] sm:$0xff]  }
 0x2b1   : > { %2124 = vst [vmem:[%s3354_s30] sm:$0xff] %v1253_v46  ;;  %v1254_v49 = vmax.f32 %v1203_v47, 0.0  ;;  %v2913_v47 = vld [vmem:[%s3701_s11 + $0x28] sm:$0xff]  }
 0x2b3   : > { %v1266_v51 = vpack.c.bf16 %v1254_v49, %v1253_v46  ;;  %2125 = vst [vmem:[%s3354_s30 + $0x8] sm:$0xff] %v1254_v49  ;;  %v2912_v46 = vld [vmem:[%s3701_s11 + $0x20] sm:$0xff]  }
 0x2b4   : > { %v1207_v52 = vpop.f32.mrb[32].mxu0  ;;  %v1289_v49 = vld [vmem:[%s3698_s8] sm:$0x1] }
 0x2b5   : > { %v1208_v53 = vadd.f32 %v1207_v52, %v3347_v41  ;;  %v2630_v54 = vpop.f32.mrb[33].mxu0  ;;  %2669 = vmatmul.mubr.bf16.vlgmr.msra.gmra.mrb[56].mxu0 %v1266_v51 }
 0x2b6   : > { %v1210_v55 = vpop.f32.mrb[34].mxu0  ;;  %2697 = vmatpush3.bf16.msra.mxu0 %v2907_v50  ;;  %2698 = vmatprep.mubr.msk.bf16.mxu0 %vm2937_vm0, %v2936_v1  ;;  %v1290_v50 = vunpack.c.l.bf16 %v1289_v49 }
 0x2b7   : > { %v1255_v56 = vmax.f32 %v1208_v53, 0.0  ;;  %v1211_v57 = vadd.f32 %v1210_v55, %v3347_v41  ;;  %v2631_v58 = vpop.f32.mrb[35].mxu0  ;;  %2770 = vmatprep.subr.bf16.mxu0 %v2936_v1 }
 0x2b8   : > { %v3431_v51 = vrot.slane %v1290_v50, %v3165_v28 }
 0x2b9   : > { %2126 = vst [vmem:[%s3354_s30 + $0x10] sm:$0xff] %v1255_v56  ;;  %v1256_v59 = vmax.f32 %v1211_v57, 0.0 }
 0x2bb   : > { %v1267_v60 = vpack.c.bf16 %v1256_v59, %v1255_v56  ;;  %2127 = vst [vmem:[%s3354_s30 + $0x18] sm:$0xff] %v1256_v59 }
 0x2bc   : > { %v1215_v61 = vpop.f32.mrb[36].mxu0 }
 0x2bd   : > { %v1216_v62 = vadd.f32 %v1215_v61, %v3347_v41  ;;  %v2634_v63 = vpop.f32.mrb[37].mxu0  ;;  %2673 = vmatmul.mubr.bf16.vlgmr.msra.gmra.mrb[28].mxu1 %v1267_v60 }
 0x2be   : > { %v1218_v0 = vpop.f32.mrb[38].mxu0  ;;  %2676 = vmatprep.mubr.msk.bf16.mxu1 %vm2937_vm0, %v2936_v1  ;;  %2727 = vmatpush3.bf16.msra.mxu1 %v2908_v43  ;;  %v2919_v43 = vld [vmem:[%s3703_s13 + $0x18] sm:$0xff]  }
 0x2bf   : > { %v1257_v2 = vmax.f32 %v1216_v62, 0.0  ;;  %v1219_v3 = vadd.f32 %v1218_v0, %v3347_v41  ;;  %v2635_v4 = vpop.f32.mrb[39].mxu0  ;;  %2728 = vmatprep.subr.bf16.mxu1 %v2936_v1 }
 0x2c1   : > { %2128 = vst [vmem:[%s3354_s30 + $0x20] sm:$0xff] %v1257_v2  ;;  %v1258_v5 = vmax.f32 %v1219_v3, 0.0 }
 0x2c3   : > { %v1268_v6 = vpack.c.bf16 %v1258_v5, %v1257_v2  ;;  %2129 = vst [vmem:[%s3354_s30 + $0x28] sm:$0xff] %v1258_v5 }
 0x2c4   : > { %v1223_v7 = vpop.f32.mrb[40].mxu0 }
 0x2c5   : > { %v1224_v8 = vadd.f32 %v1223_v7, %v3347_v41  ;;  %v2638_v9 = vpop.f32.mrb[41].mxu0  ;;  %2677 = vmatmul.mubr.bf16.gmra.mrb[32].mxu1 %v1268_v6 }
 0x2c6   : > { %v1226_v10 = vpop.f32.mrb[42].mxu0  ;;  %2680 = vmatprep.mubr.msk.bf16.mxu1 %vm2937_vm0, %v2936_v1 }
 0x2c7   : > { %v1259_v11 = vmax.f32 %v1224_v8, 0.0  ;;  %v1227_v12 = vadd.f32 %v1226_v10, %v3347_v41  ;;  %v2639_v13 = vpop.f32.mrb[43].mxu0 }
 0x2c9   : > { %2130 = vst [vmem:[%s3354_s30 + $0x30] sm:$0xff] %v1259_v11  ;;  %v1260_v14 = vmax.f32 %v1227_v12, 0.0 }
 0x2cb   : > { %v1269_v15 = vpack.c.bf16 %v1260_v14, %v1259_v11  ;;  %2131 = vst [vmem:[%s3354_s30 + $0x38] sm:$0xff] %v1260_v14 }
 0x2cc   : > { %v1231_v16 = vpop.f32.mrb[44].mxu0 }
 0x2cd   : > { %v1232_v17 = vadd.f32 %v1231_v16, %v3347_v41  ;;  %v2642_v18 = vpop.f32.mrb[45].mxu0  ;;  %2681 = vmatmul.mubr.bf16.gmra.mrb[36].mxu1 %v1269_v15 }
 0x2ce   : > { %v1234_v19 = vpop.f32.mrb[46].mxu0  ;;  %2684 = vmatprep.mubr.msk.bf16.mxu1 %vm2937_vm0, %v2936_v1 }
 0x2cf   : > { %v1261_v20 = vmax.f32 %v1232_v17, 0.0  ;;  %v1235_v21 = vadd.f32 %v1234_v19, %v3347_v41  ;;  %v2643_v22 = vpop.f32.mrb[47].mxu0 }
 0x2d1   : > { %2132 = vst [vmem:[%s3354_s30 + $0x40] sm:$0xff] %v1261_v20  ;;  %v1262_v23 = vmax.f32 %v1235_v21, 0.0 }
 0x2d3   : > { %v1270_v24 = vpack.c.bf16 %v1262_v23, %v1261_v20  ;;  %2133 = vst [vmem:[%s3354_s30 + $0x48] sm:$0xff] %v1262_v23 }
 0x2d4   : > { %v1239_v25 = vpop.f32.mrb[48].mxu0 }
 0x2d5   : > { %v1240_v26 = vadd.f32 %v1239_v25, %v3347_v41  ;;  %v2646_v27 = vpop.f32.mrb[49].mxu0  ;;  %2685 = vmatmul.mubr.bf16.gmra.mrb[40].mxu1 %v1270_v24 }
 0x2d6   : > { %v1242_v30 = vpop.f32.mrb[50].mxu0  ;;  %2688 = vmatprep.mubr.msk.bf16.mxu1 %vm2937_vm0, %v2936_v1 }
 0x2d7   : > { %v1263_v29 = vmax.f32 %v1240_v26, 0.0  ;;  %v1243_v31 = vadd.f32 %v1242_v30, %v3347_v41  ;;  %v2647_v32 = vpop.f32.mrb[51].mxu0 }
 0x2d9   : > { %2134 = vst [vmem:[%s3354_s30 + $0x50] sm:$0xff] %v1263_v29  ;;  %v1264_v33 = vmax.f32 %v1243_v31, 0.0 }
 0x2db   : > { %v1271_v34 = vpack.c.bf16 %v1264_v33, %v1263_v29  ;;  %2135 = vst [vmem:[%s3354_s30 + $0x58] sm:$0xff] %v1264_v33 }
 0x2dc   : > { %v1247_v35 = vpop.f32.mrb[52].mxu0 }
 0x2dd   : > { %2689 = vmatmul.mubr.bf16.gmra.mrb[44].mxu1 %v1271_v34  ;;  %v1248_v36 = vadd.f32 %v1247_v35, %v3347_v41  ;;  %v2650_v37 = vpop.f32.mrb[53].mxu0  ;;  %v2909_v41 = vld [vmem:[%s3701_s11 + $0x8] sm:$0xff]  }
 0x2de   : > { %v1250_v38 = vpop.f32.mrb[54].mxu0  ;;  %2692 = vmatprep.mubr.msk.bf16.mxu1 %vm2937_vm0, %v2936_v1  ;;  %2729 = vmatpush3.bf16.msra.mxu1 %v2909_v41  ;;  %v1440_v41 = vld [vmem:[%s3700_s10] sm:$0x1] }
 0x2df   : > { %v1265_v39 = vmax.f32 %v1248_v36, 0.0  ;;  %v2651_v40 = vpop.f32.mrb[55].mxu0  ;;  %2730 = vmatprep.subr.bf16.mxu1 %v2936_v1  ;;  %v2915_v38 = vld [vmem:[%s3701_s11 + $0x38] sm:$0xff]  }
 0x2e0   : > { %v2917_v40 = vld [vmem:[%s3703_s13 + $0x8] sm:$0xff]  }
 0x2e1   : > { %v1272_v42 = vpack.c.bf16 %v1265_v39, %v1265_v39  ;;  %2136 = vst [vmem:[%s3354_s30 + $0x60] sm:$0xff] %v1265_v39  ;;  %v2916_v39 = vld [vmem:[%s3703_s13] sm:$0xff]  }
 0x2e2   : > { %2731 = vmatpush3.bf16.msra.mxu1 %v2910_v44  ;;  %v1441_v44 = vunpack.c.l.bf16 %v1440_v41 }
 0x2e3   : > { %2732 = vmatprep.subr.bf16.mxu1 %v2936_v1 }
 0x2e5   : > { %2693 = vmatmul.mubr.bf16.gmra.mrb[48].mxu1 %v1272_v42  ;;  %v2918_v42 = vld [vmem:[%s3703_s13 + $0x10] sm:$0xff]  }
 0x2e6   : > { %2742 = vmatprep.mubr.msk.bf16.mxu1 %vm2937_vm0, %v2936_v1  ;;  %2733 = vmatpush3.bf16.msra.mxu1 %v2911_v45  ;;  %v3522_v45 = vrot.slane %v1441_v44, %v3165_v28 }
 0x2e7   : > { %2734 = vmatprep.subr.bf16.mxu1 %v2936_v1 }
 0x2ea   : > { %2735 = vmatpush3.bf16.msra.mxu1 %v2912_v46 }
 0x2eb   : > { %2736 = vmatprep.subr.bf16.mxu1 %v2936_v1 }
 0x2ee   : > { %2737 = vmatpush3.bf16.msra.mxu1 %v2913_v47 }
 0x2ef   : > { %2738 = vmatprep.subr.bf16.mxu1 %v2936_v1 }
 0x2f2   : > { %2739 = vmatpush3.bf16.msra.mxu1 %v2914_v48 }
 0x2f3   : > { %2740 = vmatprep.subr.bf16.mxu1 %v2936_v1 }
 0x2f6   : > { %2741 = vmatpush3.bf16.msra.mxu1 %v2915_v38 }
 0x2f7   : > { %2806 = vmatprep.subr.bf16.mxu1 %v2936_v1 }
 0x388   : > { %v1377_v52 = vpop.f32.mrb[56].mxu0 }
 0x389   : > { %v1378_v53 = vadd.f32 %v1377_v52, %v3431_v51  ;;  %v2670_v54 = vpop.f32.mrb[57].mxu0 }
 0x38a   : > { %v1380_v55 = vpop.f32.mrb[58].mxu0 }
 0x38b   : > { %2137 = vst.msk [vmem:[%s3437_s25] sm:$0xff] %vm1452_vm2, %v1378_v53  ;;  %v1381_v56 = vadd.f32 %v1380_v55, %v3431_v51  ;;  %v2671_v57 = vpop.f32.mrb[59].mxu0 }
 0x38d   : > { %v1431_v58 = vpack.c.bf16 %v1381_v56, %v1378_v53  ;;  %2138 = vst.msk [vmem:[%s3437_s25 + $0x8] sm:$0xff] %vm1452_vm2, %v1381_v56 }
 0x38f   : > { %2699 = vmatmul.mubr.msk.bf16.vlgmr.msra.gmra.mrb[60].mxu0 %vm1452_vm2, %v1431_v58 }
 0x390   : > { %v1385_v59 = vpop.f32.mrb[28].mxu1  ;;  %2702 = vmatprep.mubr.msk.bf16.mxu0 %vm2937_vm0, %v2936_v1  ;;  %2771 = vmatpush3.bf16.msra.mxu0 %v2916_v39 }
 0x391   : > { %v1386_v60 = vadd.f32 %v1385_v59, %v3431_v51  ;;  %v2674_v61 = vpop.f32.mrb[29].mxu1  ;;  %2772 = vmatprep.subr.bf16.mxu0 %v2936_v1 }
 0x392   : > { %v1388_v62 = vpop.f32.mrb[30].mxu1 }
 0x393   : > { %2139 = vst.msk [vmem:[%s3437_s25 + $0x10] sm:$0xff] %vm1452_vm2, %v1386_v60  ;;  %v1389_v63 = vadd.f32 %v1388_v62, %v3431_v51  ;;  %v2675_v0 = vpop.f32.mrb[31].mxu1 }
 0x394   : > { %2773 = vmatpush3.bf16.msra.mxu0 %v2917_v40 }
 0x395   : > { %v1432_v2 = vpack.c.bf16 %v1389_v63, %v1386_v60  ;;  %2140 = vst.msk [vmem:[%s3437_s25 + $0x18] sm:$0xff] %vm1452_vm2, %v1389_v63  ;;  %2774 = vmatprep.subr.bf16.mxu0 %v2936_v1 }
 0x397   : > { %2703 = vmatmul.mubr.msk.bf16.gmra.mrb[64].mxu0 %vm1452_vm2, %v1432_v2 }
 0x398   : > { %v1393_v3 = vpop.f32.mrb[32].mxu1  ;;  %2706 = vmatprep.mubr.msk.bf16.mxu0 %vm2937_vm0, %v2936_v1  ;;  %2775 = vmatpush3.bf16.msra.mxu0 %v2918_v42 }
 0x399   : > { %v1394_v4 = vadd.f32 %v1393_v3, %v3431_v51  ;;  %v2678_v5 = vpop.f32.mrb[33].mxu1  ;;  %2776 = vmatprep.subr.bf16.mxu0 %v2936_v1 }
 0x39a   : > { %v1396_v6 = vpop.f32.mrb[34].mxu1 }
 0x39b   : > { %2141 = vst.msk [vmem:[%s3437_s25 + $0x20] sm:$0xff] %vm1452_vm2, %v1394_v4  ;;  %v1397_v7 = vadd.f32 %v1396_v6, %v3431_v51  ;;  %v2679_v8 = vpop.f32.mrb[35].mxu1 }
 0x39c   : > { %2777 = vmatpush3.bf16.msra.mxu0 %v2919_v43 }
 0x39d   : > { %v1433_v9 = vpack.c.bf16 %v1397_v7, %v1394_v4  ;;  %2142 = vst.msk [vmem:[%s3437_s25 + $0x28] sm:$0xff] %vm1452_vm2, %v1397_v7 }
 0x39f   : > { %2707 = vmatmul.mubr.msk.bf16.gmra.mrb[68].mxu0 %vm1452_vm2, %v1433_v9 }
 0x3a0   : > { %v1401_v10 = vpop.f32.mrb[36].mxu1  ;;  %2710 = vmatprep.mubr.msk.bf16.mxu0 %vm2937_vm0, %v2936_v1 }
 0x3a1   : > { %v1402_v11 = vadd.f32 %v1401_v10, %v3431_v51  ;;  %v2682_v12 = vpop.f32.mrb[37].mxu1 }
 0x3a2   : > { %v1404_v13 = vpop.f32.mrb[38].mxu1 }
 0x3a3   : > { %2143 = vst.msk [vmem:[%s3437_s25 + $0x30] sm:$0xff] %vm1452_vm2, %v1402_v11  ;;  %v1405_v14 = vadd.f32 %v1404_v13, %v3431_v51  ;;  %v2683_v15 = vpop.f32.mrb[39].mxu1 }
 0x3a5   : > { %v1434_v16 = vpack.c.bf16 %v1405_v14, %v1402_v11  ;;  %2144 = vst.msk [vmem:[%s3437_s25 + $0x38] sm:$0xff] %vm1452_vm2, %v1405_v14 }
 0x3a7   : > { %2711 = vmatmul.mubr.msk.bf16.gmra.mrb[72].mxu0 %vm1452_vm2, %v1434_v16 }
 0x3a8   : > { %v1409_v17 = vpop.f32.mrb[40].mxu1  ;;  %2714 = vmatprep.mubr.msk.bf16.mxu0 %vm2937_vm0, %v2936_v1 }
 0x3a9   : > { %v1410_v18 = vadd.f32 %v1409_v17, %v3431_v51  ;;  %v2686_v19 = vpop.f32.mrb[41].mxu1 }
 0x3aa   : > { %v1412_v20 = vpop.f32.mrb[42].mxu1 }
 0x3ab   : > { %2145 = vst.msk [vmem:[%s3437_s25 + $0x40] sm:$0xff] %vm1452_vm2, %v1410_v18  ;;  %v1413_v21 = vadd.f32 %v1412_v20, %v3431_v51  ;;  %v2687_v22 = vpop.f32.mrb[43].mxu1 }
 0x3ad   : > { %v1435_v23 = vpack.c.bf16 %v1413_v21, %v1410_v18  ;;  %2146 = vst.msk [vmem:[%s3437_s25 + $0x48] sm:$0xff] %vm1452_vm2, %v1413_v21 }
 0x3af   : > { %2715 = vmatmul.mubr.msk.bf16.gmra.mrb[76].mxu0 %vm1452_vm2, %v1435_v23 }
 0x3b0   : > { %v1417_v24 = vpop.f32.mrb[44].mxu1  ;;  %2718 = vmatprep.mubr.msk.bf16.mxu0 %vm2937_vm0, %v2936_v1 }
 0x3b1   : > { %v1418_v25 = vadd.f32 %v1417_v24, %v3431_v51  ;;  %v2690_v26 = vpop.f32.mrb[45].mxu1 }
 0x3b2   : > { %v1420_v27 = vpop.f32.mrb[46].mxu1 }
 0x3b3   : > { %2147 = vst.msk [vmem:[%s3437_s25 + $0x50] sm:$0xff] %vm1452_vm2, %v1418_v25  ;;  %v1421_v30 = vadd.f32 %v1420_v27, %v3431_v51  ;;  %v2691_v29 = vpop.f32.mrb[47].mxu1 }
 0x3b5   : > { %v1436_v31 = vpack.c.bf16 %v1421_v30, %v1418_v25  ;;  %2148 = vst.msk [vmem:[%s3437_s25 + $0x58] sm:$0xff] %vm1452_vm2, %v1421_v30 }
 0x3b7   : > { %2719 = vmatmul.mubr.msk.bf16.gmra.mrb[80].mxu0 %vm1452_vm2, %v1436_v31 }
 0x3b8   : > { %v1425_v32 = vpop.f32.mrb[48].mxu1  ;;  %2722 = vmatprep.mubr.msk.bf16.mxu0 %vm2937_vm0, %v2936_v1 }
 0x3b9   : > { %v1426_v33 = vadd.f32 %v1425_v32, %v3431_v51  ;;  %v2694_v34 = vpop.f32.mrb[49].mxu1 }
 0x3ba   : > { %v1428_v35 = vpop.f32.mrb[50].mxu1 }
 0x3bb   : > { %v1437_v36 = vpack.c.bf16 %v1426_v33, %v1426_v33  ;;  %2149 = vst.msk [vmem:[%s3437_s25 + $0x60] sm:$0xff] %vm1452_vm2, %v1426_v33  ;;  %v2695_v37 = vpop.f32.mrb[51].mxu1 }
 0x3bf   : > { %2723 = vmatmul.mubr.msk.bf16.gmra.mrb[84].mxu0 %vm1452_vm2, %v1437_v36 }
 0x3c0   : > { %2778 = vmatprep.mubr.msk.bf16.mxu0 %vm2937_vm0, %v2936_v1 }
 0x462   : > { %v1508_v46 = vpop.f32.mrb[60].mxu0 }
 0x463   : > { %v1509_v47 = vadd.f32 %v1508_v46, %v3522_v45  ;;  %v2700_v48 = vpop.f32.mrb[61].mxu0  ;;  %v2920_v46 = vld [vmem:[%s3705_s15] sm:$0xff]  }
 0x464   : > { %v1511_v49 = vpop.f32.mrb[62].mxu0  ;;  %v2923_v48 = vld [vmem:[%s3705_s15 + $0x18] sm:$0xff]  }
 0x465   : > { %v1512_v50 = vadd.f32 %v1511_v49, %v3522_v45  ;;  %v2701_v51 = vpop.f32.mrb[63].mxu0  ;;  %v1562_v52 = vmax.f32 %v1509_v47, 0.0  ;;  %v2922_v47 = vld [vmem:[%s3705_s15 + $0x10] sm:$0xff]   ;;  %v2924_v49 = vld [vmem:[%s3705_s15 + $0x20] sm:$0xff]  }
 0x466   : > { %v2926_v51 = vld [vmem:[%s3705_s15 + $0x30] sm:$0xff]  }
 0x467   : > { %v1563_v53 = vmax.f32 %v1512_v50, 0.0  ;;  %v2925_v50 = vld [vmem:[%s3705_s15 + $0x28] sm:$0xff]  }
 0x469   : > { %v1575_v54 = vpack.c.bf16 %v1563_v53, %v1562_v52  ;;  %v1598_v52 = vld [vmem:[%s3702_s12] sm:$0x1] }
 0x46a   : > { %v1516_v55 = vpop.f32.mrb[64].mxu0  ;;  %v1599_v53 = vunpack.c.l.bf16 %v1598_v52 }
 0x46b   : > { %v1517_v56 = vadd.f32 %v1516_v55, %v3522_v45  ;;  %v2704_v57 = vpop.f32.mrb[65].mxu0  ;;  %2743 = vmatmul.mubr.bf16.vlgmr.msra.gmra.mrb[52].mxu1 %v1575_v54 }
 0x46c   : > { %v1519_v58 = vpop.f32.mrb[66].mxu0  ;;  %2746 = vmatprep.mubr.msk.bf16.mxu1 %vm2937_vm0, %v2936_v1  ;;  %2807 = vmatpush3.bf16.msra.mxu1 %v2920_v46  ;;  %v3583_v54 = vrot.slane %v1599_v53, %v3165_v28 }
 0x46d   : > { %v1520_v59 = vadd.f32 %v1519_v58, %v3522_v45  ;;  %v2705_v60 = vpop.f32.mrb[67].mxu0  ;;  %v1564_v61 = vmax.f32 %v1517_v56, 0.0  ;;  %2808 = vmatprep.subr.bf16.mxu1 %v2936_v1 }
 0x46f   : > { %v1565_v62 = vmax.f32 %v1520_v59, 0.0 }
 0x471   : > { %v1576_v63 = vpack.c.bf16 %v1565_v62, %v1564_v61 }
 0x472   : > { %v1524_v0 = vpop.f32.mrb[68].mxu0 }
 0x473   : > { %v1525_v2 = vadd.f32 %v1524_v0, %v3522_v45  ;;  %v2708_v3 = vpop.f32.mrb[69].mxu0  ;;  %2747 = vmatmul.mubr.bf16.gmra.mrb[56].mxu1 %v1576_v63 }
 0x474   : > { %v1527_v4 = vpop.f32.mrb[70].mxu0  ;;  %2750 = vmatprep.mubr.msk.bf16.mxu1 %vm2937_vm0, %v2936_v1 }
 0x475   : > { %v1528_v5 = vadd.f32 %v1527_v4, %v3522_v45  ;;  %v2709_v6 = vpop.f32.mrb[71].mxu0  ;;  %v1566_v7 = vmax.f32 %v1525_v2, 0.0 }
 0x477   : > { %v1567_v8 = vmax.f32 %v1528_v5, 0.0 }
 0x479   : > { %v1577_v9 = vpack.c.bf16 %v1567_v8, %v1566_v7 }
 0x47a   : > { %v1532_v10 = vpop.f32.mrb[72].mxu0 }
 0x47b   : > { %v1533_v11 = vadd.f32 %v1532_v10, %v3522_v45  ;;  %v2712_v12 = vpop.f32.mrb[73].mxu0  ;;  %2751 = vmatmul.mubr.bf16.gmra.mrb[60].mxu1 %v1577_v9 }
 0x47c   : > { %v1535_v13 = vpop.f32.mrb[74].mxu0  ;;  %2754 = vmatprep.mubr.msk.bf16.mxu1 %vm2937_vm0, %v2936_v1 }
 0x47d   : > { %v1536_v14 = vadd.f32 %v1535_v13, %v3522_v45  ;;  %v2713_v15 = vpop.f32.mrb[75].mxu0  ;;  %v1568_v16 = vmax.f32 %v1533_v11, 0.0 }
 0x47f   : > { %v1569_v17 = vmax.f32 %v1536_v14, 0.0 }
 0x481   : > { %v1578_v18 = vpack.c.bf16 %v1569_v17, %v1568_v16 }
 0x482   : > { %v1540_v19 = vpop.f32.mrb[76].mxu0 }
 0x483   : > { %v1541_v20 = vadd.f32 %v1540_v19, %v3522_v45  ;;  %v2716_v21 = vpop.f32.mrb[77].mxu0  ;;  %2755 = vmatmul.mubr.bf16.gmra.mrb[64].mxu1 %v1578_v18 }
 0x484   : > { %v1543_v22 = vpop.f32.mrb[78].mxu0  ;;  %2758 = vmatprep.mubr.msk.bf16.mxu1 %vm2937_vm0, %v2936_v1 }
 0x485   : > { %v1544_v23 = vadd.f32 %v1543_v22, %v3522_v45  ;;  %v2717_v24 = vpop.f32.mrb[79].mxu0  ;;  %v1570_v25 = vmax.f32 %v1541_v20, 0.0 }
 0x487   : > { %v1571_v26 = vmax.f32 %v1544_v23, 0.0 }
 0x489   : > { %v1579_v27 = vpack.c.bf16 %v1571_v26, %v1570_v25 }
 0x48a   : > { %v1548_v30 = vpop.f32.mrb[80].mxu0 }
 0x48b   : > { %v1549_v29 = vadd.f32 %v1548_v30, %v3522_v45  ;;  %v2720_v31 = vpop.f32.mrb[81].mxu0  ;;  %2759 = vmatmul.mubr.bf16.gmra.mrb[68].mxu1 %v1579_v27 }
 0x48c   : > { %v1551_v32 = vpop.f32.mrb[82].mxu0  ;;  %2762 = vmatprep.mubr.msk.bf16.mxu1 %vm2937_vm0, %v2936_v1 }
 0x48d   : > { %v1552_v33 = vadd.f32 %v1551_v32, %v3522_v45  ;;  %v2721_v34 = vpop.f32.mrb[83].mxu0  ;;  %v1572_v35 = vmax.f32 %v1549_v29, 0.0 }
 0x48f   : > { %v1573_v36 = vmax.f32 %v1552_v33, 0.0 }
 0x491   : > { %v1580_v37 = vpack.c.bf16 %v1573_v36, %v1572_v35 }
 0x492   : > { %v1556_v38 = vpop.f32.mrb[84].mxu0 }
 0x493   : > { %2763 = vmatmul.mubr.bf16.gmra.mrb[72].mxu1 %v1580_v37  ;;  %v1557_v39 = vadd.f32 %v1556_v38, %v3522_v45  ;;  %v2724_v40 = vpop.f32.mrb[85].mxu0  ;;  %v2921_v45 = vld [vmem:[%s3705_s15 + $0x8] sm:$0xff]  }
 0x494   : > { %v1559_v42 = vpop.f32.mrb[86].mxu0  ;;  %2766 = vmatprep.mubr.msk.bf16.mxu1 %vm2937_vm0, %v2936_v1  ;;  %2809 = vmatpush3.bf16.msra.mxu1 %v2921_v45 }
 0x495   : > { %v1574_v43 = vmax.f32 %v1557_v39, 0.0  ;;  %v2725_v41 = vpop.f32.mrb[87].mxu0  ;;  %2810 = vmatprep.subr.bf16.mxu1 %v2936_v1 }
 0x497   : > { %v1581_v44 = vpack.c.bf16 %v1574_v43, %v1574_v43 }
 0x498   : > { %2811 = vmatpush3.bf16.msra.mxu1 %v2922_v47 }
 0x499   : > { %2812 = vmatprep.subr.bf16.mxu1 %v2936_v1 }
 0x49b   : > { %2767 = vmatmul.mubr.bf16.gmra.mrb[76].mxu1 %v1581_v44 }
 0x49c   : > { %2822 = vmatprep.mubr.msk.bf16.mxu1 %vm2937_vm0, %v2936_v1  ;;  %2813 = vmatpush3.bf16.msra.mxu1 %v2923_v48 }
 0x49d   : > { %2814 = vmatprep.subr.bf16.mxu1 %v2936_v1 }
 0x4a0   : > { %2815 = vmatpush3.bf16.msra.mxu1 %v2924_v49 }
 0x4a1   : > { %2816 = vmatprep.subr.bf16.mxu1 %v2936_v1 }
 0x4a4   : > { %2817 = vmatpush3.bf16.msra.mxu1 %v2925_v50 }
 0x4a5   : > { %2818 = vmatprep.subr.bf16.mxu1 %v2936_v1 }
 0x4a8   : > { %2819 = vmatpush3.bf16.msra.mxu1 %v2926_v51 }
 0x4a9   : > { %2820 = vmatprep.subr.bf16.mxu1 %v2936_v1 }
 0x53e   : > { %v1686_v55 = vpop.f32.mrb[52].mxu1 }
 0x53f   : > { %v1687_v56 = vadd.f32 %v1686_v55, %v3583_v54  ;;  %v2744_v57 = vpop.f32.mrb[53].mxu1  ;;  %v2927_v55 = vld [vmem:[%s3705_s15 + $0x38] sm:$0xff]  }
 0x540   : > { %v1689_v58 = vpop.f32.mrb[54].mxu1  ;;  %2821 = vmatpush3.bf16.msra.mxu1 %v2927_v55 }
 0x541   : > { %v1690_v59 = vadd.f32 %v1689_v58, %v3583_v54  ;;  %v2745_v60 = vpop.f32.mrb[55].mxu1  ;;  %v1740_v61 = vmax.f32 %v1687_v56, 0.0 }
 0x543   : > { %v1741_v62 = vmax.f32 %v1690_v59, 0.0 }
 0x545   : > { %v1753_v63 = vpack.c.bf16 %v1741_v62, %v1740_v61 }
 0x546   : > { %v1694_v0 = vpop.f32.mrb[56].mxu1 }
 0x547   : > { %v1695_v2 = vadd.f32 %v1694_v0, %v3583_v54  ;;  %v2748_v3 = vpop.f32.mrb[57].mxu1  ;;  %2779 = vmatmul.mubr.msk.bf16.vlgmr.msra.gmra.mrb[88].mxu0 %vm798_vm1, %v1753_v63 }
 0x548   : > { %v1697_v4 = vpop.f32.mrb[58].mxu1  ;;  %2782 = vmatprep.mubr.msk.bf16.mxu0 %vm2937_vm0, %v2936_v1 }
 0x549   : > { %v1698_v5 = vadd.f32 %v1697_v4, %v3583_v54  ;;  %v2749_v6 = vpop.f32.mrb[59].mxu1  ;;  %v1742_v7 = vmax.f32 %v1695_v2, 0.0 }
 0x54b   : > { %v1743_v8 = vmax.f32 %v1698_v5, 0.0 }
 0x54d   : > { %v1754_v9 = vpack.c.bf16 %v1743_v8, %v1742_v7 }
 0x54e   : > { %v1702_v10 = vpop.f32.mrb[60].mxu1 }
 0x54f   : > { %v1703_v11 = vadd.f32 %v1702_v10, %v3583_v54  ;;  %v2752_v12 = vpop.f32.mrb[61].mxu1  ;;  %2783 = vmatmul.mubr.msk.bf16.gmra.mrb[92].mxu0 %vm798_vm1, %v1754_v9 }
 0x550   : > { %v1705_v13 = vpop.f32.mrb[62].mxu1  ;;  %2786 = vmatprep.mubr.msk.bf16.mxu0 %vm2937_vm0, %v2936_v1 }
 0x551   : > { %v1706_v14 = vadd.f32 %v1705_v13, %v3583_v54  ;;  %v2753_v15 = vpop.f32.mrb[63].mxu1  ;;  %v1744_v16 = vmax.f32 %v1703_v11, 0.0 }
 0x553   : > { %v1745_v17 = vmax.f32 %v1706_v14, 0.0 }
 0x555   : > { %v1755_v18 = vpack.c.bf16 %v1745_v17, %v1744_v16 }
 0x556   : > { %v1710_v19 = vpop.f32.mrb[64].mxu1 }
 0x557   : > { %v1711_v20 = vadd.f32 %v1710_v19, %v3583_v54  ;;  %v2756_v21 = vpop.f32.mrb[65].mxu1  ;;  %2787 = vmatmul.mubr.msk.bf16.gmra.mrb[96].mxu0 %vm798_vm1, %v1755_v18 }
 0x558   : > { %v1713_v22 = vpop.f32.mrb[66].mxu1  ;;  %2790 = vmatprep.mubr.msk.bf16.mxu0 %vm2937_vm0, %v2936_v1 }
 0x559   : > { %v1714_v23 = vadd.f32 %v1713_v22, %v3583_v54  ;;  %v2757_v24 = vpop.f32.mrb[67].mxu1  ;;  %v1746_v25 = vmax.f32 %v1711_v20, 0.0 }
 0x55b   : > { %v1747_v26 = vmax.f32 %v1714_v23, 0.0 }
 0x55d   : > { %v1756_v27 = vpack.c.bf16 %v1747_v26, %v1746_v25 }
 0x55e   : > { %v1718_v30 = vpop.f32.mrb[68].mxu1 }
 0x55f   : > { %v1719_v29 = vadd.f32 %v1718_v30, %v3583_v54  ;;  %v2760_v31 = vpop.f32.mrb[69].mxu1  ;;  %2791 = vmatmul.mubr.msk.bf16.gmra.mrb[100].mxu0 %vm798_vm1, %v1756_v27 }
 0x560   : > { %v1721_v32 = vpop.f32.mrb[70].mxu1  ;;  %2794 = vmatprep.mubr.msk.bf16.mxu0 %vm2937_vm0, %v2936_v1 }
 0x561   : > { %v1722_v33 = vadd.f32 %v1721_v32, %v3583_v54  ;;  %v2761_v34 = vpop.f32.mrb[71].mxu1  ;;  %v1748_v35 = vmax.f32 %v1719_v29, 0.0 }
 0x563   : > { %v1749_v36 = vmax.f32 %v1722_v33, 0.0 }
 0x565   : > { %v1757_v37 = vpack.c.bf16 %v1749_v36, %v1748_v35 }
 0x566   : > { %v1726_v38 = vpop.f32.mrb[72].mxu1 }
 0x567   : > { %v1727_v39 = vadd.f32 %v1726_v38, %v3583_v54  ;;  %v2764_v40 = vpop.f32.mrb[73].mxu1  ;;  %2795 = vmatmul.mubr.msk.bf16.gmra.mrb[104].mxu0 %vm798_vm1, %v1757_v37 }
 0x568   : > { %v1729_v42 = vpop.f32.mrb[74].mxu1  ;;  %2798 = vmatprep.mubr.msk.bf16.mxu0 %vm2937_vm0, %v2936_v1 }
 0x569   : > { %v1730_v43 = vadd.f32 %v1729_v42, %v3583_v54  ;;  %v2765_v41 = vpop.f32.mrb[75].mxu1  ;;  %v1750_v44 = vmax.f32 %v1727_v39, 0.0 }
 0x56b   : > { %v1751_v46 = vmax.f32 %v1730_v43, 0.0 }
 0x56d   : > { %v1758_v45 = vpack.c.bf16 %v1751_v46, %v1750_v44 }
 0x56e   : > { %v1734_v47 = vpop.f32.mrb[76].mxu1 }
 0x56f   : > { %v1735_v48 = vadd.f32 %v1734_v47, %v3583_v54  ;;  %2799 = vmatmul.mubr.msk.bf16.gmra.mrb[108].mxu0 %vm798_vm1, %v1758_v45  ;;  %v2768_v49 = vpop.f32.mrb[77].mxu1  ;;  %v1768_v54 = vld [vmem:[%s3704_s14] sm:$0x1] }
 0x570   : > { %v1737_v50 = vpop.f32.mrb[78].mxu1  ;;  %2802 = vmatprep.mubr.msk.bf16.mxu0 %vm2937_vm0, %v2936_v1  ;;  %v1769_v56 = vunpack.c.l.bf16 %v1768_v54 }
 0x571   : > { %v1752_v51 = vmax.f32 %v1735_v48, 0.0  ;;  %v2769_v52 = vpop.f32.mrb[79].mxu1 }
 0x572   : > { %v3624_v57 = vrot.slane %v1769_v56, %v3165_v28 }
 0x573   : > { %v1759_v53 = vpack.c.bf16 %v1752_v51, %v1752_v51 }
 0x577   : > { %2803 = vmatmul.mubr.msk.bf16.gmra.mrb[112].mxu0 %vm798_vm1, %v1759_v53 }
 0x61a   : > { %v1853_v58 = vpop.f32.mrb[88].mxu0 }
 0x61b   : > { %v1854_v59 = vadd.f32 %v1853_v58, %v3624_v57  ;;  %v2780_v60 = vpop.f32.mrb[89].mxu0  ;;  %v1943_v58 = vld [vmem:[%s3706_s16] sm:$0x1] }
 0x61c   : > { %v1856_v61 = vpop.f32.mrb[90].mxu0 }
 0x61d   : > { %v1857_v62 = vadd.f32 %v1856_v61, %v3624_v57  ;;  %v2781_v63 = vpop.f32.mrb[91].mxu0  ;;  %v1907_v0 = vmax.f32 %v1854_v59, 0.0  ;;  %v1944_v59 = vunpack.c.l.bf16 %v1943_v58 }
 0x61f   : > { %v1908_v2 = vmax.f32 %v1857_v62, 0.0  ;;  %v1948_v60 = vrot.slane %v1944_v59, %v3165_v28 }
 0x621   : > { %v1920_v3 = vpack.c.bf16 %v1908_v2, %v1907_v0 }
 0x622   : > { %v1861_v4 = vpop.f32.mrb[92].mxu0 }
 0x623   : > { %v1862_v5 = vadd.f32 %v1861_v4, %v3624_v57  ;;  %v2784_v6 = vpop.f32.mrb[93].mxu0  ;;  %2823 = vmatmul.mubr.bf16.vlgmr.msra.gmra.mrb[80].mxu1 %v1920_v3 }
 0x624   : > { %v1864_v7 = vpop.f32.mrb[94].mxu0  ;;  %2826 = vmatprep.mubr.msk.bf16.mxu1 %vm2937_vm0, %v2936_v1 }
 0x625   : > { %v1865_v8 = vadd.f32 %v1864_v7, %v3624_v57  ;;  %v2785_v9 = vpop.f32.mrb[95].mxu0  ;;  %v1909_v10 = vmax.f32 %v1862_v5, 0.0 }
 0x627   : > { %v1910_v11 = vmax.f32 %v1865_v8, 0.0 }
 0x629   : > { %v1921_v12 = vpack.c.bf16 %v1910_v11, %v1909_v10 }
 0x62a   : > { %v1869_v13 = vpop.f32.mrb[96].mxu0 }
 0x62b   : > { %v1870_v14 = vadd.f32 %v1869_v13, %v3624_v57  ;;  %v2788_v15 = vpop.f32.mrb[97].mxu0  ;;  %2827 = vmatmul.mubr.bf16.gmra.mrb[84].mxu1 %v1921_v12 }
 0x62c   : > { %v1872_v16 = vpop.f32.mrb[98].mxu0  ;;  %2830 = vmatprep.mubr.msk.bf16.mxu1 %vm2937_vm0, %v2936_v1 }
 0x62d   : > { %v1873_v17 = vadd.f32 %v1872_v16, %v3624_v57  ;;  %v2789_v18 = vpop.f32.mrb[99].mxu0  ;;  %v1911_v19 = vmax.f32 %v1870_v14, 0.0 }
 0x62f   : > { %v1912_v20 = vmax.f32 %v1873_v17, 0.0 }
 0x631   : > { %v1922_v21 = vpack.c.bf16 %v1912_v20, %v1911_v19 }
 0x632   : > { %v1877_v22 = vpop.f32.mrb[100].mxu0 }
 0x633   : > { %v1878_v23 = vadd.f32 %v1877_v22, %v3624_v57  ;;  %v2792_v24 = vpop.f32.mrb[101].mxu0  ;;  %2831 = vmatmul.mubr.bf16.gmra.mrb[88].mxu1 %v1922_v21 }
 0x634   : > { %v1880_v25 = vpop.f32.mrb[102].mxu0  ;;  %2834 = vmatprep.mubr.msk.bf16.mxu1 %vm2937_vm0, %v2936_v1 }
 0x635   : > { %v1881_v26 = vadd.f32 %v1880_v25, %v3624_v57  ;;  %v2793_v27 = vpop.f32.mrb[103].mxu0  ;;  %v1913_v30 = vmax.f32 %v1878_v23, 0.0 }
 0x637   : > { %v1914_v29 = vmax.f32 %v1881_v26, 0.0 }
 0x639   : > { %v1923_v31 = vpack.c.bf16 %v1914_v29, %v1913_v30 }
 0x63a   : > { %v1885_v32 = vpop.f32.mrb[104].mxu0 }
 0x63b   : > { %v1886_v33 = vadd.f32 %v1885_v32, %v3624_v57  ;;  %v2796_v34 = vpop.f32.mrb[105].mxu0  ;;  %2835 = vmatmul.mubr.bf16.gmra.mrb[92].mxu1 %v1923_v31 }
 0x63c   : > { %v1888_v35 = vpop.f32.mrb[106].mxu0  ;;  %2838 = vmatprep.mubr.msk.bf16.mxu1 %vm2937_vm0, %v2936_v1 }
 0x63d   : > { %v1889_v36 = vadd.f32 %v1888_v35, %v3624_v57  ;;  %v2797_v37 = vpop.f32.mrb[107].mxu0  ;;  %v1915_v38 = vmax.f32 %v1886_v33, 0.0 }
 0x63f   : > { %v1916_v39 = vmax.f32 %v1889_v36, 0.0 }
 0x641   : > { %v1924_v40 = vpack.c.bf16 %v1916_v39, %v1915_v38 }
 0x642   : > { %v1893_v42 = vpop.f32.mrb[108].mxu0 }
 0x643   : > { %v1894_v43 = vadd.f32 %v1893_v42, %v3624_v57  ;;  %v2800_v41 = vpop.f32.mrb[109].mxu0  ;;  %2839 = vmatmul.mubr.bf16.gmra.mrb[96].mxu1 %v1924_v40 }
 0x644   : > { %v1896_v44 = vpop.f32.mrb[110].mxu0  ;;  %2842 = vmatprep.mubr.msk.bf16.mxu1 %vm2937_vm0, %v2936_v1 }
 0x645   : > { %v1897_v46 = vadd.f32 %v1896_v44, %v3624_v57  ;;  %v2801_v45 = vpop.f32.mrb[111].mxu0  ;;  %v1917_v47 = vmax.f32 %v1894_v43, 0.0 }
 0x647   : > { %v1918_v48 = vmax.f32 %v1897_v46, 0.0 }
 0x649   : > { %v1925_v49 = vpack.c.bf16 %v1918_v48, %v1917_v47 }
 0x64a   : > { %v1901_v50 = vpop.f32.mrb[112].mxu0 }
 0x64b   : > { %v1902_v51 = vadd.f32 %v1901_v50, %v3624_v57  ;;  %v2804_v52 = vpop.f32.mrb[113].mxu0  ;;  %2843 = vmatmul.mubr.bf16.gmra.mrb[100].mxu1 %v1925_v49 }
 0x64c   : > { %v1904_v53 = vpop.f32.mrb[114].mxu0  ;;  %2846 = vmatprep.mubr.msk.bf16.mxu1 %vm2937_vm0, %v2936_v1 }
 0x64d   : > { %v1919_v55 = vmax.f32 %v1902_v51, 0.0  ;;  %v2805_v54 = vpop.f32.mrb[115].mxu0 }
 0x64f   : > { %v1926_v56 = vpack.c.bf16 %v1919_v55, %v1919_v55 }
 0x653   : > { %2847 = vmatmul.mubr.bf16.gmra.mrb[104].mxu1 %v1926_v56 }
 0x6f6   : > { %v2031_v1 = vpop.f32.mrb[80].mxu1 }
 0x6f7   : > { %v2032_v57 = vadd.f32 %v2031_v1, %v1948_v60  ;;  %v2824_v61 = vpop.f32.mrb[81].mxu1 }
 0x6f8   : > { %v2034_v62 = vpop.f32.mrb[82].mxu1 }
 0x6f9   : > { %2085 = vst.msk [vmem:[%s3659_s22] sm:$0xff] %vm798_vm1, %v2032_v57  ;;  %v2035_v63 = vadd.f32 %v2034_v62, %v1948_v60  ;;  %v2825_v0 = vpop.f32.mrb[83].mxu1 }
 0x6fb   : > { %2086 = vst.msk [vmem:[%s3659_s22 + $0x8] sm:$0xff] %vm798_vm1, %v2035_v63 }
 0x6fe   : > { %v2039_v28 = vpop.f32.mrb[84].mxu1 }
 0x6ff   : > { %v2040_v2 = vadd.f32 %v2039_v28, %v1948_v60  ;;  %v2828_v3 = vpop.f32.mrb[85].mxu1 }
 0x700   : > { %v2042_v4 = vpop.f32.mrb[86].mxu1 }
 0x701   : > { %2087 = vst.msk [vmem:[%s3659_s22 + $0x10] sm:$0xff] %vm798_vm1, %v2040_v2  ;;  %v2043_v5 = vadd.f32 %v2042_v4, %v1948_v60  ;;  %v2829_v6 = vpop.f32.mrb[87].mxu1 }
 0x703   : > { %2088 = vst.msk [vmem:[%s3659_s22 + $0x18] sm:$0xff] %vm798_vm1, %v2043_v5 }
 0x706   : > { %v2047_v7 = vpop.f32.mrb[88].mxu1 }
 0x707   : > { %v2048_v8 = vadd.f32 %v2047_v7, %v1948_v60  ;;  %v2832_v9 = vpop.f32.mrb[89].mxu1 }
 0x708   : > { %v2050_v10 = vpop.f32.mrb[90].mxu1 }
 0x709   : > { %2089 = vst.msk [vmem:[%s3659_s22 + $0x20] sm:$0xff] %vm798_vm1, %v2048_v8  ;;  %v2051_v11 = vadd.f32 %v2050_v10, %v1948_v60  ;;  %v2833_v12 = vpop.f32.mrb[91].mxu1 }
 0x70b   : > { %2090 = vst.msk [vmem:[%s3659_s22 + $0x28] sm:$0xff] %vm798_vm1, %v2051_v11 }
 0x70e   : > { %v2055_v13 = vpop.f32.mrb[92].mxu1 }
 0x70f   : > { %v2056_v14 = vadd.f32 %v2055_v13, %v1948_v60  ;;  %v2836_v15 = vpop.f32.mrb[93].mxu1 }
 0x710   : > { %v2058_v16 = vpop.f32.mrb[94].mxu1 }
 0x711   : > { %2091 = vst.msk [vmem:[%s3659_s22 + $0x30] sm:$0xff] %vm798_vm1, %v2056_v14  ;;  %v2059_v17 = vadd.f32 %v2058_v16, %v1948_v60  ;;  %v2837_v18 = vpop.f32.mrb[95].mxu1 }
 0x713   : > { %2092 = vst.msk [vmem:[%s3659_s22 + $0x38] sm:$0xff] %vm798_vm1, %v2059_v17 }
 0x716   : > { %v2063_v19 = vpop.f32.mrb[96].mxu1 }
 0x717   : > { %v2064_v20 = vadd.f32 %v2063_v19, %v1948_v60  ;;  %v2840_v21 = vpop.f32.mrb[97].mxu1 }
 0x718   : > { %v2066_v22 = vpop.f32.mrb[98].mxu1 }
 0x719   : > { %2093 = vst.msk [vmem:[%s3659_s22 + $0x40] sm:$0xff] %vm798_vm1, %v2064_v20  ;;  %v2067_v23 = vadd.f32 %v2066_v22, %v1948_v60  ;;  %v2841_v24 = vpop.f32.mrb[99].mxu1 }
 0x71b   : > { %2094 = vst.msk [vmem:[%s3659_s22 + $0x48] sm:$0xff] %vm798_vm1, %v2067_v23 }
 0x71e   : > { %v2071_v25 = vpop.f32.mrb[100].mxu1 }
 0x71f   : > { %v2072_v26 = vadd.f32 %v2071_v25, %v1948_v60  ;;  %v2844_v27 = vpop.f32.mrb[101].mxu1 }
 0x720   : > { %v2074_v30 = vpop.f32.mrb[102].mxu1 }
 0x721   : > { %2095 = vst.msk [vmem:[%s3659_s22 + $0x50] sm:$0xff] %vm798_vm1, %v2072_v26  ;;  %v2075_v29 = vadd.f32 %v2074_v30, %v1948_v60  ;;  %v2845_v31 = vpop.f32.mrb[103].mxu1 }
 0x723   : > { %2096 = vst.msk [vmem:[%s3659_s22 + $0x58] sm:$0xff] %vm798_vm1, %v2075_v29 }
 0x726   : > { %v2079_v32 = vpop.f32.mrb[104].mxu1 }
 0x727   : > { %v2080_v33 = vadd.f32 %v2079_v32, %v1948_v60  ;;  %v2848_v34 = vpop.f32.mrb[105].mxu1 }
 0x728   : > { %v2082_v35 = vpop.f32.mrb[106].mxu1 }
 0x729   : > { %2097 = vst.msk [vmem:[%s3659_s22 + $0x60] sm:$0xff] %vm798_vm1, %v2080_v33  ;;  %v2849_v36 = vpop.f32.mrb[107].mxu1 }
 0x72a PF: > { %s32_s2 = sadd.s32 1, %s2934_s2  }
 0x72b   : > { %p29_p4 = scmp.ge.s32.totalorder %s32_s2, 4  }
 0x72d   :  { %31 = sbr.rel (!%p29_p4) target bundleno = 7 (0x7), region = 166 }

</bundles_post_ra>
